<compile_context>
chip_gen: v5e
topology: v5e:2x2
jax: 0.10.0
libtpu: 0.0.40
codegen_flags: <defaults>
</compile_context>

<pallas_src>
import functools

import jax
import jax.numpy as jnp
from jax import lax
from jax.experimental import pallas as pl
from jax.experimental.pallas import tpu as pltpu


def _resblock_kernel(x_ref, w_ref, scale_ref, bias_ref, out_ref, xpad_ref):
    """conv3x3(s1,p1,no bias) -> BN(inference) -> +identity -> ReLU -> maxpool(3,2,1).

    x_ref    : (1, H, W, C)   un-padded NHWC input block (one batch element)
    w_ref    : (9*C, C)       im2col conv weights, row = (kh*3 + kw)*C + cin
    scale_ref: (1, C)         gamma / sqrt(running_var + eps)
    bias_ref : (1, C)         beta - running_mean * scale
    out_ref  : (1, HO, WO, C)
    xpad_ref : (H+2, W+2, C)  VMEM scratch: zero-halo buffer, reused as the
                              maxpool padding buffer (zero == -inf post-ReLU)
    """
    Hp, Wp, C = xpad_ref.shape
    H, W = Hp - 2, Wp - 2
    _, HO, WO, _ = out_ref.shape
    f32 = jnp.float32

    # ---- zero only the 1-pixel halo; interior is fully rewritten each step.
    # (Done every step, not @pl.when(first-step), so it stays correct if the
    # grid axis is sharded across TensorCores, each with its own scratch.)
    zrow = jnp.zeros((1, Wp, C), f32)
    zcol = jnp.zeros((Hp, 1, C), f32)
    xpad_ref[0:1, :, :] = zrow
    xpad_ref[Hp - 1:Hp, :, :] = zrow
    xpad_ref[:, 0:1, :] = zcol
    xpad_ref[:, Wp - 1:Wp, :] = zcol
    xpad_ref[1:1 + H, 1:1 + W, :] = x_ref[0].astype(f32)

    # ---- 3x3 conv as ONE im2col matmul: concat the 9 shifted taps along the
    # channel (lane) axis so the tap accumulation happens in the MXU K dim.
    xpad = xpad_ref[...]
    patches = [xpad[kh:kh + H, kw:kw + W, :] for kh in range(3) for kw in range(3)]
    im2col = jnp.concatenate(patches, axis=-1).reshape(H * W, 9 * C)
    acc = jnp.dot(im2col.astype(w_ref.dtype), w_ref[...],
                  preferred_element_type=f32)

    # ---- fused BN (inference) + residual (centre tap == identity) + ReLU (f32 VPU)
    ident = patches[4].reshape(H * W, C)          # kh=1,kw=1 tap IS the identity
    y = jnp.maximum(acc * scale_ref[...] + bias_ref[...] + ident, 0.0)

    # ---- MaxPool2d(kernel=3, stride=2, padding=1): write y back into the
    # zero-halo scratch and take 9 strided reads. Post-ReLU values are >= 0,
    # so the zero border behaves exactly like -inf padding.
    xpad_ref[1:1 + H, 1:1 + W, :] = y.reshape(H, W, C)
    res = xpad_ref[pl.ds(0, HO, 2), pl.ds(0, WO, 2), :]
    for kh in range(3):
        for kw in range(3):
            if kh == 0 and kw == 0:
                continue
            res = jnp.maximum(res, xpad_ref[pl.ds(kh, HO, 2), pl.ds(kw, WO, 2), :])
    out_ref[0] = res.astype(out_ref.dtype)


def basic_resblock_forward(x_nchw, conv_w, gamma, beta, run_mean, run_var,
                           eps=1e-5, matmul_dtype=jnp.float32):
    """NCHW in / NCHW out wrapper around the Pallas kernel (grid over batch)."""
    N, C, H, W = x_nchw.shape
    Cout = conv_w.shape[0]
    assert conv_w.shape == (Cout, C, 3, 3) and Cout == C, "identity add needs Cin == Cout"
    HO = (H + 2 - 3) // 2 + 1
    WO = (W + 2 - 3) // 2 + 1

    x = jnp.transpose(x_nchw, (0, 2, 3, 1)).astype(jnp.float32)        # NHWC, no pad
    # im2col weights: row index = (kh*3 + kw)*C + cin, column = cout.
    w_im2col = jnp.transpose(conv_w, (2, 3, 1, 0)).reshape(9 * C, Cout).astype(matmul_dtype)
    inv_std = 1.0 / jnp.sqrt(run_var.astype(jnp.float32) + eps)
    scale = (gamma * inv_std).reshape(1, Cout).astype(jnp.float32)
    bias = (beta - run_mean * gamma * inv_std).reshape(1, Cout).astype(jnp.float32)

    out_nhwc = pl.pallas_call(
        _resblock_kernel,
        out_shape=jax.ShapeDtypeStruct((N, HO, WO, Cout), jnp.float32),
        grid_spec=pltpu.PrefetchScalarGridSpec(
            num_scalar_prefetch=0,
            grid=(N,),
            in_specs=[
                pl.BlockSpec((1, H, W, C), lambda n: (n, 0, 0, 0)),
                pl.BlockSpec((9 * C, Cout), lambda n: (0, 0)),
                pl.BlockSpec((1, Cout), lambda n: (0, 0)),
                pl.BlockSpec((1, Cout), lambda n: (0, 0)),
            ],
            out_specs=pl.BlockSpec((1, HO, WO, Cout), lambda n: (n, 0, 0, 0)),
            scratch_shapes=[pltpu.VMEM((H + 2, W + 2, C), jnp.float32)],
        ),
        compiler_params=pltpu.CompilerParams(dimension_semantics=("parallel",)),
    )(x, w_im2col, scale, bias)

    return jnp.transpose(out_nhwc, (0, 3, 1, 2))                       # back to NCHW


def _reference_forward(x, conv_w, gamma, beta, run_mean, run_var, eps=1e-5):
    """Pure-JAX reference (same inference-mode BN semantics), NCHW."""
    out = lax.conv_general_dilated(
        x, conv_w, window_strides=(1, 1), padding=((1, 1), (1, 1)),
        dimension_numbers=("NCHW", "OIHW", "NCHW"))
    inv_std = 1.0 / jnp.sqrt(run_var + eps)
    out = (out - run_mean[None, :, None, None]) * inv_std[None, :, None, None]
    out = out * gamma[None, :, None, None] + beta[None, :, None, None]
    out = jnp.maximum(out + x, 0.0)
    out = lax.reduce_window(
        out, -jnp.inf, lax.max,
        window_dimensions=(1, 1, 3, 3),
        window_strides=(1, 1, 2, 2),
        padding=((0, 0), (0, 0), (1, 1), (1, 1)))
    return out


if __name__ == "__main__":
    N, C, H, W = 2, 32, 16, 16   # inplanes = planes = C (required for the residual add)

    key = jax.random.PRNGKey(0)
    kx, kw, kg, kb, km, kv = jax.random.split(key, 6)
    x = jax.random.normal(kx, (N, C, H, W), dtype=jnp.float32)
    conv_w = 0.1 * jax.random.normal(kw, (C, C, 3, 3), dtype=jnp.float32)
    gamma = jax.random.uniform(kg, (C,), minval=0.5, maxval=1.5, dtype=jnp.float32)
    beta = 0.1 * jax.random.normal(kb, (C,), dtype=jnp.float32)
    run_mean = 0.1 * jax.random.normal(km, (C,), dtype=jnp.float32)
    run_var = jax.random.uniform(kv, (C,), minval=0.5, maxval=1.5, dtype=jnp.float32)

    ref = _reference_forward(x, conv_w, gamma, beta, run_mean, run_var)
    assert ref.shape == (N, C, 8, 8), ref.shape

    # f32 MXU path (tight check against the f32 JAX reference).
    fwd_f32 = jax.jit(functools.partial(basic_resblock_forward, matmul_dtype=jnp.float32))
    out_f32 = jax.block_until_ready(fwd_f32(x, conv_w, gamma, beta, run_mean, run_var))
    assert out_f32.shape == ref.shape, (out_f32.shape, ref.shape)
    assert jnp.allclose(out_f32, ref, atol=1e-4, rtol=1e-4), \
        float(jnp.max(jnp.abs(out_f32 - ref)))

    # bf16 MXU-operand path (v5e/v6e): bf16 matmul inputs, f32 accumulate + f32 VPU math.
    fwd_bf16 = jax.jit(functools.partial(basic_resblock_forward, matmul_dtype=jnp.bfloat16))
    out_bf16 = jax.block_until_ready(fwd_bf16(x, conv_w, gamma, beta, run_mean, run_var))
    assert out_bf16.shape == ref.shape, (out_bf16.shape, ref.shape)
    assert jnp.allclose(out_bf16, ref, atol=1e-1, rtol=1e-1), \
        float(jnp.max(jnp.abs(out_bf16 - ref)))

    print("KERNEL_OK")
</pallas_src>

<mosaic_0001>
module attributes {stable_mosaic.version = 11 : i64} {
  func.func @_resblock_kernel(%arg0: i32, %arg1: memref<1x16x16x32xf32, #tpu.memory_space<vmem>>, %arg2: memref<288x32xf32, #tpu.memory_space<vmem>>, %arg3: memref<1x32xf32, #tpu.memory_space<vmem>>, %arg4: memref<1x32xf32, #tpu.memory_space<vmem>>, %arg5: memref<1x8x8x32xf32, #tpu.memory_space<vmem>>, %arg6: memref<18x18x32xf32, #tpu.memory_space<vmem>>) attributes {dimension_semantics = [#tpu.dimension_semantics<parallel>], iteration_bounds = array<i64: 2>, scalar_prefetch = 0 : i64, scratch_operands = 1 : i64, tpu.core_type = #tpu.core_type<tc>, window_params = [{transform_indices = @transform_0, window_bounds = array<i64: 1, 16, 16, 32>}, {pipeline_mode = #tpu.pipeline_mode<synchronous>, transform_indices = @transform_1, window_bounds = array<i64: 288, 32>}, {pipeline_mode = #tpu.pipeline_mode<synchronous>, transform_indices = @transform_2, window_bounds = array<i64: 1, 32>}, {pipeline_mode = #tpu.pipeline_mode<synchronous>, transform_indices = @transform_3, window_bounds = array<i64: 1, 32>}, {transform_indices = @transform_4, window_bounds = array<i64: 1, 8, 8, 32>}]} {
    %cst = arith.constant 0.000000e+00 : f32
    %0 = vector.broadcast %cst : f32 to vector<1x18x32xf32>
    %cst_0 = arith.constant 0.000000e+00 : f32
    %1 = vector.broadcast %cst_0 : f32 to vector<18x1x32xf32>
    %c0 = arith.constant 0 : index
    %c0_1 = arith.constant 0 : index
    %c0_2 = arith.constant 0 : index
    %2 = vector.load %arg6[%c0, %c0_1, %c0_2] : memref<18x18x32xf32, #tpu.memory_space<vmem>>, vector<1x18x32xf32>
    tpu.vector_store %arg6[%c0, %c0_1, %c0_2], %0 {strides = array<i32>} : memref<18x18x32xf32, #tpu.memory_space<vmem>>, vector<1x18x32xf32>,
    %c17 = arith.constant 17 : index
    %c0_3 = arith.constant 0 : index
    %c0_4 = arith.constant 0 : index
    %3 = vector.load %arg6[%c17, %c0_3, %c0_4] : memref<18x18x32xf32, #tpu.memory_space<vmem>>, vector<1x18x32xf32>
    tpu.vector_store %arg6[%c17, %c0_3, %c0_4], %0 {strides = array<i32>} : memref<18x18x32xf32, #tpu.memory_space<vmem>>, vector<1x18x32xf32>,
    %c0_5 = arith.constant 0 : index
    %c0_6 = arith.constant 0 : index
    %c0_7 = arith.constant 0 : index
    %4 = vector.load %arg6[%c0_5, %c0_6, %c0_7] : memref<18x18x32xf32, #tpu.memory_space<vmem>>, vector<18x1x32xf32>
    tpu.vector_store %arg6[%c0_5, %c0_6, %c0_7], %1 {strides = array<i32>} : memref<18x18x32xf32, #tpu.memory_space<vmem>>, vector<18x1x32xf32>,
    %c0_8 = arith.constant 0 : index
    %c17_9 = arith.constant 17 : index
    %c0_10 = arith.constant 0 : index
    %5 = vector.load %arg6[%c0_8, %c17_9, %c0_10] : memref<18x18x32xf32, #tpu.memory_space<vmem>>, vector<18x1x32xf32>
    tpu.vector_store %arg6[%c0_8, %c17_9, %c0_10], %1 {strides = array<i32>} : memref<18x18x32xf32, #tpu.memory_space<vmem>>, vector<18x1x32xf32>,
    %c0_11 = arith.constant 0 : index
    %c0_12 = arith.constant 0 : index
    %c0_13 = arith.constant 0 : index
    %c0_14 = arith.constant 0 : index
    %6 = vector.load %arg1[%c0_11, %c0_12, %c0_13, %c0_14] : memref<1x16x16x32xf32, #tpu.memory_space<vmem>>, vector<1x16x16x32xf32>
    %7 = vector.shape_cast %6 : vector<1x16x16x32xf32> to vector<16x16x32xf32>
    %c1 = arith.constant 1 : index
    %c1_15 = arith.constant 1 : index
    %c0_16 = arith.constant 0 : index
    %8 = vector.load %arg6[%c1, %c1_15, %c0_16] : memref<18x18x32xf32, #tpu.memory_space<vmem>>, vector<16x16x32xf32>
    tpu.vector_store %arg6[%c1, %c1_15, %c0_16], %7 {strides = array<i32>} : memref<18x18x32xf32, #tpu.memory_space<vmem>>, vector<16x16x32xf32>,
    %c0_17 = arith.constant 0 : index
    %c0_18 = arith.constant 0 : index
    %c0_19 = arith.constant 0 : index
    %9 = vector.load %arg6[%c0_17, %c0_18, %c0_19] : memref<18x18x32xf32, #tpu.memory_space<vmem>>, vector<18x18x32xf32>
    %10 = vector.extract_strided_slice %9 {offsets = [0, 0, 0], sizes = [16, 16, 32], strides = [1, 1, 1]} : vector<18x18x32xf32> to vector<16x16x32xf32>
    %11 = vector.extract_strided_slice %9 {offsets = [0, 1, 0], sizes = [16, 16, 32], strides = [1, 1, 1]} : vector<18x18x32xf32> to vector<16x16x32xf32>
    %12 = vector.extract_strided_slice %9 {offsets = [0, 2, 0], sizes = [16, 16, 32], strides = [1, 1, 1]} : vector<18x18x32xf32> to vector<16x16x32xf32>
    %13 = vector.extract_strided_slice %9 {offsets = [1, 0, 0], sizes = [16, 16, 32], strides = [1, 1, 1]} : vector<18x18x32xf32> to vector<16x16x32xf32>
    %14 = vector.extract_strided_slice %9 {offsets = [1, 1, 0], sizes = [16, 16, 32], strides = [1, 1, 1]} : vector<18x18x32xf32> to vector<16x16x32xf32>
    %15 = vector.extract_strided_slice %9 {offsets = [1, 2, 0], sizes = [16, 16, 32], strides = [1, 1, 1]} : vector<18x18x32xf32> to vector<16x16x32xf32>
    %16 = vector.extract_strided_slice %9 {offsets = [2, 0, 0], sizes = [16, 16, 32], strides = [1, 1, 1]} : vector<18x18x32xf32> to vector<16x16x32xf32>
    %17 = vector.extract_strided_slice %9 {offsets = [2, 1, 0], sizes = [16, 16, 32], strides = [1, 1, 1]} : vector<18x18x32xf32> to vector<16x16x32xf32>
    %18 = vector.extract_strided_slice %9 {offsets = [2, 2, 0], sizes = [16, 16, 32], strides = [1, 1, 1]} : vector<18x18x32xf32> to vector<16x16x32xf32>
    %19 = tpu.concatenate %10, %11, %12, %13, %14, %15, %16, %17, %18 in 2 : vector<16x16x32xf32>, vector<16x16x32xf32>, vector<16x16x32xf32>, vector<16x16x32xf32>, vector<16x16x32xf32>, vector<16x16x32xf32>, vector<16x16x32xf32>, vector<16x16x32xf32>, vector<16x16x32xf32> -> vector<16x16x288xf32>
    %20 = vector.shape_cast %19 : vector<16x16x288xf32> to vector<256x288xf32>
    %c0_20 = arith.constant 0 : index
    %c0_21 = arith.constant 0 : index
    %21 = vector.load %arg2[%c0_20, %c0_21] : memref<288x32xf32, #tpu.memory_space<vmem>>, vector<288x32xf32>
    %cst_22 = arith.constant dense<0.000000e+00> : vector<256x32xf32>
    %22 = tpu.matmul %20, %21, %cst_22 {dimension_numbers = #tpu.dot_dimension_numbers<[1], [0], [0], [1], [0, 0, 1, 1], [], []>} : vector<256x288xf32>, vector<288x32xf32>, vector<256x32xf32> -> vector<256x32xf32>
    %23 = vector.shape_cast %14 : vector<16x16x32xf32> to vector<256x32xf32>
    %c0_23 = arith.constant 0 : index
    %c0_24 = arith.constant 0 : index
    %24 = vector.load %arg3[%c0_23, %c0_24] : memref<1x32xf32, #tpu.memory_space<vmem>>, vector<1x32xf32>
    %25 = vector.broadcast %24 : vector<1x32xf32> to vector<256x32xf32>
    %26 = arith.mulf %22, %25 : vector<256x32xf32>
    %c0_25 = arith.constant 0 : index
    %c0_26 = arith.constant 0 : index
    %27 = vector.load %arg4[%c0_25, %c0_26] : memref<1x32xf32, #tpu.memory_space<vmem>>, vector<1x32xf32>
    %28 = vector.broadcast %27 : vector<1x32xf32> to vector<256x32xf32>
    %29 = arith.addf %26, %28 : vector<256x32xf32>
    %30 = arith.addf %29, %23 : vector<256x32xf32>
    %cst_27 = arith.constant 0.000000e+00 : f32
    %31 = vector.broadcast %cst_27 : f32 to vector<256x32xf32>
    %32 = arith.maximumf %30, %31 : vector<256x32xf32>
    %33 = vector.shape_cast %32 : vector<256x32xf32> to vector<16x16x32xf32>
    %c1_28 = arith.constant 1 : index
    %c1_29 = arith.constant 1 : index
    %c0_30 = arith.constant 0 : index
    %34 = vector.load %arg6[%c1_28, %c1_29, %c0_30] : memref<18x18x32xf32, #tpu.memory_space<vmem>>, vector<16x16x32xf32>
    tpu.vector_store %arg6[%c1_28, %c1_29, %c0_30], %33 {strides = array<i32>} : memref<18x18x32xf32, #tpu.memory_space<vmem>>, vector<16x16x32xf32>,
    %c0_31 = arith.constant 0 : index
    %c0_32 = arith.constant 0 : index
    %c0_33 = arith.constant 0 : index
    %35 = tpu.strided_load %arg6[%c0_31, %c0_32, %c0_33] {strides = array<i32: 2, 2, 1>} : memref<18x18x32xf32, #tpu.memory_space<vmem>>, vector<8x8x32xf32>
    %c0_34 = arith.constant 0 : index
    %c1_35 = arith.constant 1 : index
    %c0_36 = arith.constant 0 : index
    %36 = tpu.strided_load %arg6[%c0_34, %c1_35, %c0_36] {strides = array<i32: 2, 2, 1>} : memref<18x18x32xf32, #tpu.memory_space<vmem>>, vector<8x8x32xf32>
    %37 = arith.maximumf %35, %36 : vector<8x8x32xf32>
    %c0_37 = arith.constant 0 : index
    %c2 = arith.constant 2 : index
    %c0_38 = arith.constant 0 : index
    %38 = tpu.strided_load %arg6[%c0_37, %c2, %c0_38] {strides = array<i32: 2, 2, 1>} : memref<18x18x32xf32, #tpu.memory_space<vmem>>, vector<8x8x32xf32>
    %39 = arith.maximumf %37, %38 : vector<8x8x32xf32>
    %c1_39 = arith.constant 1 : index
    %c0_40 = arith.constant 0 : index
    %c0_41 = arith.constant 0 : index
    %40 = tpu.strided_load %arg6[%c1_39, %c0_40, %c0_41] {strides = array<i32: 2, 2, 1>} : memref<18x18x32xf32, #tpu.memory_space<vmem>>, vector<8x8x32xf32>
    %41 = arith.maximumf %39, %40 : vector<8x8x32xf32>
    %c1_42 = arith.constant 1 : index
    %c1_43 = arith.constant 1 : index
    %c0_44 = arith.constant 0 : index
    %42 = tpu.strided_load %arg6[%c1_42, %c1_43, %c0_44] {strides = array<i32: 2, 2, 1>} : memref<18x18x32xf32, #tpu.memory_space<vmem>>, vector<8x8x32xf32>
    %43 = arith.maximumf %41, %42 : vector<8x8x32xf32>
    %c1_45 = arith.constant 1 : index
    %c2_46 = arith.constant 2 : index
    %c0_47 = arith.constant 0 : index
    %44 = tpu.strided_load %arg6[%c1_45, %c2_46, %c0_47] {strides = array<i32: 2, 2, 1>} : memref<18x18x32xf32, #tpu.memory_space<vmem>>, vector<8x8x32xf32>
    %45 = arith.maximumf %43, %44 : vector<8x8x32xf32>
    %c2_48 = arith.constant 2 : index
    %c0_49 = arith.constant 0 : index
    %c0_50 = arith.constant 0 : index
    %46 = tpu.strided_load %arg6[%c2_48, %c0_49, %c0_50] {strides = array<i32: 2, 2, 1>} : memref<18x18x32xf32, #tpu.memory_space<vmem>>, vector<8x8x32xf32>
    %47 = arith.maximumf %45, %46 : vector<8x8x32xf32>
    %c2_51 = arith.constant 2 : index
    %c1_52 = arith.constant 1 : index
    %c0_53 = arith.constant 0 : index
    %48 = tpu.strided_load %arg6[%c2_51, %c1_52, %c0_53] {strides = array<i32: 2, 2, 1>} : memref<18x18x32xf32, #tpu.memory_space<vmem>>, vector<8x8x32xf32>
    %49 = arith.maximumf %47, %48 : vector<8x8x32xf32>
    %c2_54 = arith.constant 2 : index
    %c2_55 = arith.constant 2 : index
    %c0_56 = arith.constant 0 : index
    %50 = tpu.strided_load %arg6[%c2_54, %c2_55, %c0_56] {strides = array<i32: 2, 2, 1>} : memref<18x18x32xf32, #tpu.memory_space<vmem>>, vector<8x8x32xf32>
    %51 = arith.maximumf %49, %50 : vector<8x8x32xf32>
    %c0_57 = arith.constant 0 : index
    %c0_58 = arith.constant 0 : index
    %c0_59 = arith.constant 0 : index
    %c0_60 = arith.constant 0 : index
    %52 = vector.load %arg5[%c0_57, %c0_58, %c0_59, %c0_60] : memref<1x8x8x32xf32, #tpu.memory_space<vmem>>, vector<1x8x8x32xf32>
    %53 = vector.shape_cast %52 : vector<1x8x8x32xf32> to vector<8x8x32xf32>
    %54 = vector.shape_cast %51 : vector<8x8x32xf32> to vector<1x8x8x32xf32>
    tpu.vector_store %arg5[%c0_57, %c0_58, %c0_59, %c0_60], %54 {strides = array<i32>} : memref<1x8x8x32xf32, #tpu.memory_space<vmem>>, vector<1x8x8x32xf32>,
    return
  }
  func.func @transform_0(%arg0: i32) -> (i32, i32, i32, i32) {
    %c0_i32 = arith.constant 0 : i32
    %c0_i32_0 = arith.constant 0 : i32
    %c0_i32_1 = arith.constant 0 : i32
    %c0_i32_2 = arith.constant 0 : i32
    return %arg0, %c0_i32, %c0_i32_0, %c0_i32_1 : i32, i32, i32, i32
  }
  func.func @transform_1(%arg0: i32) -> (i32, i32) {
    %c0_i32 = arith.constant 0 : i32
    %c0_i32_0 = arith.constant 0 : i32
    %c0_i32_1 = arith.constant 0 : i32
    return %c0_i32, %c0_i32_0 : i32, i32
  }
  func.func @transform_2(%arg0: i32) -> (i32, i32) {
    %c0_i32 = arith.constant 0 : i32
    %c0_i32_0 = arith.constant 0 : i32
    %c0_i32_1 = arith.constant 0 : i32
    return %c0_i32, %c0_i32_0 : i32, i32
  }
  func.func @transform_3(%arg0: i32) -> (i32, i32) {
    %c0_i32 = arith.constant 0 : i32
    %c0_i32_0 = arith.constant 0 : i32
    %c0_i32_1 = arith.constant 0 : i32
    return %c0_i32, %c0_i32_0 : i32, i32
  }
  func.func @transform_4(%arg0: i32) -> (i32, i32, i32, i32) {
    %c0_i32 = arith.constant 0 : i32
    %c0_i32_0 = arith.constant 0 : i32
    %c0_i32_1 = arith.constant 0 : i32
    %c0_i32_2 = arith.constant 0 : i32
    return %arg0, %c0_i32, %c0_i32_0, %c0_i32_1 : i32, i32, i32, i32
  }
}

</mosaic_0001>

<bundles_post_ra>
// kernel: basic_resblock_forward.1
= control target key start
LH: loop header
LB: loop body
LE: loop exit
PB: predicated region body
PF: predicated region fallthrough
CT: control target
= control target key end

     0   :  { %9 = vsyncpa [#allocation4], 0  ;;  %s5050_s0 = inlined_call_operand.vmem [shape: f32[2,16,16,32], index: 0, kind: input, shape index: {}]   ;;  %s5051_s1 = inlined_call_operand.vmem [shape: f32[288,32], index: 1, kind: input, shape index: {}]   ;;  %s5052_s2 = inlined_call_operand.vmem [shape: f32[1,32], index: 2, kind: input, shape index: {}]   ;;  %s5053_s3 = inlined_call_operand.vmem [shape: f32[1,32], index: 3, kind: input, shape index: {}]   ;;  %s5054_s4 = inlined_call_operand.hbm [shape: f32[2,8,8,32], index: 4, kind: output, shape index: {}]  }
   0x1   :  { %11 = vsyncpa [#allocation4 + $0x1], 0  ;;  %s3064_s15 = smov 0   ;;  %s3066_s16 = smov 0  }
   0x2   :  { %s3068_s17 = smov 0   ;;  %s3070_s18 = smov 0  }
   0x3 LB: > { %s3085_s19 = sadd.s32 4294967295, %s3031_s18   ;;  %s2344_s20 = sadd.s32 4294967294, %s3031_s18   ;;  %s3031_s18 = sphi %s3070_s18, %s5347_s18   ;;  %s3027_s17 = sphi %s3068_s17, %s5346_s17   ;;  %s3023_s16 = sphi %s3066_s16, %s5345_s16   ;;  %s3019_s15 = sphi %s3064_s15, %s5344_s15  }
   0x4   : > { %s3089_s21 = sadd.s32 1, %s3031_s18   ;;  %s113_s22 = sadd.s32 1, %s3027_s17 }
   0x5   : > { %s110_s23 = ssub.s32 %s3031_s18, %s3089_s21  ;;  %p123_p0 = scmp.ne.s32.totalorder %s3027_s17, %s3023_s16 }
   0x6   : > { %p111_p1 = scmp.eq.s32.totalorder %s110_s23, 0  ;;  %p124_p2 = scmp.eq.s32.totalorder %s3085_s19, 1 }
   0x7   : > { %p129_p3 = scmp.ne.s32.totalorder %s3023_s16, %s3019_s15  ;;  %p130_p4 = scmp.eq.s32.totalorder %s2344_s20, 1 }
   0x8   : > { %s3100_s24 = scalar_select %p111_p1, %s3027_s17, %s113_s22  }
   0x9   : > { %p3102_p5 = por %p124_p2, %p123_p0  ;;  %p3106_p6 = por %p130_p4, %p129_p3 }
   0xa   : > { %p2347_p7 = scmp.ge.s32.totalorder %s3031_s18, 1  ;;  %p165_p8 = scmp.lt.s32.totalorder %s3031_s18, 3 }
   0xc   : > { %p166_p9 = pnand %p2347_p7, %p165_p8 }
   0xe   : > { %169 = sbr.rel (%p166_p9) target bundleno = 647 (0x287), region = 36 }
  0x13   : > { %vm196_vm0 = vcmask 261120   ;;  %vm199_vm1 = vcmask 254976   ;;  %v3033_v0 = vmov 0.0   ;;  %vm205_vm2 = vcmask 253952   ;;  %s3034_s27 = smov 32   ;;  %p191_p10 = scmp.lt.s32.totalorder %s3085_s19, 1 }
  0x14   : > { %197 = vst.msk [vmem:[#allocation2] sm:$0xff] %vm196_vm0, %v3033_v0  ;;  %vm409_vm3 = vcmask 1046528   ;;  %vm586_vm4 = vcmask 1045504   ;;  %s3035_s7 = smov 64   ;;  %s3036_s22 = smov 96   ;;  %vm1237_vm5 = vcmask 523264  }
  0x15   : > { %198 = vst.msk [vmem:[#allocation2 + $0x8] sm:$0xff] %vm196_vm0, %v3033_v0  ;;  %s192_s28 = scalar_select %p191_p10, %s3085_s19, 1  ;;  %vm1270_vm6 = vcmask 785408  }
  0x16   : > { %200 = vst.msk [vmem:[#allocation2 + $0x10] sm:$0x3] %vm199_vm1, %v3033_v0  ;;  %s188_s20 = sand.u32 1, %s3023_s16  }
  0x17   : > { %204 = vst.msk [vmem:[#allocation2 + $0x1a8] sm:$0x3] %vm199_vm1, %v3033_v0  ;;  %s2388_s29 = sshll.u32 %s192_s28, 8  ;;  %s2348_s23 = sshll.u32 %s188_s20, 6 }
  0x18   : > { %206 = vst.msk [vmem:[#allocation2] sm:$0x1] %vm205_vm2, %v3033_v0  ;;  %s3199_s6 = scalar_lea.vmem %s5050_s0, %s2388_s29  ;;  %s4833_s28 = scalar_lea.vmem [#allocation3], %s2348_s23 }
  0x19   : > { %224 = vst.msk [vmem:[#allocation2 + $0x11] sm:$0x1] %vm205_vm2, %v3033_v0  ;;  %v248_v10 = vld [vmem:[%s3199_s6 + $0x30] sm:$0xff]  ;;  %v249_v11 = vld [vmem:[%s3199_s6 + $0x38] sm:$0xff]  ;;  %v242_v14 = vld [vmem:[%s3199_s6] sm:$0xff]  ;;  %s2389_s29 = sshll.u32 %s3085_s19, 6 }
  0x1a   : > { %202 = vst.msk [vmem:[#allocation2 + $0x198] sm:$0xff] %vm196_vm0, %v3033_v0  ;;  %v244_v12 = vld [vmem:[%s3199_s6 + $0x10] sm:$0xff]  ;;  %v245_v13 = vld [vmem:[%s3199_s6 + $0x18] sm:$0xff]  ;;  %v243_v15 = vld [vmem:[%s3199_s6 + $0x8] sm:$0xff]  ;;  %s2233_s19 = sshll.u32 %s4833_s28, 4  ;;  %s2221_s9 = scalar_lea.sflag [#allocation4], %s188_s20  ;;  %s2234_s19 = int_to_ptr.vmem [resolvable:$true] %s2233_s19 }
  0x1b   : > { %203 = vst.msk [vmem:[#allocation2 + $0x1a0] sm:$0xff] %vm196_vm0, %v3033_v0  ;;  %v250_v16 = vld [vmem:[%s3199_s6 + $0x40] sm:$0xff]  ;;  %v251_v17 = vld [vmem:[%s3199_s6 + $0x48] sm:$0xff]  ;;  %v252_v24 = vld [vmem:[%s3199_s6 + $0x50] sm:$0xff] }
  0x1c   : > { %v3126_v1 = vld [vmem:[#allocation2 + $0x8] sm:$0xff]  ;;  %207 = vst.msk [vmem:[#allocation2 + $0x18] sm:$0x1] %vm205_vm2, %v3033_v0  ;;  %v246_v18 = vld [vmem:[%s3199_s6 + $0x20] sm:$0xff]  ;;  %v253_v27 = vld [vmem:[%s3199_s6 + $0x58] sm:$0xff] }
  0x1d   : > { %208 = vst.msk [vmem:[#allocation2 + $0x30] sm:$0x1] %vm205_vm2, %v3033_v0  ;;  %v411_v2 = vrot.slane %v3126_v1, 1  ;;  %v247_v20 = vld [vmem:[%s3199_s6 + $0x28] sm:$0xff]  ;;  %v256_v29 = vld [vmem:[%s3199_s6 + $0x70] sm:$0xff]  ;;  %v257_v35 = vld [vmem:[%s3199_s6 + $0x78] sm:$0xff] }
  0x1e   : > { %209 = vst.msk [vmem:[#allocation2 + $0x48] sm:$0x1] %vm205_vm2, %v3033_v0  ;;  %v254_v40 = vld [vmem:[%s3199_s6 + $0x60] sm:$0xff]  ;;  %v255_v44 = vld [vmem:[%s3199_s6 + $0x68] sm:$0xff] }
  0x1f   : > { %v3135_v3 = vld [vmem:[#allocation2] sm:$0xff]  ;;  %210 = vst.msk [vmem:[#allocation2 + $0x60] sm:$0x1] %vm205_vm2, %v3033_v0  ;;  %v259_v55 = vld [vmem:[%s3199_s6 + $0x88] sm:$0xff] }
  0x20   : > { %v3139_v4 = vld [vmem:[#allocation2 + $0x10] sm:$0x3]  ;;  %v410_v5 = vrot.slane %v3135_v3, 1  ;;  %211 = vst.msk [vmem:[#allocation2 + $0x78] sm:$0x1] %vm205_vm2, %v3033_v0  ;;  %v258_v50 = vld [vmem:[%s3199_s6 + $0x80] sm:$0xff] }
  0x21   : > { %v413_v6 = vrot.slane %v3139_v4, 1  ;;  %212 = vst.msk [vmem:[#allocation2 + $0x90] sm:$0x1] %vm205_vm2, %v3033_v0  ;;  %v262_v61 = vld [vmem:[%s3199_s6 + $0xa0] sm:$0xff] }
  0x22   : > { %v412_v7 = vsel %vm409_vm3, %v410_v5, %v411_v2  ;;  %213 = vst.msk [vmem:[#allocation2 + $0xa8] sm:$0x1] %vm205_vm2, %v3033_v0  ;;  %v263_v5 = vld [vmem:[%s3199_s6 + $0xa8] sm:$0xff] }
  0x23   : > { %v414_v8 = vsel %vm409_vm3, %v411_v2, %v413_v6  ;;  %214 = vst.msk [vmem:[#allocation2 + $0xc0] sm:$0x1] %vm205_vm2, %v3033_v0 }
  0x24   : > { %v2471_v9 = vpack.i.bf16 %v414_v8, %v412_v7  ;;  %215 = vst.msk [vmem:[#allocation2 + $0xd8] sm:$0x1] %vm205_vm2, %v3033_v0 }
  0x25   : > { %216 = vst.msk [vmem:[#allocation2 + $0xf0] sm:$0x1] %vm205_vm2, %v3033_v0 }
  0x26   : > { %2472 = vrot.lane.b32.xlu0 %v2471_v9, %s3034_s27  ;;  %217 = vst.msk [vmem:[#allocation2 + $0x108] sm:$0x1] %vm205_vm2, %v3033_v0 }
  0x27   : > { %218 = vst.msk [vmem:[#allocation2 + $0x120] sm:$0x1] %vm205_vm2, %v3033_v0 }
  0x28   : > { %219 = vst.msk [vmem:[#allocation2 + $0x138] sm:$0x1] %vm205_vm2, %v3033_v0 }
  0x29   : > { %220 = vst.msk [vmem:[#allocation2 + $0x150] sm:$0x1] %vm205_vm2, %v3033_v0 }
  0x2a   : > { %221 = vst.msk [vmem:[#allocation2 + $0x168] sm:$0x1] %vm205_vm2, %v3033_v0 }
  0x2b   : > { %222 = vst.msk [vmem:[#allocation2 + $0x180] sm:$0x1] %vm205_vm2, %v3033_v0 }
  0x2c   : > { %225 = vst.msk [vmem:[#allocation2 + $0x29] sm:$0x1] %vm205_vm2, %v3033_v0 }
  0x2d   : > { %226 = vst.msk [vmem:[#allocation2 + $0x41] sm:$0x1] %vm205_vm2, %v3033_v0 }
  0x2e   : > { %227 = vst.msk [vmem:[#allocation2 + $0x59] sm:$0x1] %vm205_vm2, %v3033_v0 }
  0x2f   : > { %228 = vst.msk [vmem:[#allocation2 + $0x71] sm:$0x1] %vm205_vm2, %v3033_v0 }
  0x30   : > { %229 = vst.msk [vmem:[#allocation2 + $0x89] sm:$0x1] %vm205_vm2, %v3033_v0 }
  0x31   : > { %230 = vst.msk [vmem:[#allocation2 + $0xa1] sm:$0x1] %vm205_vm2, %v3033_v0 }
  0x32   : > { %231 = vst.msk [vmem:[#allocation2 + $0xb9] sm:$0x1] %vm205_vm2, %v3033_v0 }
  0x33   : > { %232 = vst.msk [vmem:[#allocation2 + $0xd1] sm:$0x1] %vm205_vm2, %v3033_v0 }
  0x34   : > { %233 = vst.msk [vmem:[#allocation2 + $0xe9] sm:$0x1] %vm205_vm2, %v3033_v0 }
  0x35   : > { %234 = vst.msk [vmem:[#allocation2 + $0x101] sm:$0x1] %vm205_vm2, %v3033_v0 }
  0x36   : > { %235 = vst.msk [vmem:[#allocation2 + $0x119] sm:$0x1] %vm205_vm2, %v3033_v0 }
  0x37   : > { %236 = vst.msk [vmem:[#allocation2 + $0x131] sm:$0x1] %vm205_vm2, %v3033_v0 }
  0x38   : > { %237 = vst.msk [vmem:[#allocation2 + $0x149] sm:$0x1] %vm205_vm2, %v3033_v0 }
  0x39   : > { %238 = vst.msk [vmem:[#allocation2 + $0x161] sm:$0x1] %vm205_vm2, %v3033_v0 }
  0x3a   : > { %239 = vst.msk [vmem:[#allocation2 + $0x179] sm:$0x1] %vm205_vm2, %v3033_v0 }
  0x3b   : > { %240 = vst.msk [vmem:[#allocation2 + $0x191] sm:$0x1] %vm205_vm2, %v3033_v0 }
  0x3c   : > { %241 = vst.msk [vmem:[#allocation2 + $0x1a9] sm:$0x1] %vm205_vm2, %v3033_v0 }
  0x3d   : > { %281 = vst.msk [vmem:[#allocation2 + $0x61] sm:$0xff] %vm196_vm0, %v248_v10 }
  0x3e   : > { %282 = vst.msk [vmem:[#allocation2 + $0x69] sm:$0xff] %vm196_vm0, %v249_v11  ;;  %v260_v11 = vld [vmem:[%s3199_s6 + $0x90] sm:$0xff] }
  0x3f   : > { %223 = vst.msk [vmem:[#allocation2 + $0x198] sm:$0x1] %vm205_vm2, %v3033_v0 }
  0x40   : > { %277 = vst.msk [vmem:[#allocation2 + $0x31] sm:$0xff] %vm196_vm0, %v244_v12 }
  0x41   : > { %278 = vst.msk [vmem:[#allocation2 + $0x39] sm:$0xff] %vm196_vm0, %v245_v13 }
  0x42   : > { %275 = vst.msk [vmem:[#allocation2 + $0x19] sm:$0xff] %vm196_vm0, %v242_v14 }
  0x43   : > { %276 = vst.msk [vmem:[#allocation2 + $0x21] sm:$0xff] %vm196_vm0, %v243_v15 }
  0x44   : > { %v3228_v19 = vld [vmem:[#allocation2 + $0x60] sm:$0xff]  ;;  %283 = vst.msk [vmem:[#allocation2 + $0x79] sm:$0xff] %vm196_vm0, %v250_v16  ;;  %v261_v16 = vld [vmem:[%s3199_s6 + $0x98] sm:$0xff] }
  0x45   : > { %v3232_v21 = vld [vmem:[#allocation2 + $0x68] sm:$0xff]  ;;  %v3234_v22 = vld [vmem:[#allocation2 + $0x70] sm:$0x3]  ;;  %v430_v23 = vrot.slane %v3228_v19, 1  ;;  %284 = vst.msk [vmem:[#allocation2 + $0x81] sm:$0xff] %vm196_vm0, %v251_v17 }
  0x46   : > { %v431_v25 = vrot.slane %v3232_v21, 1  ;;  %v433_v26 = vrot.slane %v3234_v22, 1  ;;  %279 = vst.msk [vmem:[#allocation2 + $0x49] sm:$0xff] %vm196_vm0, %v246_v18 }
  0x47   : > { %v3243_v28 = vld [vmem:[#allocation2 + $0x30] sm:$0xff]  ;;  %280 = vst.msk [vmem:[#allocation2 + $0x51] sm:$0xff] %vm196_vm0, %v247_v20 }
  0x48   : > { %v3248_v30 = vsel %vm409_vm3, %v430_v23, %v431_v25  ;;  %v3251_v31 = vsel %vm409_vm3, %v431_v25, %v433_v26  ;;  %v3253_v32 = vld [vmem:[#allocation2 + $0x38] sm:$0xff]  ;;  %v3255_v33 = vld [vmem:[#allocation2 + $0x40] sm:$0x3]  ;;  %v420_v34 = vrot.slane %v3243_v28, 1  ;;  %285 = vst.msk [vmem:[#allocation2 + $0x91] sm:$0xff] %vm196_vm0, %v252_v24  ;;  %v264_v25 = vld [vmem:[%s3199_s6 + $0xb0] sm:$0xff] }
  0x49   : > { %5162 = vst [vmem:[#allocation6_spill] sm:$0xff] %v3248_v30  ;;  %v2491_v36 = vpack.i.bf16 %v3251_v31, %v3248_v30  ;;  %v421_v37 = vrot.slane %v3253_v32, 1  ;;  %v423_v38 = vrot.slane %v3255_v33, 1  ;;  %v3264_v39 = vld [vmem:[#allocation2 + $0x18] sm:$0xff] }
  0x4a   : > { %5163 = vst [vmem:[#allocation7_spill] sm:$0xff] %v3251_v31  ;;  %v3268_v41 = vld [vmem:[#allocation2 + $0x20] sm:$0xff]  ;;  %v3270_v42 = vld [vmem:[#allocation2 + $0x28] sm:$0x3]  ;;  %v415_v43 = vrot.slane %v3264_v39, 1 }
  0x4b   : > { %286 = vst.msk [vmem:[#allocation2 + $0x99] sm:$0xff] %vm196_vm0, %v253_v27  ;;  %2492 = vrot.lane.b32.xlu2 %v2491_v36, %s3034_s27  ;;  %v3277_v45 = vsel %vm409_vm3, %v420_v34, %v421_v37  ;;  %v3280_v46 = vsel %vm409_vm3, %v421_v37, %v423_v38  ;;  %v416_v47 = vrot.slane %v3268_v41, 1  ;;  %v418_v48 = vrot.slane %v3270_v42, 1  ;;  %v3284_v49 = vld [vmem:[#allocation2 + $0x78] sm:$0xff] }
  0x4c   : > { %289 = vst.msk [vmem:[#allocation2 + $0xc1] sm:$0xff] %vm196_vm0, %v256_v29  ;;  %v2481_v51 = vpack.i.bf16 %v3280_v46, %v3277_v45  ;;  %v3290_v52 = vld [vmem:[#allocation2 + $0x80] sm:$0xff]  ;;  %v3292_v53 = vld [vmem:[#allocation2 + $0x88] sm:$0x3]  ;;  %v435_v54 = vrot.slane %v3284_v49, 1 }
  0x4d   : > { %5164 = vst [vmem:[#allocation8_spill] sm:$0xff] %v3277_v45  ;;  %v3298_v56 = vsel %vm409_vm3, %v415_v43, %v416_v47  ;;  %v3301_v57 = vsel %vm409_vm3, %v416_v47, %v418_v48  ;;  %v436_v58 = vrot.slane %v3290_v52, 1  ;;  %v438_v59 = vrot.slane %v3292_v53, 1  ;;  %v3305_v60 = vld [vmem:[#allocation2 + $0x48] sm:$0xff] }
  0x4e   : > { %5165 = vst [vmem:[#allocation9_spill] sm:$0xff] %v3280_v46  ;;  %2482 = vrot.lane.b32.xlu1 %v2481_v51, %s3034_s27  ;;  %v2476_v62 = vpack.i.bf16 %v3301_v57, %v3298_v56  ;;  %v3312_v63 = vld [vmem:[#allocation2 + $0x50] sm:$0xff]  ;;  %v3314_v0 = vld [vmem:[#allocation2 + $0x58] sm:$0x3]  ;;  %v425_v2 = vrot.slane %v3305_v60, 1 }
  0x4f   : > { %290 = vst.msk [vmem:[#allocation2 + $0xc9] sm:$0xff] %vm196_vm0, %v257_v35  ;;  %v3320_v6 = vsel %vm409_vm3, %v435_v54, %v436_v58  ;;  %v3323_v7 = vsel %vm409_vm3, %v436_v58, %v438_v59  ;;  %v426_v8 = vrot.slane %v3312_v63, 1  ;;  %v428_v9 = vrot.slane %v3314_v0, 1  ;;  %v3327_v10 = vld [vmem:[#allocation2 + $0x90] sm:$0xff]  ;;  %v265_v35 = vld [vmem:[%s3199_s6 + $0xb8] sm:$0xff] }
  0x50   : > { %287 = vst.msk [vmem:[#allocation2 + $0xa9] sm:$0xff] %vm196_vm0, %v254_v40  ;;  %2477 = vrot.lane.b32.xlu0 %v2476_v62, %s3034_s27  ;;  %v2496_v12 = vpack.i.bf16 %v3323_v7, %v3320_v6  ;;  %v440_v15 = vrot.slane %v3327_v10, 1  ;;  %v269_v54 = vld [vmem:[%s3199_s6 + $0xd8] sm:$0xff] }
  0x51   : > { %5166 = vst [vmem:[#allocation10_spill] sm:$0xff] %v3298_v56  ;;  %v3342_v17 = vsel %vm409_vm3, %v425_v2, %v426_v8  ;;  %v3345_v18 = vsel %vm409_vm3, %v426_v8, %v428_v9  ;;  %v266_v2 = vld [vmem:[%s3199_s6 + $0xc0] sm:$0xff] }
  0x52   : > { %5167 = vst [vmem:[#allocation11_spill] sm:$0xff] %v3301_v57  ;;  %v3334_v13 = vld [vmem:[#allocation2 + $0x98] sm:$0xff]  ;;  %v3336_v14 = vld [vmem:[#allocation2 + $0xa0] sm:$0x3]  ;;  %v2486_v26 = vpack.i.bf16 %v3345_v18, %v3342_v17 }
  0x53   : > { %288 = vst.msk [vmem:[#allocation2 + $0xb1] sm:$0xff] %vm196_vm0, %v255_v44  ;;  %v441_v20 = vrot.slane %v3334_v13, 1  ;;  %v443_v23 = vrot.slane %v3336_v14, 1  ;;  %v3349_v24 = vld [vmem:[#allocation2 + $0xc0] sm:$0xff]  ;;  %2497 = vrot.lane.b32.xlu2 %v2496_v12, %s3034_s27  ;;  %v268_v44 = vld [vmem:[%s3199_s6 + $0xd0] sm:$0xff]  ;;  %v267_v12 = vld [vmem:[%s3199_s6 + $0xc8] sm:$0xff] }
  0x54   : > { %291 = vst.msk [vmem:[#allocation2 + $0xd9] sm:$0xff] %vm196_vm0, %v258_v50  ;;  %v450_v34 = vrot.slane %v3349_v24, 1 }
  0x55   : > { %5168 = vst [vmem:[#allocation12_spill] sm:$0xff] %v3320_v6  ;;  %v3364_v36 = vsel %vm409_vm3, %v440_v15, %v441_v20  ;;  %v3367_v37 = vsel %vm409_vm3, %v441_v20, %v443_v23 }
  0x56   : > { %5169 = vst [vmem:[#allocation13_spill] sm:$0xff] %v3323_v7  ;;  %v3355_v27 = vld [vmem:[#allocation2 + $0xc8] sm:$0xff]  ;;  %v3357_v29 = vld [vmem:[#allocation2 + $0xd0] sm:$0x3]  ;;  %v2501_v47 = vpack.i.bf16 %v3367_v37, %v3364_v36  ;;  %2487 = vrot.lane.b32.xlu1 %v2486_v26, %s3034_s27  ;;  %v270_v26 = vld [vmem:[%s3199_s6 + $0xe0] sm:$0xff] }
  0x57   : > { %292 = vst.msk [vmem:[#allocation2 + $0xe1] sm:$0xff] %vm196_vm0, %v259_v55  ;;  %v451_v38 = vrot.slane %v3355_v27, 1  ;;  %v453_v40 = vrot.slane %v3357_v29, 1  ;;  %v3371_v43 = vld [vmem:[#allocation2 + $0xa8] sm:$0xff] }
  0x58   : > { %295 = vst.msk [vmem:[#allocation2 + $0x109] sm:$0xff] %vm196_vm0, %v262_v61  ;;  %v445_v51 = vrot.slane %v3371_v43, 1  ;;  %2502 = vrot.lane.b32.xlu0 %v2501_v47, %s3034_s27 }
  0x59   : > { %5170 = vst [vmem:[#allocation14_spill] sm:$0xff] %v3342_v17  ;;  %v3385_v55 = vsel %vm409_vm3, %v450_v34, %v451_v38  ;;  %v3388_v58 = vsel %vm409_vm3, %v451_v38, %v453_v40  ;;  %v271_v40 = vld [vmem:[%s3199_s6 + $0xe8] sm:$0xff] }
  0x5a   : > { %5171 = vst [vmem:[#allocation15_spill] sm:$0xff] %v3345_v18  ;;  %v3377_v48 = vld [vmem:[#allocation2 + $0xb0] sm:$0xff]  ;;  %v3379_v50 = vld [vmem:[#allocation2 + $0xb8] sm:$0x3] }
  0x5b   : > { %5172 = vst [vmem:[#allocation16_spill] sm:$0xff] %v3349_v24  ;;  %v446_v59 = vrot.slane %v3377_v48, 1  ;;  %v448_v61 = vrot.slane %v3379_v50, 1  ;;  %v3392_v62 = vld [vmem:[#allocation2 + $0xd8] sm:$0xff] }
  0x5c   : > { %296 = vst.msk [vmem:[#allocation2 + $0x111] sm:$0xff] %vm196_vm0, %v263_v5  ;;  %v2511_v5 = vpack.i.bf16 %v3388_v58, %v3385_v55 }
  0x5d   : > { %5173 = vst [vmem:[#allocation17_spill] sm:$0xff] %v3355_v27  ;;  %v3407_v15 = vsel %vm409_vm3, %v445_v51, %v446_v59 }
  0x5e   : > { %293 = vst.msk [vmem:[#allocation2 + $0xf1] sm:$0xff] %vm196_vm0, %v260_v11  ;;  %v3399_v8 = vld [vmem:[#allocation2 + $0xe0] sm:$0xff]  ;;  %v3401_v9 = vld [vmem:[#allocation2 + $0xe8] sm:$0x3]  ;;  %v455_v11 = vrot.slane %v3392_v62, 1  ;;  %2512 = vrot.lane.b32.xlu2 %v2511_v5, %s3034_s27 }
  0x5f   : > { %5174 = vst [vmem:[#allocation18_spill] sm:$0xff] %v3364_v36  ;;  %v456_v20 = vrot.slane %v3399_v8, 1  ;;  %v458_v23 = vrot.slane %v3401_v9, 1 }
  0x60   : > { %5175 = vst [vmem:[#allocation19_spill] sm:$0xff] %v3367_v37 }
  0x61   : > { %294 = vst.msk [vmem:[#allocation2 + $0xf9] sm:$0xff] %vm196_vm0, %v261_v16  ;;  %v3410_v16 = vsel %vm409_vm3, %v446_v59, %v448_v61  ;;  %v3430_v51 = vsel %vm409_vm3, %v456_v20, %v458_v23 }
  0x62   : > { %297 = vst.msk [vmem:[#allocation2 + $0x121] sm:$0xff] %vm196_vm0, %v264_v25  ;;  %v3414_v25 = vld [vmem:[#allocation2 + $0x108] sm:$0xff]  ;;  %v2506_v61 = vpack.i.bf16 %v3410_v16, %v3407_v15 }
  0x63   : > { %5176 = vst [vmem:[#allocation20_spill] sm:$0xff] %v3385_v55  ;;  %v3419_v34 = vld [vmem:[#allocation2 + $0x110] sm:$0xff]  ;;  %v465_v38 = vrot.slane %v3414_v25, 1 }
  0x64   : > { %5177 = vst [vmem:[#allocation21_spill] sm:$0xff] %v3388_v58  ;;  %2507 = vrot.lane.b32.xlu1 %v2506_v61, %s3034_s27 }
  0x65   : > { %298 = vst.msk [vmem:[#allocation2 + $0x129] sm:$0xff] %vm196_vm0, %v265_v35  ;;  %v3421_v35 = vld [vmem:[#allocation2 + $0x118] sm:$0x3]  ;;  %v3434_v47 = vld [vmem:[#allocation2 + $0xf0] sm:$0xff] }
  0x66   : > { %5178 = vst [vmem:[#allocation22_spill] sm:$0xff] %v3399_v8  ;;  %v468_v59 = vrot.slane %v3421_v35, 1 }
  0x67   : > { %301 = vst.msk [vmem:[#allocation2 + $0x151] sm:$0xff] %vm196_vm0, %v268_v44  ;;  %v3427_v44 = vsel %vm409_vm3, %v455_v11, %v456_v20  ;;  %v460_v11 = vrot.slane %v3434_v47, 1 }
  0x68   : > { %5179 = vst [vmem:[#allocation23_spill] sm:$0xff] %v3407_v15  ;;  %v3439_v57 = vld [vmem:[#allocation2 + $0xf8] sm:$0xff] }
  0x69   : > { %5180 = vst [vmem:[#allocation24_spill] sm:$0xff] %v3410_v16  ;;  %v461_v20 = vrot.slane %v3439_v57, 1  ;;  %v3448_v56 = vld [vmem:[#allocation2 + $0x120] sm:$0xff] }
  0x6a   : > { %5181 = vst [vmem:[#allocation25_spill] sm:$0xff] %v3414_v25  ;;  %v470_v16 = vrot.slane %v3448_v56, 1 }
  0x6b   : > { %302 = vst.msk [vmem:[#allocation2 + $0x159] sm:$0xff] %vm196_vm0, %v269_v54  ;;  %v466_v54 = vrot.slane %v3419_v34, 1 }
  0x6c   : > { %5182 = vst [vmem:[#allocation26_spill] sm:$0xff] %v3419_v34  ;;  %v3459_v5 = vld [vmem:[#allocation2 + $0x128] sm:$0xff]  ;;  %v3461_v55 = vld [vmem:[#allocation2 + $0x130] sm:$0x3] }
  0x6d   : > { %299 = vst.msk [vmem:[#allocation2 + $0x139] sm:$0xff] %vm196_vm0, %v266_v2  ;;  %v3441_v2 = vld [vmem:[#allocation2 + $0x100] sm:$0x3]  ;;  %v3454_v58 = vsel %vm409_vm3, %v465_v38, %v466_v54  ;;  %v471_v15 = vrot.slane %v3459_v5, 1  ;;  %v473_v37 = vrot.slane %v3461_v55, 1 }
  0x6e   : > { %5183 = vst [vmem:[#allocation27_spill] sm:$0xff] %v3427_v44  ;;  %v463_v23 = vrot.slane %v3441_v2, 1 }
  0x6f   : > { %5184 = vst [vmem:[#allocation28_spill] sm:$0xff] %v3430_v51 }
  0x70   : > { %5185 = vst [vmem:[#allocation29_spill] sm:$0xff] %v3434_v47 }
  0x71   : > { %300 = vst.msk [vmem:[#allocation2 + $0x141] sm:$0xff] %vm196_vm0, %v267_v12  ;;  %v2516_v12 = vpack.i.bf16 %v3430_v51, %v3427_v44  ;;  %v3479_v44 = vsel %vm409_vm3, %v461_v20, %v463_v23 }
  0x72   : > { %5186 = vst [vmem:[#allocation30_spill] sm:$0xff] %v3439_v57  ;;  %v3469_v51 = vld [vmem:[#allocation2 + $0x158] sm:$0xff]  ;;  %v3471_v38 = vld [vmem:[#allocation2 + $0x160] sm:$0x3] }
  0x73   : > { %303 = vst.msk [vmem:[#allocation2 + $0x169] sm:$0xff] %vm196_vm0, %v270_v26  ;;  %v3457_v26 = vsel %vm409_vm3, %v466_v54, %v468_v59  ;;  %v3476_v59 = vsel %vm409_vm3, %v460_v11, %v461_v20  ;;  %2517 = vrot.lane.b32.xlu0 %v2516_v12, %s3034_s27  ;;  %v481_v7 = vrot.slane %v3469_v51, 1  ;;  %v483_v61 = vrot.slane %v3471_v38, 1 }
  0x74   : > { %304 = vst.msk [vmem:[#allocation2 + $0x171] sm:$0xff] %vm196_vm0, %v271_v40  ;;  %v3466_v40 = vld [vmem:[#allocation2 + $0x150] sm:$0xff]  ;;  %v2526_v54 = vpack.i.bf16 %v3457_v26, %v3454_v58  ;;  %v3485_v6 = vld [vmem:[#allocation2 + $0x138] sm:$0xff]  ;;  %v3492_v11 = vsel %vm409_vm3, %v470_v16, %v471_v15  ;;  %v3495_v20 = vsel %vm409_vm3, %v471_v15, %v473_v37  ;;  %v2521_v23 = vpack.i.bf16 %v3479_v44, %v3476_v59 }
  0x75   : > { %5187 = vst [vmem:[#allocation31_spill] sm:$0xff] %v3454_v58  ;;  %v480_v36 = vrot.slane %v3466_v40, 1  ;;  %v475_v18 = vrot.slane %v3485_v6, 1  ;;  %v2531_v37 = vpack.i.bf16 %v3495_v20, %v3492_v11 }
  0x76   : > { %5188 = vst [vmem:[#allocation32_spill] sm:$0xff] %v3457_v26  ;;  %2527 = vrot.lane.b32.xlu2 %v2526_v54, %s3034_s27  ;;  %2522 = vrot.lane.b32.xlu1 %v2521_v23, %s3034_s27 }
  0x77   : > { %5189 = vst [vmem:[#allocation33_spill] sm:$0xff] %v3471_v38  ;;  %v3512_v15 = vsel %vm409_vm3, %v480_v36, %v481_v7 }
  0x78   : > { %5190 = vst [vmem:[#allocation34_spill] sm:$0xff] %v3476_v59  ;;  %v3487_v31 = vld [vmem:[#allocation2 + $0x140] sm:$0xff]  ;;  %v3489_v30 = vld [vmem:[#allocation2 + $0x148] sm:$0x3] }
  0x79   : > { %5191 = vst [vmem:[#allocation35_spill] sm:$0xff] %v3479_v44  ;;  %v476_v17 = vrot.slane %v3487_v31, 1  ;;  %v478_v16 = vrot.slane %v3489_v30, 1  ;;  %v3515_v44 = vsel %vm409_vm3, %v481_v7, %v483_v61  ;;  %v592_v7 = vrot.slane %v3264_v39, 2 }
  0x7a   : > { %5192 = vst [vmem:[#allocation36_spill] sm:$0xff] %v3492_v11  ;;  %v3499_v12 = vld [vmem:[#allocation2 + $0x168] sm:$0xff]  ;;  %v2541_v45 = vpack.i.bf16 %v3515_v44, %v3512_v15  ;;  %v593_v61 = vrot.slane %v3268_v41, 2 }
  0x7b   : > { %5193 = vst [vmem:[#allocation37_spill] sm:$0xff] %v3495_v20  ;;  %v3501_v26 = vld [vmem:[#allocation2 + $0x170] sm:$0xff]  ;;  %v3503_v58 = vld [vmem:[#allocation2 + $0x178] sm:$0x3]  ;;  %v485_v59 = vrot.slane %v3499_v12, 1  ;;  %v3524_v38 = vsel %vm409_vm3, %v475_v18, %v476_v17  ;;  %v3527_v36 = vsel %vm409_vm3, %v476_v17, %v478_v16  ;;  %2532 = vrot.lane.b32.xlu0 %v2531_v37, %s3034_s27  ;;  %v595_v20 = vrot.slane %v3270_v42, 2 }
  0x7c   : > { %5194 = vst [vmem:[#allocation38_spill] sm:$0xff] %v3512_v15  ;;  %v486_v46 = vrot.slane %v3501_v26, 1  ;;  %v488_v54 = vrot.slane %v3503_v58, 1  ;;  %v2536_v18 = vpack.i.bf16 %v3527_v36, %v3524_v38  ;;  %v590_v17 = vrot.slane %v3139_v4, 2 }
  0x7d   : > { %5195 = vst [vmem:[#allocation39_spill] sm:$0xff] %v3515_v44  ;;  %v587_v16 = vrot.slane %v3135_v3, 2  ;;  %v588_v37 = vrot.slane %v3126_v1, 2  ;;  %v598_v44 = vrot.slane %v3253_v32, 2 }
  0x7e   : > { %5196 = vst [vmem:[#allocation40_spill] sm:$0xff] %v3524_v38  ;;  %v3534_v11 = vsel %vm409_vm3, %v485_v59, %v486_v46  ;;  %v3537_v23 = vsel %vm409_vm3, %v486_v46, %v488_v54  ;;  %2542 = vrot.lane.b32.xlu2 %v2541_v45, %s3034_s27  ;;  %v594_v59 = vsel %vm586_vm4, %v592_v7, %v593_v61  ;;  %v597_v54 = vrot.slane %v3243_v28, 2 }
  0x7f   : > { %5197 = vst [vmem:[#allocation41_spill] sm:$0xff] %v3527_v36  ;;  %v2546_v42 = vpack.i.bf16 %v3537_v23, %v3534_v11  ;;  %v596_v46 = vsel %vm586_vm4, %v593_v61, %v595_v20  ;;  %v600_v36 = vrot.slane %v3255_v33, 2  ;;  %2537 = vrot.lane.b32.xlu1 %v2536_v18, %s3034_s27  ;;  %v589_v4 = vsel %vm586_vm4, %v587_v16, %v588_v37 }
  0x80   : > { %5198 = vst [vmem:[#allocation42_spill] sm:$0xff] %v3534_v11  ;;  %v591_v3 = vsel %vm586_vm4, %v588_v37, %v590_v17  ;;  %v3555_v1 = vpack.i.bf16 %v596_v46, %v594_v59  ;;  %v607_v45 = vrot.slane %v3228_v19, 2  ;;  %v608_v20 = vrot.slane %v3232_v21, 2 }
  0x81   : > { %5199 = vst [vmem:[#allocation43_spill] sm:$0xff] %v3537_v23  ;;  %v610_v7 = vrot.slane %v3234_v22, 2  ;;  %v3562_v61 = vsel %vm586_vm4, %v597_v54, %v598_v44  ;;  %v3565_v33 = vsel %vm586_vm4, %v598_v44, %v600_v36  ;;  %v2551_v18 = vpack.i.bf16 %v591_v3, %v589_v4 }
  0x82   : > { %v602_v17 = vrot.slane %v3305_v60, 2  ;;  %v603_v16 = vrot.slane %v3312_v63, 2  ;;  %v605_v37 = vrot.slane %v3314_v0, 2  ;;  %v3574_v22 = vpack.i.bf16 %v3565_v33, %v3562_v61 }
  0x83   : > { %2547 = vrot.lane.b32.xlu0 %v2546_v42, %s3034_s27  ;;  %v3577_v42 = vsel %vm586_vm4, %v607_v45, %v608_v20  ;;  %v3580_v44 = vsel %vm586_vm4, %v608_v20, %v610_v7  ;;  %v612_v36 = vrot.slane %v3284_v49, 2  ;;  %v613_v59 = vrot.slane %v3290_v52, 2 }
  0x84   : > { %v615_v46 = vrot.slane %v3292_v53, 2  ;;  %v3587_v0 = vsel %vm586_vm4, %v602_v17, %v603_v16  ;;  %v3590_v54 = vsel %vm586_vm4, %v603_v16, %v605_v37  ;;  %v3594_v4 = vpack.i.bf16 %v3580_v44, %v3577_v42 }
  0x85   : > { %v622_v3 = vrot.slane %v3371_v43, 2  ;;  %v623_v45 = vrot.slane %v3377_v48, 2  ;;  %v625_v53 = vrot.slane %v3379_v50, 2  ;;  %v3602_v20 = vsel %vm586_vm4, %v612_v36, %v613_v59 }
  0x86   : > { %2557 = vrot.lane.b32.xlu2 %v3555_v1, %s3035_s7  ;;  %v3605_v7 = vsel %vm586_vm4, %v613_v59, %v615_v46  ;;  %v617_v17 = vrot.slane %v3327_v10, 2  ;;  %v618_v16 = vrot.slane %v3334_v13, 2  ;;  %v620_v37 = vrot.slane %v3336_v14, 2 }
  0x87   : > { %2552 = vrot.lane.b32.xlu1 %v2551_v18, %s3035_s7  ;;  %v3609_v18 = vpack.i.bf16 %v3590_v54, %v3587_v0  ;;  %v3618_v50 = vpack.i.bf16 %v3605_v7, %v3602_v20  ;;  %v3621_v36 = vsel %vm586_vm4, %v622_v3, %v623_v45  ;;  %v3624_v59 = vsel %vm586_vm4, %v623_v45, %v625_v53 }
  0x88   : > { %v627_v46 = vrot.slane %v3349_v24, 2  ;;  %v628_v38 = vrot.slane %v3355_v27, 2  ;;  %v630_v23 = vrot.slane %v3357_v29, 2  ;;  %v3632_v14 = vsel %vm586_vm4, %v617_v17, %v618_v16 }
  0x89   : > { %v3635_v11 = vsel %vm586_vm4, %v618_v16, %v620_v37  ;;  %v2586_v3 = vpack.i.bf16 %v3624_v59, %v3621_v36  ;;  %v637_v45 = vrot.slane %v3434_v47, 2  ;;  %v638_v53 = vrot.slane %v3439_v57, 2 }
  0x8a   : > { %v640_v29 = vrot.slane %v3441_v2, 2  ;;  %v3645_v27 = vsel %vm586_vm4, %v627_v46, %v628_v38  ;;  %v3648_v17 = vsel %vm586_vm4, %v628_v38, %v630_v23  ;;  %v3652_v16 = vpack.i.bf16 %v3635_v11, %v3632_v14 }
  0x8b   : > { %2562 = vrot.lane.b32.xlu0 %v3574_v22, %s3035_s7  ;;  %v632_v37 = vrot.slane %v3392_v62, 2  ;;  %v633_v24 = vrot.slane %v3399_v8, 2  ;;  %v635_v57 = vrot.slane %v3401_v9, 2  ;;  %v2591_v2 = vpack.i.bf16 %v3648_v17, %v3645_v27  ;;  %v3674_v9 = vld [vmem:[%s5051_s1 + $0x118] sm:$0xff] }
  0x8c   : > { %v3661_v46 = vsel %vm586_vm4, %v637_v45, %v638_v53  ;;  %v3664_v38 = vsel %vm586_vm4, %v638_v53, %v640_v29  ;;  %v642_v23 = vrot.slane %v3414_v25, 2  ;;  %v643_v47 = vrot.slane %v3419_v34, 2  ;;  %5202 = vst [vmem:[#allocation46_spill] sm:$0xff] %v3674_v9  ;;  %v3679_v45 = vld [vmem:[%s5051_s1 + $0x110] sm:$0xff]  ;;  %1737 = vmatpush.msra.mxu2 %v3674_v9  ;;  %v1431_v9 = vld [vmem:[%s5051_s1 + $0x100] sm:$0xff] }
  0x8d   : > { %5200 = vst [vmem:[#allocation44_spill] sm:$0xff] %v3661_v46  ;;  %v3682_v53 = vsel %vm586_vm4, %v632_v37, %v633_v24  ;;  %v3685_v29 = vsel %vm586_vm4, %v633_v24, %v635_v57  ;;  %v652_v34 = vrot.slane %v3485_v6, 2  ;;  %v653_v25 = vrot.slane %v3487_v31, 2  ;;  %v1432_v37 = vld [vmem:[%s5051_s1 + $0x108] sm:$0xff] }
  0x8e   : > { %2572 = vrot.lane.b32.xlu2 %v3594_v4, %s3035_s7  ;;  %5201 = vst [vmem:[#allocation45_spill] sm:$0xff] %v3664_v38  ;;  %v655_v8 = vrot.slane %v3489_v30, 2  ;;  %v3698_v57 = vsel %vm586_vm4, %v642_v23, %v643_v47  ;;  %1738 = vmatpush.msra.mxu2 %v3679_v45  ;;  %v647_v30 = vrot.slane %v3448_v56, 2  ;;  %v650_v23 = vrot.slane %v3461_v55, 2  ;;  %v5210_v56 = vld [vmem:[#allocation33_spill] sm:$0xff] }
  0x8f   : > { %2567 = vrot.lane.b32.xlu1 %v3609_v18, %s3035_s7  ;;  %5203 = vst [vmem:[#allocation47_spill] sm:$0xff] %v3679_v45 }
  0x90   : > { %5204 = vst [vmem:[#allocation48_spill] sm:$0xff] %v3685_v29  ;;  %1739 = vmatpush.msra.mxu2 %v1432_v37  ;;  %v3721_v45 = vsel %vm586_vm4, %v653_v25, %v655_v8 }
  0x91   : > { %5205 = vst [vmem:[#allocation49_spill] sm:$0xff] %v3698_v57 }
  0x92   : > { %5209 = vst [vmem:[#allocation53_spill] sm:$0xff] %v3721_v45  ;;  %1740 = vmatpush.msra.mxu2 %v1431_v9  ;;  %v5133_v9 = vrot.slane %v3501_v26, 2 }
  0x93   : > { %2577 = vrot.lane.b32.xlu0 %v3618_v50, %s3035_s7  ;;  %2351 = vmatmul.msk.f32.vlgmr.msra.gmra.mxu2 %vm196_vm0, %v3562_v61 }
  0x96   : > { %2587 = vrot.lane.b32.xlu2 %v2586_v3, %s3035_s7  ;;  %v645_v3 = vrot.slane %v3421_v35, 2  ;;  %v2601_v35 = vpack.i.bf16 %v3664_v38, %v3661_v46  ;;  %v648_v38 = vrot.slane %v3459_v5, 2  ;;  %v657_v46 = vrot.slane %v3466_v40, 2 }
  0x97   : > { %2582 = vrot.lane.b32.xlu1 %v3652_v16, %s3035_s7 }
  0x98   : > { %v3701_v24 = vsel %vm586_vm4, %v643_v47, %v645_v3  ;;  %v3718_v3 = vsel %vm586_vm4, %v652_v34, %v653_v25  ;;  %v3730_v55 = vsel %vm586_vm4, %v647_v30, %v648_v38  ;;  %v3733_v34 = vsel %vm586_vm4, %v648_v38, %v650_v23 }
  0x99   : > { %5206 = vst [vmem:[#allocation50_spill] sm:$0xff] %v3701_v24  ;;  %v3715_v47 = vpack.i.bf16 %v3701_v24, %v3698_v57  ;;  %v2616_v8 = vpack.i.bf16 %v3721_v45, %v3718_v3  ;;  %v3747_v61 = vpack.i.bf16 %v3733_v34, %v3730_v55  ;;  %v662_v38 = vrot.slane %v3499_v12, 2  ;;  %v5239_v24 = vld [vmem:[#allocation30_spill] sm:$0xff] }
  0x9a   : > { %5208 = vst [vmem:[#allocation52_spill] sm:$0xff] %v3718_v3 }
  0x9b   : > { %2592 = vrot.lane.b32.xlu0 %v2591_v2, %s3035_s7  ;;  %v2596_v2 = vpack.i.bf16 %v3685_v29, %v3682_v53  ;;  %5207 = vst [vmem:[#allocation51_spill] sm:$0xff] %v3715_v47  ;;  %v660_v29 = vrot.slane %v5210_v56, 2  ;;  %2352 = vmatmul.msk.f32.gmra.mxu2 %vm196_vm0, %v3565_v33  ;;  %v5215_v33 = vld [vmem:[#allocation9_spill] sm:$0xff] }
  0x9c   : > { %5211 = vst [vmem:[#allocation33_spill] sm:$0xff] %v3730_v55  ;;  %v2646_v23 = vpack.i.bf16 %v5215_v33, %v3268_v41  ;;  %v3956_v55 = vld [vmem:[%s5051_s1 + $0xd8] sm:$0xff] }
  0x9d   : > { %5212 = vst [vmem:[#allocation54_spill] sm:$0xff] %v3733_v34 }
  0x9e   : > { %2602 = vrot.lane.b32.xlu2 %v2601_v35, %s3035_s7  ;;  %v658_v35 = vrot.slane %v3469_v51, 2  ;;  %5213 = vst [vmem:[#allocation55_spill] sm:$0xff] %v3747_v61 }
  0x9f   : > { %2597 = vrot.lane.b32.xlu1 %v2596_v2, %s3035_s7  ;;  %v5214_v2 = vld [vmem:[#allocation8_spill] sm:$0xff] }
  0xa0   : > { %v3740_v25 = vsel %vm586_vm4, %v657_v46, %v658_v35  ;;  %v3743_v5 = vsel %vm586_vm4, %v658_v35, %v660_v29  ;;  %v3761_v46 = vsel %vm586_vm4, %v662_v38, %v5133_v9  ;;  %v2636_v30 = vpack.i.bf16 %v5214_v2, %v3264_v39 }
  0xa1   : > { %v2621_v37 = vpack.i.bf16 %v3743_v5, %v3740_v25  ;;  %v2626_v29 = vpack.i.bf16 %v3243_v28, %v3761_v46  ;;  %v2641_v35 = vpack.i.bf16 %v3305_v60, %v3253_v32  ;;  %v2661_v39 = vpack.i.bf16 %v3228_v19, %v3312_v63 }
  0xa3   : > { %2607 = vrot.lane.b32.xlu0 %v3715_v47, %s3035_s7  ;;  %2353 = vmatmul.msk.f32.gmra.mxu2 %vm196_vm0, %v3587_v0  ;;  %v5216_v0 = vld [vmem:[#allocation14_spill] sm:$0xff] }
  0xa4   : > { %v2656_v56 = vpack.i.bf16 %v5216_v0, %v3243_v28  ;;  %v5231_v0 = vrot.slane %v3501_v26, 2 }
  0xa6   : > { %2617 = vrot.lane.b32.xlu2 %v2616_v8, %s3035_s7  ;;  %v5217_v8 = vld [vmem:[#allocation15_spill] sm:$0xff] }
  0xa7   : > { %2612 = vrot.lane.b32.xlu1 %v3747_v61, %s3035_s7  ;;  %v2666_v38 = vpack.i.bf16 %v5217_v8, %v3253_v32 }
  0xab   : > { %2622 = vrot.lane.b32.xlu0 %v2621_v37, %s3035_s7  ;;  %2354 = vmatmul.msk.f32.gmra.mxu2 %vm196_vm0, %v3590_v54  ;;  %v272_v54 = vld [vmem:[%s3199_s6 + $0xf0] sm:$0xff] }
  0xac   : > { %305 = vst.msk [vmem:[#allocation2 + $0x181] sm:$0xff] %vm196_vm0, %v272_v54 }
  0xae   : > { %2632 = vrot.lane.b32.xlu2 %v3555_v1, %s3034_s27  ;;  %v3779_v1 = vpop.permute.xlu2 %2492 }
  0xaf   : > { %2627 = vrot.lane.b32.xlu1 %v2626_v29, %s3035_s7  ;;  %v5218_v29 = vld [vmem:[#allocation6_spill] sm:$0xff] }
  0xb3   : > { %2637 = vrot.lane.b32.xlu0 %v2636_v30, %s3036_s22  ;;  %2355 = vmatmul.msk.f32.gmra.mxu2 %vm196_vm0, %v3577_v42  ;;  %v2681_v30 = vpack.i.bf16 %v3487_v31, %v5218_v29  ;;  %v273_v42 = vld [vmem:[%s3199_s6 + $0xf8] sm:$0xff]  ;;  %v2686_v31 = vpack.i.bf16 %v3284_v49, %v3232_v21  ;;  %v2494_v29 = vunpack.i.l.bf16 %v3779_v1  ;;  %s2232_s6 = scalar_lea.hbm %s5054_s4, %s2389_s29 }
  0xb4   : > { %306 = vst.msk [vmem:[#allocation2 + $0x189] sm:$0xff] %vm196_vm0, %v273_v42  ;;  %s2235_s8 = sshll.u32 %s2232_s6, 4  ;;  %s2236_s8 = int_to_ptr.hbm [resolvable:$true] %s2235_s8 }
  0xb5   : > { %s2983_s10 = sshra.s32 %s2236_s8, 4  ;;  %s2984_s10 = int_to_ptr.hbm [resolvable:$true] %s2983_s10 }
  0xb6   : > { %2647 = vrot.lane.b32.xlu2 %v2646_v23, %s3036_s22  ;;  %v3793_v37 = vpop.permute.xlu2 %2497  ;;  %s2985_s11 = scalar_lea.hbm %s2984_s10, 64  ;;  %p2990_p0 = scmp.lt.s32.totalorder %s2984_s10, %s5054_s4 }
  0xb7   : > { %2642 = vrot.lane.b32.xlu1 %v2641_v35, %s3035_s7  ;;  %v5219_v35 = vld [vmem:[#allocation7_spill] sm:$0xff]  ;;  %p2986_p11 = scmp.ne.s32.totalorder %s2984_s10, %s2985_s11 }
  0xb9   : > { %p2987_p12 = pnand %p2986_p11, %p3102_p5 }
  0xbb   : > { %2652 = vrot.lane.b32.xlu0 %v3574_v22, %s3034_s27  ;;  %v2671_v22 = vpack.i.bf16 %v3305_v60, %v3485_v6  ;;  %2356 = vmatmul.msk.f32.gmra.mxu2 %vm196_vm0, %v3580_v44  ;;  %v2691_v6 = vpack.i.bf16 %v5219_v35, %v3312_v63  ;;  %v5220_v44 = vld [vmem:[#allocation12_spill] sm:$0xff]  ;;  %v3907_v34 = vld [vmem:[#allocation2 + $0x188] sm:$0xff]  ;;  %p2988_p13 = pneg %p2987_p12 }
  0xbe   : > { %2662 = vrot.lane.b32.xlu2 %v2661_v39, %s3035_s7  ;;  %v3807_v23 = vpop.permute.xlu2 %2512  ;;  %v2696_v39 = vpack.i.bf16 %v3228_v19, %v3466_v40 }
  0xbf   : > { %2657 = vrot.lane.b32.xlu1 %v2656_v56, %s3036_s22 }
  0xc3   : > { %2667 = vrot.lane.b32.xlu0 %v2666_v38, %s3036_s22  ;;  %2357 = vmatmul.msk.f32.gmra.mxu2 %vm196_vm0, %v3602_v20  ;;  %v2706_v38 = vpack.i.bf16 %v3469_v51, %v5220_v44  ;;  %v2721_v20 = vpack.i.bf16 %v3284_v49, %v3499_v12 }
  0xc6   : > { %2677 = vrot.lane.b32.xlu2 %v3609_v18, %s3034_s27  ;;  %v3817_v18 = vpop.permute.xlu0 %2472 }
  0xc7   : > { %2672 = vrot.lane.b32.xlu1 %v2671_v22, %s3036_s22  ;;  %v3831_v22 = vpop.permute.xlu1 %2482 }
  0xc8   : > { %v2485_v2 = vunpack.i.h.bf16 %v3831_v22 }
  0xcb   : > { %2682 = vrot.lane.b32.xlu0 %v2681_v30, %s3036_s22  ;;  %v2711_v30 = vpack.i.bf16 %v3327_v10, %v3290_v52  ;;  %2358 = vmatmul.msk.f32.gmra.mxu2 %vm196_vm0, %v3605_v7 }
  0xce   : > { %2692 = vrot.lane.b32.xlu2 %v2691_v6, %s3036_s22  ;;  %v3834_v54 = vpop.permute.xlu0 %2477 }
  0xcf   : > { %2687 = vrot.lane.b32.xlu1 %v2686_v31, %s3035_s7  ;;  %5221 = vst [vmem:[#allocation56_spill] sm:$0xff] %v3834_v54  ;;  %v3847_v6 = vpop.permute.xlu1 %2487  ;;  %v2480_v9 = vunpack.i.h.bf16 %v3834_v54  ;;  %v1210_v54 = vsel %vm196_vm0, %v3253_v32, %v2485_v2  ;;  %v4111_v32 = vld [vmem:[%s5051_s1 + $0x98] sm:$0xff] }
  0xd0   : > { %v3824_v56 = vpop.permute.xlu2 %2527  ;;  %5249 = vst [vmem:[#allocation70_spill] sm:$0xff] %v4111_v32  ;;  %v2490_v2 = vunpack.i.h.bf16 %v3847_v6 }
  0xd3   : > { %2697 = vrot.lane.b32.xlu0 %v2696_v39, %s3036_s22  ;;  %v5222_v39 = vld [vmem:[#allocation13_spill] sm:$0xff]  ;;  %2359 = vmatmul.msk.f32.gmra.mxu2 %vm196_vm0, %v3632_v14  ;;  %v2495_v14 = vunpack.i.h.bf16 %v3779_v1  ;;  %v3889_v1 = vld [vmem:[%s5051_s1 + $0xf8] sm:$0xff] }
  0xd4   : > { %1612 = vmatpush.msra.mxu1 %v3889_v1 }
  0xd6   : > { %2707 = vrot.lane.b32.xlu2 %v2706_v38, %s3036_s22  ;;  %v3850_v31 = vpop.permute.xlu0 %2502  ;;  %v2716_v38 = vpack.i.bf16 %v5222_v39, %v3232_v21  ;;  %v1208_v39 = vsel %vm196_vm0, %v3268_v41, %v2480_v9  ;;  %v5226_v41 = vld [vmem:[#allocation19_spill] sm:$0xff] }
  0xd7   : > { %2702 = vrot.lane.b32.xlu1 %v3594_v4, %s3034_s27  ;;  %v2508_v44 = vpop.permute.xlu1 %2507  ;;  %v2741_v9 = vpack.i.bf16 %v5226_v41, %v3290_v52 }
  0xd8   : > { %v3839_v42 = vpop.permute.xlu2 %2542 }
  0xdb   : > { %2712 = vrot.lane.b32.xlu0 %v2711_v30, %s3035_s7  ;;  %v2736_v30 = vpack.i.bf16 %v3371_v43, %v3334_v13  ;;  %2360 = vmatmul.msk.f32.gmra.mxu2 %vm196_vm0, %v3635_v11  ;;  %v1214_v11 = vsel %vm196_vm0, %v3232_v21, %v2495_v14  ;;  %v3915_v21 = vld [vmem:[%s5051_s1 + $0xf0] sm:$0xff] }
  0xdc   : > { %1613 = vmatpush.msra.mxu1 %v3915_v21 }
  0xde   : > { %2722 = vrot.lane.b32.xlu2 %v2721_v20, %s3036_s22 }
  0xdf   : > { %2717 = vrot.lane.b32.xlu1 %v2716_v38, %s3036_s22  ;;  %v5225_v38 = vld [vmem:[#allocation18_spill] sm:$0xff] }
  0xe0   : > { %v3856_v4 = vpop.permute.xlu2 %2557  ;;  %v2731_v61 = vpack.i.bf16 %v3501_v26, %v5225_v38 }
  0xe1   : > { %5223 = vst [vmem:[#allocation57_spill] sm:$0xff] %v3856_v4  ;;  %v2560_v7 = vunpack.i.h.bf16 %v3856_v4  ;;  %v2484_v4 = vunpack.i.l.bf16 %v3831_v22  ;;  %v4056_v22 = vld [vmem:[%s5051_s1 + $0xb0] sm:$0xff] }
  0xe2   : > { %5242 = vst [vmem:[#allocation67_spill] sm:$0xff] %v4056_v22 }
  0xe3   : > { %2727 = vrot.lane.b32.xlu0 %v3618_v50, %s3034_s27  ;;  %v3869_v20 = vsel %vm1237_vm5, %v1208_v39, %v2560_v7  ;;  %v1414_v7 = vld [vmem:[%s5051_s1 + $0x78] sm:$0xff]  ;;  %2361 = vmatmul.msk.f32.gmra.mxu2 %vm196_vm0, %v3621_v36 }
  0xe4   : > { %5224 = vst [vmem:[#allocation58_spill] sm:$0xff] %v3869_v20  ;;  %1499 = vmatpush.msra.mxu0 %v1414_v7  ;;  %2390 = vmatpush.msra.mxu3 %v1414_v7  ;;  %v1412_v7 = vld [vmem:[%s5051_s1 + $0x68] sm:$0xff] }
  0xe5   : > { %v3871_v35 = vpop.permute.xlu0 %2517 }
  0xe6   : > { %2737 = vrot.lane.b32.xlu2 %v2736_v30, %s3035_s7  ;;  %v3891_v30 = vld [vmem:[#allocation2 + $0x180] sm:$0xff] }
  0xe7   : > { %2732 = vrot.lane.b32.xlu1 %v2731_v61, %s3036_s22  ;;  %v1213_v61 = vsel %vm196_vm0, %v3228_v19, %v2494_v29  ;;  %v1413_v19 = vld [vmem:[%s5051_s1 + $0x70] sm:$0xff]  ;;  %v2746_v14 = vpack.i.bf16 %v3327_v10, %v3891_v30 }
  0xe8   : > { %v2573_v8 = vpop.permute.xlu2 %2572  ;;  %1500 = vmatpush.msra.mxu0 %v1413_v19  ;;  %2391 = vmatpush.msra.mxu3 %v1413_v19 }
  0xe9   : > { %v2575_v50 = vunpack.i.h.bf16 %v2573_v8  ;;  %v2574_v39 = vunpack.i.l.bf16 %v2573_v8  ;;  %v3898_v8 = vpop.permute.xlu1 %2522 }
  0xea   : > { %1501 = vmatpush.msra.mxu0 %v1412_v7  ;;  %2392 = vmatpush.msra.mxu3 %v1412_v7  ;;  %v5233_v7 = vld [vmem:[#allocation24_spill] sm:$0xff] }
  0xeb   : > { %2742 = vrot.lane.b32.xlu0 %v2741_v9, %s3036_s22  ;;  %v3902_v41 = vsel %vm1237_vm5, %v1213_v61, %v2574_v39  ;;  %v3905_v38 = vsel %vm1237_vm5, %v1214_v11, %v2575_v50  ;;  %v665_v9 = vrot.slane %v3503_v58, 2  ;;  %v2510_v50 = vunpack.i.h.bf16 %v2508_v44  ;;  %v3931_v61 = vld [vmem:[%s5051_s1 + $0xe8] sm:$0xff]  ;;  %v1411_v58 = vld [vmem:[%s5051_s1 + $0x60] sm:$0xff]  ;;  %v5230_v11 = vld [vmem:[#allocation23_spill] sm:$0xff]  ;;  %2362 = vmatmul.msk.f32.gmra.mxu2 %vm196_vm0, %v3624_v59 }
  0xec   : > { %5227 = vst [vmem:[#allocation59_spill] sm:$0xff] %v3902_v41  ;;  %v2509_v39 = vunpack.i.l.bf16 %v2508_v44  ;;  %v2756_v44 = vpack.i.bf16 %v3907_v34, %v5230_v11  ;;  %1614 = vmatpush.msra.mxu1 %v3931_v61  ;;  %1502 = vmatpush.msra.mxu0 %v1411_v58  ;;  %v1410_v11 = vld [vmem:[%s5051_s1 + $0x58] sm:$0xff] }
  0xed   : > { %5228 = vst [vmem:[#allocation60_spill] sm:$0xff] %v3905_v38  ;;  %v3917_v29 = vpop.permute.xlu0 %2532  ;;  %v3948_v19 = vsel %vm586_vm4, %v5231_v0, %v665_v9  ;;  %2393 = vmatpush.msra.mxu3 %v1411_v58  ;;  %v3999_v58 = vld [vmem:[%s5051_s1 + $0xc8] sm:$0xff] }
  0xee   : > { %5229 = vst [vmem:[#allocation61_spill] sm:$0xff] %v3917_v29  ;;  %2752 = vrot.lane.b32.xlu2 %v3652_v16, %s3034_s27  ;;  %v3942_v16 = vld [vmem:[%s5051_s1 + $0xe0] sm:$0xff]  ;;  %v1219_v0 = vsel %vm196_vm0, %v3371_v43, %v2509_v39  ;;  %1503 = vmatpush.msra.mxu0 %v1410_v11  ;;  %v1409_v39 = vld [vmem:[%s5051_s1 + $0x50] sm:$0xff] }
  0xef   : > { %2747 = vrot.lane.b32.xlu1 %v2746_v14, %s3036_s22  ;;  %5232 = vst [vmem:[#allocation62_spill] sm:$0xff] %v3948_v19  ;;  %v2766_v14 = vpack.i.bf16 %v5233_v7, %v3334_v13  ;;  %1615 = vmatpush.msra.mxu1 %v3942_v16 }
  0xf0   : > { %v2588_v38 = vpop.permute.xlu2 %2587  ;;  %1504 = vmatpush.msra.mxu0 %v1409_v39  ;;  %2394 = vmatpush.msra.mxu3 %v1410_v11  ;;  %v2781_v11 = vpack.i.bf16 %v3371_v43, %v3512_v15 }
  0xf1   : > { %v2590_v41 = vunpack.i.h.bf16 %v2588_v38  ;;  %v2589_v47 = vunpack.i.l.bf16 %v2588_v38  ;;  %v1220_v38 = vsel %vm196_vm0, %v3377_v48, %v2510_v50  ;;  %v3967_v9 = vpop.permute.xlu1 %2537  ;;  %1616 = vmatpush.msra.mxu1 %v3956_v55  ;;  %v3983_v50 = vld [vmem:[%s5051_s1 + $0xd0] sm:$0xff] }
  0xf2   : > { %5234 = vst [vmem:[#allocation63_spill] sm:$0xff] %v3967_v9  ;;  %2395 = vmatpush.msra.mxu3 %v1409_v39  ;;  %v4071_v39 = vld [vmem:[%s5051_s1 + $0xa8] sm:$0xff] }
  0xf3   : > { %2757 = vrot.lane.b32.xlu0 %v2756_v44, %s3036_s22  ;;  %v3971_v20 = vsel %vm1237_vm5, %v1219_v0, %v2589_v47  ;;  %v3974_v7 = vsel %vm1237_vm5, %v1220_v38, %v2590_v41  ;;  %v2761_v47 = vpack.i.bf16 %v3377_v48, %v3948_v19  ;;  %v2525_v41 = vunpack.i.h.bf16 %v3898_v8  ;;  %1617 = vmatpush.msra.mxu1 %v3983_v50  ;;  %v1408_v38 = vld [vmem:[%s5051_s1 + $0x48] sm:$0xff] }
  0xf4   : > { %5235 = vst [vmem:[#allocation64_spill] sm:$0xff] %v3971_v20  ;;  %v2524_v0 = vunpack.i.l.bf16 %v3898_v8  ;;  %v2771_v8 = vpack.i.bf16 %v3621_v36, %v3718_v3  ;;  %1505 = vmatpush.msra.mxu0 %v1408_v38  ;;  %v4019_v36 = vld [vmem:[%s5051_s1 + $0x38] sm:$0xff]  ;;  %2396 = vmatpush.msra.mxu3 %v1408_v38  ;;  %v2489_v38 = vunpack.i.l.bf16 %v3847_v6  ;;  %v4126_v6 = vld [vmem:[%s5051_s1 + $0x10] sm:$0xff] }
  0xf5   : > { %5236 = vst [vmem:[#allocation65_spill] sm:$0xff] %v3974_v7  ;;  %v3985_v44 = vpop.permute.xlu0 %2547  ;;  %v4004_v7 = vld [vmem:[%s5051_s1 + $0x40] sm:$0xff]  ;;  %1618 = vmatpush.msra.mxu1 %v3999_v58  ;;  %v4024_v3 = vld [vmem:[%s5051_s1 + $0xb8] sm:$0xff]  ;;  %v1226_v29 = vsel %vm196_vm0, %v5239_v24, %v2525_v41  ;;  %v4051_v24 = vld [vmem:[%s5051_s1 + $0x30] sm:$0xff]  ;;  %2363 = vmatmul.msk.f32.gmra.mxu2 %vm196_vm0, %v3645_v27 }
  0xf6   : > { %2767 = vrot.lane.b32.xlu2 %v2766_v14, %s3036_s22  ;;  %v4011_v14 = vld [vmem:[%s5051_s1 + $0xc0] sm:$0xff]  ;;  %1506 = vmatpush.msra.mxu0 %v4004_v7  ;;  %5237 = vst [vmem:[#allocation66_spill] sm:$0xff] %v4024_v3 }
  0xf7   : > { %2762 = vrot.lane.b32.xlu1 %v2761_v47, %s3035_s7  ;;  %1619 = vmatpush.msra.mxu1 %v4011_v14 }
  0xf8   : > { %v2603_v20 = vpop.permute.xlu2 %2602  ;;  %1507 = vmatpush.msra.mxu0 %v4019_v36  ;;  %2397 = vmatpush.msra.mxu3 %v4004_v7  ;;  %v1400_v7 = vld [vmem:[%s5051_s1 + $0x8] sm:$0xff] }
  0xf9   : > { %v2605_v9 = vunpack.i.h.bf16 %v2603_v20  ;;  %v2604_v33 = vunpack.i.l.bf16 %v2603_v20  ;;  %v5238_v20 = vld [vmem:[#allocation29_spill] sm:$0xff]  ;;  %v4037_v57 = vpop.permute.xlu1 %2552  ;;  %1620 = vmatpush.msra.mxu1 %v4024_v3  ;;  %v2499_v3 = vunpack.i.l.bf16 %v3793_v37 }
  0xfa   : > { %v1225_v47 = vsel %vm196_vm0, %v5238_v20, %v2524_v0  ;;  %1508 = vmatpush.msra.mxu0 %v4051_v24  ;;  %2398 = vmatpush.msra.mxu3 %v4019_v36  ;;  %v2505_v36 = vunpack.i.h.bf16 %v3850_v31 }
  0xfb   : > { %2772 = vrot.lane.b32.xlu0 %v2771_v8, %s3034_s27  ;;  %v4042_v43 = vsel %vm1237_vm5, %v1225_v47, %v2604_v33  ;;  %v4045_v15 = vsel %vm1237_vm5, %v1226_v29, %v2605_v9  ;;  %v5243_v33 = vld [vmem:[#allocation16_spill] sm:$0xff]  ;;  %1621 = vmatpush.msra.mxu1 %v4056_v22  ;;  %v4066_v8 = vld [vmem:[%s5051_s1 + $0x28] sm:$0xff] }
  0xfc   : > { %5240 = vst [vmem:[#allocation29_spill] sm:$0xff] %v4042_v43  ;;  %v2776_v0 = vpack.i.bf16 %v5243_v33, %v3466_v40  ;;  %v4076_v40 = vld [vmem:[%s5051_s1 + $0x20] sm:$0xff]  ;;  %1509 = vmatpush.msra.mxu0 %v4066_v8  ;;  %v1209_v43 = vsel %vm196_vm0, %v3243_v28, %v2484_v4  ;;  %v4106_v28 = vld [vmem:[%s5051_s1 + $0x18] sm:$0xff]  ;;  %2399 = vmatpush.msra.mxu3 %v4051_v24 }
  0xfd   : > { %5241 = vst [vmem:[#allocation30_spill] sm:$0xff] %v4045_v15  ;;  %v2563_v41 = vpop.permute.xlu0 %2562  ;;  %v5244_v47 = vld [vmem:[#allocation20_spill] sm:$0xff]  ;;  %1622 = vmatpush.msra.mxu1 %v4071_v39  ;;  %2364 = vmatmul.msk.f32.gmra.mxu2 %vm196_vm0, %v3648_v17  ;;  %v1218_v24 = vsel %vm196_vm0, %v3334_v13, %v2505_v36  ;;  %v2519_v36 = vunpack.i.l.bf16 %v3871_v35 }
  0xfe   : > { %v2565_v29 = vunpack.i.h.bf16 %v2563_v41  ;;  %v2564_v9 = vunpack.i.l.bf16 %v2563_v41  ;;  %2782 = vrot.lane.b32.xlu2 %v2781_v11, %s3036_s22  ;;  %v5245_v41 = vld [vmem:[#allocation39_spill] sm:$0xff]  ;;  %v4084_v15 = vld [vmem:[%s5051_s1 + $0xa0] sm:$0xff]  ;;  %1510 = vmatpush.msra.mxu0 %v4076_v40 }
  0xff   : > { %v2786_v11 = vpack.i.bf16 %v5245_v41, %v5244_v47  ;;  %2777 = vrot.lane.b32.xlu1 %v2776_v0, %s3035_s7  ;;  %1623 = vmatpush.msra.mxu1 %v4084_v15 }
 0x100   : > { %v4090_v22 = vpop.permute.xlu2 %2617  ;;  %v4094_v47 = vsel %vm1237_vm5, %v1209_v43, %v2564_v9  ;;  %v4097_v41 = vsel %vm1237_vm5, %v1210_v54, %v2565_v29  ;;  %v5250_v54 = vld [vmem:[#allocation17_spill] sm:$0xff]  ;;  %v2500_v43 = vunpack.i.h.bf16 %v3793_v37  ;;  %1511 = vmatpush.msra.mxu0 %v4106_v28  ;;  %2400 = vmatpush.msra.mxu3 %v4066_v8 }
 0x101   : > { %5246 = vst [vmem:[#allocation16_spill] sm:$0xff] %v4090_v22  ;;  %v2796_v4 = vpack.i.bf16 %v5250_v54, %v3469_v51  ;;  %v2568_v0 = vpop.permute.xlu1 %2567  ;;  %1624 = vmatpush.msra.mxu1 %v4111_v32  ;;  %v1215_v22 = vsel %vm196_vm0, %v3284_v49, %v2499_v3  ;;  %v1212_v3 = vsel %vm196_vm0, %v3312_v63, %v2490_v2  ;;  %v2504_v2 = vunpack.i.l.bf16 %v3850_v31 }
 0x102   : > { %5247 = vst [vmem:[#allocation68_spill] sm:$0xff] %v4094_v47  ;;  %v2570_v29 = vunpack.i.h.bf16 %v2568_v0  ;;  %v2569_v9 = vunpack.i.l.bf16 %v2568_v0  ;;  %1512 = vmatpush.msra.mxu0 %v4126_v6  ;;  %v1211_v0 = vsel %vm196_vm0, %v3305_v60, %v2489_v38  ;;  %v4154_v60 = vld [vmem:[%s5051_s1] sm:$0xff]  ;;  %v5251_v38 = vld [vmem:[#allocation21_spill] sm:$0xff]  ;;  %2401 = vmatpush.msra.mxu3 %v4076_v40  ;;  %v2520_v40 = vunpack.i.h.bf16 %v3871_v35  ;;  %v5254_v35 = vld [vmem:[#allocation43_spill] sm:$0xff] }
 0x103   : > { %5248 = vst [vmem:[#allocation69_spill] sm:$0xff] %v4097_v41  ;;  %2787 = vrot.lane.b32.xlu0 %v2786_v11, %s3036_s22  ;;  %v4131_v41 = vld [vmem:[%s5051_s1 + $0x90] sm:$0xff]  ;;  %v2791_v11 = vpack.i.bf16 %v3624_v59, %v3721_v45  ;;  %v4149_v59 = vld [vmem:[%s5051_s1 + $0x88] sm:$0xff] }
 0x104   : > { %1625 = vmatpush.msra.mxu1 %v4131_v41  ;;  %v4157_v49 = vsel %vm1237_vm5, %v1211_v0, %v2569_v9  ;;  %1513 = vmatpush.msra.mxu0 %v1400_v7  ;;  %v4170_v45 = vsel %vm1237_vm5, %v1212_v3, %v2570_v29  ;;  %v1216_v9 = vsel %vm196_vm0, %v3290_v52, %v2500_v43 }
 0x105   : > { %v2578_v37 = vpop.permute.xlu0 %2577  ;;  %v2811_v52 = vpack.i.bf16 %v3392_v62, %v3499_v12  ;;  %v1217_v3 = vsel %vm196_vm0, %v3327_v10, %v2504_v2  ;;  %2402 = vmatpush.msra.mxu3 %v4106_v28  ;;  %2365 = vmatmul.msk.f32.gmra.mxu2 %vm196_vm0, %v3682_v53 }
 0x106   : > { %v2580_v47 = vunpack.i.h.bf16 %v2578_v37  ;;  %v2579_v32 = vunpack.i.l.bf16 %v2578_v37  ;;  %2797 = vrot.lane.b32.xlu2 %v2796_v4, %s3035_s7  ;;  %v2801_v4 = vpack.i.bf16 %v5251_v38, %v3377_v48  ;;  %v4166_v37 = vld [vmem:[%s5051_s1 + $0x80] sm:$0xff]  ;;  %1626 = vmatpush.msra.mxu1 %v4149_v59 }
 0x107   : > { %2792 = vrot.lane.b32.xlu1 %v2791_v11, %s3034_s27  ;;  %1514 = vmatpush.msra.mxu0 %v4154_v60  ;;  %v2806_v11 = vpack.i.bf16 %v3645_v27, %v3740_v25 }
 0x108   : > { %v4174_v0 = vpop.permute.xlu2 %2632  ;;  %v4178_v63 = vsel %vm1237_vm5, %v1215_v22, %v2579_v32  ;;  %v4181_v48 = vsel %vm1237_vm5, %v1216_v9, %v2580_v47  ;;  %1627 = vmatpush.msra.mxu1 %v4166_v37  ;;  %v2515_v22 = vunpack.i.h.bf16 %v3807_v23  ;;  %v2514_v47 = vunpack.i.l.bf16 %v3807_v23  ;;  %2403 = vmatpush.msra.mxu3 %v4126_v6 }
 0x109   : > { %v2583_v32 = vpop.permute.xlu1 %2582 }
 0x10a   : > { %v2585_v43 = vunpack.i.h.bf16 %v2583_v32  ;;  %v2584_v29 = vunpack.i.l.bf16 %v2583_v32  ;;  %v1221_v10 = vsel %vm196_vm0, %v5243_v33, %v2514_v47  ;;  %v1222_v8 = vsel %vm196_vm0, %v5250_v54, %v2515_v22  ;;  %2404 = vmatpush.msra.mxu3 %v1400_v7 }
 0x10b   : > { %2802 = vrot.lane.b32.xlu0 %v2801_v4, %s3036_s22  ;;  %v5252_v4 = vld [vmem:[#allocation42_spill] sm:$0xff]  ;;  %v2530_v54 = vunpack.i.h.bf16 %v3824_v56 }
 0x10c   : > { %v4203_v23 = vsel %vm1237_vm5, %v1217_v3, %v2584_v29  ;;  %v2816_v32 = vpack.i.bf16 %v5243_v33, %v5252_v4  ;;  %v4211_v27 = vsel %vm1237_vm5, %v1218_v24, %v2585_v43  ;;  %v2826_v33 = vpack.i.bf16 %v3648_v17, %v3743_v5  ;;  %v5253_v29 = vld [vmem:[#allocation27_spill] sm:$0xff]  ;;  %2405 = vmatpush.msra.mxu3 %v4154_v60 }
 0x10d   : > { %v2593_v31 = vpop.permute.xlu0 %2592  ;;  %v1223_v17 = vsel %vm196_vm0, %v3392_v62, %v2519_v36  ;;  %v2841_v60 = vpack.i.bf16 %v3682_v53, %v3761_v46  ;;  %v2948_v53 = vld [vmem:[#allocation2 + $0xc8] sm:$0xff] }
 0x10e   : > { %v2595_v9 = vunpack.i.h.bf16 %v2593_v31  ;;  %v2594_v38 = vunpack.i.l.bf16 %v2593_v31  ;;  %2812 = vrot.lane.b32.xlu2 %v2811_v52, %s3035_s7  ;;  %v2821_v31 = vpack.i.bf16 %v5254_v35, %v5253_v29  ;;  %2406 = vmatpush.msrb.mxu3 %v3889_v1  ;;  %v863_v1 = vrot.slane %v3907_v34, 1 }
 0x10f   : > { %2807 = vrot.lane.b32.xlu1 %v2806_v11, %s3034_s27 }
 0x110   : > { %v4217_v2 = vpop.permute.xlu2 %2647  ;;  %v4220_v52 = vsel %vm1237_vm5, %v1221_v10, %v2594_v38  ;;  %v4223_v13 = vsel %vm1237_vm5, %v1222_v8, %v2595_v9  ;;  %v2529_v38 = vunpack.i.l.bf16 %v3824_v56  ;;  %v5256_v9 = vld [vmem:[#allocation22_spill] sm:$0xff]  ;;  %2407 = vmatpush.msrb.mxu3 %v3915_v21  ;;  %v862_v21 = vrot.slane %v3891_v30, 1 }
 0x111   : > { %v2598_v22 = vpop.permute.xlu1 %2597  ;;  %v1224_v6 = vsel %vm196_vm0, %v5256_v9, %v2520_v40  ;;  %v2831_v24 = vpack.i.bf16 %v5256_v9, %v3501_v26  ;;  %v5259_v10 = vld [vmem:[#allocation26_spill] sm:$0xff] }
 0x112   : > { %v2600_v47 = vunpack.i.h.bf16 %v2598_v22  ;;  %v2599_v43 = vunpack.i.l.bf16 %v2598_v22  ;;  %v1228_v8 = vsel %vm196_vm0, %v5259_v10, %v2530_v54  ;;  %v2545_v54 = vunpack.i.h.bf16 %v3839_v42  ;;  %2408 = vmatpush.msrb.mxu3 %v3931_v61 }
 0x113   : > { %2817 = vrot.lane.b32.xlu0 %v2816_v32, %s3036_s22  ;;  %v5258_v32 = vld [vmem:[#allocation25_spill] sm:$0xff] }
 0x114   : > { %v4243_v56 = vsel %vm1237_vm5, %v1223_v17, %v2599_v43  ;;  %v4251_v7 = vsel %vm1237_vm5, %v1224_v6, %v2600_v47  ;;  %v1227_v62 = vsel %vm196_vm0, %v5258_v32, %v2529_v38  ;;  %v5262_v38 = vld [vmem:[#allocation48_spill] sm:$0xff]  ;;  %2409 = vmatpush.msrb.mxu3 %v3942_v16  ;;  %v1234_v9 = vsel %vm196_vm0, %v3469_v51, %v2545_v54 }
 0x115   : > { %v2608_v28 = vpop.permute.xlu0 %2607  ;;  %5255 = vst [vmem:[#allocation17_spill] sm:$0xff] %v4243_v56  ;;  %2366 = vmatmul.msk.f32.gmra.mxu2 %vm196_vm0, %v5262_v38  ;;  %v2474_v16 = vunpack.i.l.bf16 %v3817_v18  ;;  %v2549_v32 = vunpack.i.l.bf16 %v3985_v44  ;;  %v5267_v51 = vld [vmem:[#allocation44_spill] sm:$0xff] }
 0x116   : > { %v2610_v11 = vunpack.i.h.bf16 %v2608_v28  ;;  %v2609_v3 = vunpack.i.l.bf16 %v2608_v28  ;;  %2827 = vrot.lane.b32.xlu2 %v2826_v33, %s3034_s27  ;;  %5257 = vst [vmem:[#allocation27_spill] sm:$0xff] %v4251_v7  ;;  %v4259_v33 = vld [vmem:[#allocation2 + $0x190] sm:$0x3]  ;;  %v5263_v28 = vld [vmem:[#allocation28_spill] sm:$0xff]  ;;  %2410 = vmatpush.msrb.mxu3 %v3956_v55  ;;  %v2554_v55 = vunpack.i.l.bf16 %v4037_v57 }
 0x117   : > { %2822 = vrot.lane.b32.xlu1 %v2821_v31, %s3036_s22  ;;  %v865_v47 = vrot.slane %v4259_v33, 1  ;;  %v2836_v31 = vpack.i.bf16 %v5263_v28, %v2948_v53 }
 0x118   : > { %v4257_v36 = vpop.permute.xlu2 %2662  ;;  %v4263_v40 = vsel %vm1237_vm5, %v1227_v62, %v2609_v3  ;;  %v4266_v26 = vsel %vm1237_vm5, %v1228_v8, %v2610_v11  ;;  %v2634_v11 = vunpack.i.l.bf16 %v4174_v0  ;;  %v2846_v3 = vpack.i.bf16 %v5238_v20, %v3891_v30  ;;  %v5266_v62 = vld [vmem:[#allocation34_spill] sm:$0xff]  ;;  %2411 = vmatpush.msrb.mxu3 %v3983_v50 }
 0x119   : > { %5260 = vst [vmem:[#allocation22_spill] sm:$0xff] %v4263_v40  ;;  %v4275_v22 = vpop.permute.xlu1 %2612  ;;  %v4292_v61 = vsel %vm409_vm3, %v863_v1, %v865_v47  ;;  %v4306_v20 = vsel %vm409_vm3, %v862_v21, %v863_v1  ;;  %v4317_v1 = vpop.f32.mrf.mxu2 }
 0x11a   : > { %5261 = vst [vmem:[#allocation25_spill] sm:$0xff] %v4266_v26  ;;  %v2856_v10 = vpack.i.bf16 %v4292_v61, %v5266_v62  ;;  %2412 = vmatpush.msrb.mxu3 %v3999_v58  ;;  %v1235_v26 = vsel %vm196_vm0, %v3499_v12, %v2549_v32 }
 0x11b   : > { %2832 = vrot.lane.b32.xlu0 %v2831_v24, %s3035_s7  ;;  %5264 = vst [vmem:[#allocation26_spill] sm:$0xff] %v4292_v61 }
 0x11c   : > { %5265 = vst [vmem:[#allocation48_spill] sm:$0xff] %v4306_v20  ;;  %2413 = vmatpush.msrb.mxu3 %v4011_v14  ;;  %v4339_v14 = vld [vmem:[#allocation2 + $0x198] sm:$0xff] }
 0x11d   : > { %v4281_v43 = vpop.permute.xlu0 %2622  ;;  %2367 = vmatmul.msk.f32.gmra.mxu2 %vm196_vm0, %v5267_v51 }
 0x11e   : > { %v2625_v17 = vunpack.i.h.bf16 %v4281_v43  ;;  %2842 = vrot.lane.b32.xlu2 %v2841_v60, %s3034_s27  ;;  %v5268_v60 = vld [vmem:[#allocation10_spill] sm:$0xff] }
 0x11f   : > { %2837 = vrot.lane.b32.xlu1 %v2836_v31, %s3036_s22  ;;  %v1303_v54 = vsel %vm196_vm0, %v5268_v60, %v2634_v11 }
 0x120   : > { %v4296_v6 = vpop.permute.xlu2 %2677  ;;  %v4300_v24 = vsel %vm1237_vm5, %v1234_v9, %v2625_v17  ;;  %v2949_v17 = vld [vmem:[#allocation2 + $0xd8] sm:$0xff]  ;;  %v2950_v9 = vld [vmem:[#allocation2] sm:$0xff] }
 0x121   : > { %v2628_v8 = vpop.permute.xlu1 %2627  ;;  %v2851_v21 = vpack.i.bf16 %v2949_v17, %v4306_v20  ;;  %v1205_v50 = vsel %vm196_vm0, %v2950_v9, %v2474_v16  ;;  %v2861_v16 = vpack.i.bf16 %v5262_v38, %v3948_v19  ;;  %v2951_v38 = vld [vmem:[#allocation2 + $0xe0] sm:$0xff]  ;;  %v2555_v9 = vunpack.i.h.bf16 %v4037_v57  ;;  %v360_v19 = vld [vmem:[#allocation2 + $0x1a8] sm:$0x3] }
 0x122   : > { %v2630_v47 = vunpack.i.h.bf16 %v2628_v8  ;;  %v2629_v53 = vunpack.i.l.bf16 %v2628_v8  ;;  %v1238_v8 = vsel %vm1237_vm5, %v1205_v50, %v2554_v55  ;;  %v2635_v55 = vunpack.i.h.bf16 %v4174_v0 }
 0x123   : > { %2847 = vrot.lane.b32.xlu0 %v2846_v3, %s3035_s7  ;;  %v2650_v57 = vunpack.i.h.bf16 %v4217_v2 }
 0x124   : > { %v1335_v11 = vsel %vm1237_vm5, %v1303_v54, %v2630_v47  ;;  %v4328_v58 = vsel %vm1237_vm5, %v1235_v26, %v2629_v53  ;;  %v5153_v54 = vrot.slane %v3907_v34, 2  ;;  %v4341_v26 = vld [vmem:[#allocation2 + $0x1a0] sm:$0xff]  ;;  %v5269_v47 = vld [vmem:[#allocation66_spill] sm:$0xff]  ;;  %v5270_v53 = vld [vmem:[#allocation35_spill] sm:$0xff] }
 0x125   : > { %v2638_v31 = vpop.permute.xlu0 %2637  ;;  %2414 = vmatpush.msrb.mxu3 %v5269_v47  ;;  %v1100_v0 = vrot.slane %v4341_v26, 1 }
 0x126   : > { %v2640_v3 = vunpack.i.h.bf16 %v2638_v31  ;;  %v2639_v40 = vunpack.i.l.bf16 %v2638_v31  ;;  %2857 = vrot.lane.b32.xlu2 %v2856_v10, %s3036_s22  ;;  %v899_v10 = vrot.slane %v3891_v30, 2  ;;  %v2871_v31 = vpack.i.bf16 %v5270_v53, %v2951_v38  ;;  %v5271_v30 = vld [vmem:[#allocation45_spill] sm:$0xff]  ;;  %v5274_v38 = vld [vmem:[#allocation11_spill] sm:$0xff] }
 0x127   : > { %2852 = vrot.lane.b32.xlu1 %v2851_v21, %s3036_s22  ;;  %2368 = vmatmul.msk.f32.gmra.mxu2 %vm196_vm0, %v5271_v30  ;;  %v5272_v21 = vld [vmem:[#allocation67_spill] sm:$0xff] }
 0x128   : > { %v1271_v17 = vsel %vm1270_vm6, %v1238_v8, %v2639_v40  ;;  %v1367_v12 = vsel %vm1270_vm6, %v1335_v11, %v2640_v3  ;;  %v4335_v32 = vpop.permute.xlu2 %2692  ;;  %v2475_v40 = vunpack.i.h.bf16 %v3817_v18  ;;  %v1099_v3 = vrot.slane %v4339_v14, 1  ;;  %2415 = vmatpush.msrb.mxu3 %v5272_v21 }
 0x129   : > { %1515 = vmatmul.f32.vlgmr.msra.gmra.mxu0 %v1271_v17  ;;  %1628 = vmatmul.f32.vlgmr.msra.gmra.mxu1 %v1367_v12  ;;  %v2643_v50 = vpop.permute.xlu1 %2642  ;;  %v2649_v18 = vunpack.i.l.bf16 %v4217_v2  ;;  %v4359_v8 = vsel %vm586_vm4, %v899_v10, %v5153_v54  ;;  %v4361_v17 = vpop.f32.mrf.mxu2  ;;  %v1304_v21 = vsel %vm196_vm0, %v5274_v38, %v2635_v55  ;;  %v2953_v10 = vld [vmem:[#allocation2 + $0x8] sm:$0xff] }
 0x12a   : > { %v2644_v11 = vunpack.i.l.bf16 %v2643_v50  ;;  %5273 = vst [vmem:[#allocation28_spill] sm:$0xff] %v4359_v8  ;;  %2416 = vmatpush.msrb.mxu3 %v4071_v39  ;;  %v1206_v54 = vsel %vm196_vm0, %v2953_v10, %v2475_v40  ;;  %v2876_v53 = vpack.i.bf16 %v5267_v51, %v4359_v8  ;;  %v1101_v56 = vsel %vm409_vm3, %v1099_v3, %v1100_v0  ;;  %v2954_v51 = vld [vmem:[#allocation2 + $0xf0] sm:$0xff]  ;;  %v5276_v3 = vld [vmem:[#allocation49_spill] sm:$0xff] }
 0x12b   : > { %2862 = vrot.lane.b32.xlu0 %v2861_v16, %s3034_s27  ;;  %v4366_v16 = vld [vmem:[#allocation2 + $0xf8] sm:$0xff]  ;;  %v1239_v7 = vsel %vm1237_vm5, %v1206_v54, %v2555_v9  ;;  %v1102_v39 = vrot.slane %v360_v19, 1  ;;  %v5275_v54 = vld [vmem:[#allocation56_spill] sm:$0xff]  ;;  %v5278_v19 = vld [vmem:[#allocation70_spill] sm:$0xff] }
 0x12c   : > { %v2866_v47 = vpack.i.bf16 %v4366_v16, %v3907_v34  ;;  %v1336_v2 = vsel %vm1237_vm5, %v1304_v21, %v2644_v11  ;;  %2417 = vmatpush.msrb.mxu3 %v4084_v15  ;;  %v1272_v55 = vsel %vm1270_vm6, %v1239_v7, %v2649_v18  ;;  %v2479_v9 = vunpack.i.l.bf16 %v5275_v54  ;;  %v5277_v15 = vld [vmem:[#allocation57_spill] sm:$0xff]  ;;  %v5288_v8 = vld [vmem:[#allocation46_spill] sm:$0xff] }
 0x12d   : > { %v4364_v12 = vpop.permute.xlu0 %2652  ;;  %v1368_v40 = vsel %vm1270_vm6, %v1336_v2, %v2650_v57  ;;  %v2886_v11 = vpack.i.bf16 %v2954_v51, %v1101_v56  ;;  %v2559_v7 = vunpack.i.l.bf16 %v5277_v15  ;;  %v2956_v51 = vld [vmem:[#allocation2 + $0x18] sm:$0xff] }
 0x12e   : > { %2872 = vrot.lane.b32.xlu2 %v2871_v31, %s3036_s22  ;;  %v2654_v31 = vunpack.i.l.bf16 %v4364_v12  ;;  %2418 = vmatpush.msrb.mxu3 %v5278_v19 }
 0x12f   : > { %2867 = vrot.lane.b32.xlu1 %v2866_v47, %s3035_s7  ;;  %2369 = vmatmul.msk.f32.gmra.mxu2 %vm196_vm0, %v5276_v3  ;;  %v1103_v47 = vsel %vm409_vm3, %v1100_v0, %v1102_v39  ;;  %v1207_v0 = vsel %vm196_vm0, %v2956_v51, %v2479_v9  ;;  %v902_v39 = vrot.slane %v4259_v33, 2  ;;  %v2655_v3 = vunpack.i.h.bf16 %v4364_v12 }
 0x130   : > { %v4382_v38 = vpop.permute.xlu2 %2707  ;;  %2419 = vmatpush.msrb.mxu3 %v4131_v41  ;;  %v1240_v15 = vsel %vm1237_vm5, %v1207_v0, %v2559_v7  ;;  %v2664_v12 = vunpack.i.l.bf16 %v4257_v36  ;;  %v4434_v0 = vld [vmem:[#allocation2 + $0x120] sm:$0xff] }
 0x131   : > { %1518 = vmatmul.f32.gmra.mxu0 %v1272_v55  ;;  %1631 = vmatmul.f32.gmra.mxu1 %v1368_v40  ;;  %v2658_v18 = vpop.permute.xlu1 %2657  ;;  %v4394_v10 = vpop.f32.mrf.mxu2  ;;  %v4396_v55 = vld [vmem:[#allocation2 + $0x108] sm:$0xff]  ;;  %v5279_v40 = vld [vmem:[#allocation8_spill] sm:$0xff] }
 0x132   : > { %v2659_v21 = vunpack.i.l.bf16 %v2658_v18  ;;  %v2660_v57 = vunpack.i.h.bf16 %v2658_v18  ;;  %v2881_v56 = vpack.i.bf16 %v4396_v55, %v4339_v14  ;;  %v1305_v54 = vsel %vm196_vm0, %v5279_v40, %v2654_v31  ;;  %v5280_v18 = vld [vmem:[#allocation31_spill] sm:$0xff]  ;;  %2420 = vmatpush.msrb.mxu3 %v4149_v59  ;;  %v5281_v14 = vld [vmem:[#allocation61_spill] sm:$0xff] }
 0x133   : > { %2877 = vrot.lane.b32.xlu0 %v2876_v53, %s3034_s27  ;;  %v2645_v53 = vunpack.i.h.bf16 %v2643_v50  ;;  %v2891_v19 = vpack.i.bf16 %v1103_v47, %v5280_v18  ;;  %v2534_v31 = vunpack.i.l.bf16 %v5281_v14  ;;  %v5282_v59 = vrot.slane %v3907_v34, 2  ;;  %v4426_v47 = vld [vmem:[#allocation2 + $0x110] sm:$0xff] }
 0x134   : > { %v1273_v41 = vsel %vm1270_vm6, %v1240_v15, %v2659_v21  ;;  %v5284_v21 = vld [vmem:[#allocation50_spill] sm:$0xff]  ;;  %2421 = vmatpush.msrb.mxu3 %v4166_v37 }
 0x135   : > { %v2668_v2 = vpop.permute.xlu0 %2667  ;;  %v1337_v50 = vsel %vm1237_vm5, %v1305_v54, %v2645_v53  ;;  %v4422_v7 = vsel %vm586_vm4, %v5282_v59, %v902_v39  ;;  %v1229_v39 = vsel %vm196_vm0, %v4434_v0, %v2534_v31  ;;  %v2535_v31 = vunpack.i.h.bf16 %v5281_v14  ;;  %v5290_v14 = vld [vmem:[#allocation47_spill] sm:$0xff] }
 0x136   : > { %2887 = vrot.lane.b32.xlu2 %v2886_v11, %s3036_s22  ;;  %v2614_v11 = vunpack.i.l.bf16 %v4275_v22  ;;  %v1369_v33 = vsel %vm1270_vm6, %v1337_v50, %v2660_v57  ;;  %5283 = vst [vmem:[#allocation34_spill] sm:$0xff] %v4422_v7  ;;  %v5285_v57 = vld [vmem:[#allocation9_spill] sm:$0xff]  ;;  %v2669_v34 = vunpack.i.l.bf16 %v2668_v2 }
 0x137   : > { %2882 = vrot.lane.b32.xlu1 %v2881_v56, %s3035_s7  ;;  %2370 = vmatmul.msk.f32.gmra.mxu2 %vm196_vm0, %v5284_v21  ;;  %v2901_v56 = vpack.i.bf16 %v4426_v47, %v4341_v26  ;;  %v1306_v53 = vsel %vm196_vm0, %v5285_v57, %v2655_v3  ;;  %v5287_v21 = vld [vmem:[#allocation58_spill] sm:$0xff] }
 0x138   : > { %v4417_v9 = vpop.permute.xlu2 %2722  ;;  %v1262_v26 = vsel %vm1237_vm5, %v1229_v39, %v2614_v11  ;;  %v1338_v37 = vsel %vm1237_vm5, %v1306_v53, %v2664_v12  ;;  %v2615_v11 = vunpack.i.h.bf16 %v4275_v22  ;;  %v5289_v53 = vld [vmem:[#allocation33_spill] sm:$0xff]  ;;  %v2665_v22 = vunpack.i.h.bf16 %v4257_v36 }
 0x139   : > { %1521 = vmatmul.f32.gmra.mxu0 %v1273_v41  ;;  %1634 = vmatmul.f32.gmra.mxu1 %v1369_v33  ;;  %v2673_v54 = vpop.permute.xlu1 %2672  ;;  %v4438_v15 = vpop.f32.mrf.mxu2  ;;  %v2670_v41 = vunpack.i.h.bf16 %v2668_v2  ;;  %v5286_v33 = vld [vmem:[#allocation32_spill] sm:$0xff]  ;;  %v1274_v2 = vsel %vm1270_vm6, %v5287_v21, %v2669_v34  ;;  %v2960_v36 = vld [vmem:[%s5051_s1 + $0x108] sm:$0xff]  ;;  %v2680_v21 = vunpack.i.h.bf16 %v4296_v6 }
 0x13a   : > { %v2674_v51 = vunpack.i.l.bf16 %v2673_v54  ;;  %v2906_v59 = vpack.i.bf16 %v5286_v33, %v4366_v16 }
 0x13b   : > { %2892 = vrot.lane.b32.xlu0 %v2891_v19, %s3036_s22  ;;  %v2896_v19 = vpack.i.bf16 %v5271_v30, %v4422_v7  ;;  %v2679_v30 = vunpack.i.l.bf16 %v4296_v6  ;;  %v1370_v12 = vsel %vm1270_vm6, %v1338_v37, %v2670_v41  ;;  %v5291_v37 = vld [vmem:[#allocation14_spill] sm:$0xff]  ;;  %v5296_v6 = vld [vmem:[#allocation51_spill] sm:$0xff] }
 0x13c   : > { %v1295_v3 = vsel %vm1270_vm6, %v1262_v26, %v2674_v51  ;;  %v4465_v51 = vld [vmem:[#allocation2 + $0x128] sm:$0xff] }
 0x13d   : > { %v2683_v50 = vpop.permute.xlu0 %2682  ;;  %1587 = vmatmul.f32.vlgmr.msra.gmra.mxu3 %v1295_v3  ;;  %v1230_v39 = vsel %vm196_vm0, %v4465_v51, %v2535_v31  ;;  %v5292_v31 = vld [vmem:[#allocation36_spill] sm:$0xff] }
 0x13e   : > { %2902 = vrot.lane.b32.xlu2 %v2901_v56, %s3035_s7  ;;  %2422 = vmatpush.msra.mxu3 %v5288_v8  ;;  %v2685_v56 = vunpack.i.h.bf16 %v2683_v50  ;;  %v2675_v8 = vunpack.i.h.bf16 %v2673_v54  ;;  %v2684_v26 = vunpack.i.l.bf16 %v2683_v50  ;;  %v1263_v3 = vsel %vm1237_vm5, %v1230_v39, %v2615_v11  ;;  %v5295_v39 = vld [vmem:[#allocation16_spill] sm:$0xff] }
 0x13f   : > { %2897 = vrot.lane.b32.xlu1 %v2896_v19, %s3034_s27  ;;  %2371 = vmatmul.msk.f32.gmra.mxu2 %vm196_vm0, %v5289_v53  ;;  %v2921_v50 = vpack.i.bf16 %v5292_v31, %v4396_v55  ;;  %v5294_v53 = vld [vmem:[#allocation68_spill] sm:$0xff] }
 0x140   : > { %2423 = vmatpush.msra.mxu3 %v5290_v14  ;;  %v4463_v34 = vpop.permute.xlu2 %2737  ;;  %v1296_v54 = vsel %vm1270_vm6, %v1263_v3, %v2685_v56  ;;  %v1275_v11 = vsel %vm1270_vm6, %v5294_v53, %v2675_v8  ;;  %v2961_v14 = vld [vmem:[%s5051_s1 + $0x100] sm:$0xff]  ;;  %v2619_v56 = vunpack.i.l.bf16 %v5295_v39  ;;  %v5297_v8 = vld [vmem:[#allocation54_spill] sm:$0xff] }
 0x141   : > { %1524 = vmatmul.f32.gmra.mxu0 %v1274_v2  ;;  %1637 = vmatmul.f32.gmra.mxu1 %v1370_v12  ;;  %v4458_v16 = vpop.permute.xlu1 %2687  ;;  %v4469_v41 = vpop.f32.mrf.mxu2  ;;  %v5293_v2 = vld [vmem:[#allocation63_spill] sm:$0xff] }
 0x142   : > { %2424 = vmatpush.msra.mxu3 %v2960_v36  ;;  %v2539_v12 = vunpack.i.l.bf16 %v5293_v2  ;;  %v2689_v3 = vunpack.i.l.bf16 %v4458_v16 }
 0x143   : > { %2907 = vrot.lane.b32.xlu0 %v2906_v59, %s3036_s22  ;;  %v1307_v59 = vsel %vm196_vm0, %v5291_v37, %v2679_v30  ;;  %v2620_v37 = vunpack.i.h.bf16 %v5295_v39 }
 0x144   : > { %v1339_v30 = vsel %vm1237_vm5, %v1307_v59, %v2665_v22  ;;  %2425 = vmatpush.msra.mxu3 %v2961_v14  ;;  %v2916_v22 = vpack.i.bf16 %v4465_v51, %v4434_v0 }
 0x145   : > { %v4471_v19 = vpop.permute.xlu0 %2697  ;;  %1590 = vmatmul.f32.gmra.mxu3 %v1296_v54  ;;  %v1371_v55 = vsel %vm1270_vm6, %v1339_v30, %v2684_v26  ;;  %v5298_v54 = vld [vmem:[#allocation15_spill] sm:$0xff] }
 0x146   : > { %v2699_v36 = vunpack.i.l.bf16 %v4471_v19  ;;  %v1308_v53 = vsel %vm196_vm0, %v5298_v54, %v2680_v21  ;;  %v2962_v26 = vld [vmem:[#allocation2 + $0x138] sm:$0xff]  ;;  %2917 = vrot.lane.b32.xlu2 %v2916_v22, %s3035_s7  ;;  %v2540_v22 = vunpack.i.h.bf16 %v5293_v2  ;;  %v5303_v2 = vld [vmem:[#allocation6_spill] sm:$0xff]  ;;  %v2700_v39 = vunpack.i.h.bf16 %v4471_v19 }
 0x147   : > { %2912 = vrot.lane.b32.xlu1 %v5296_v6, %s3034_s27  ;;  %2372 = vmatmul.msk.f32.gmra.mxu2 %vm196_vm0, %v5297_v8  ;;  %v1231_v30 = vsel %vm196_vm0, %v2962_v26, %v2539_v12  ;;  %v2695_v6 = vunpack.i.h.bf16 %v4335_v32  ;;  %v1340_v54 = vsel %vm1237_vm5, %v1308_v53, %v2689_v3  ;;  %v5305_v19 = vld [vmem:[#allocation55_spill] sm:$0xff] }
 0x148   : > { %v1264_v8 = vsel %vm1237_vm5, %v1231_v30, %v2619_v56  ;;  %v4514_v7 = vpop.permute.xlu2 %2752  ;;  %v2710_v56 = vunpack.i.h.bf16 %v4382_v38 }
 0x149   : > { %1527 = vmatmul.f32.gmra.mxu0 %v1275_v11  ;;  %1640 = vmatmul.f32.gmra.mxu1 %v1371_v55  ;;  %v2703_v59 = vpop.permute.xlu1 %2702  ;;  %v2694_v11 = vunpack.i.l.bf16 %v4335_v32  ;;  %v4506_v14 = vpop.f32.mrf.mxu2  ;;  %v1297_v21 = vsel %vm1270_vm6, %v1264_v8, %v2699_v36  ;;  %v5302_v36 = vld [vmem:[#allocation52_spill] sm:$0xff] }
 0x14a   : > { %5299 = vst [vmem:[#allocation44_spill] sm:$0xff] %v4506_v14  ;;  %v2704_v12 = vunpack.i.l.bf16 %v2703_v59  ;;  %v5301_v14 = vld [vmem:[#allocation69_spill] sm:$0xff] }
 0x14b   : > { %2922 = vrot.lane.b32.xlu0 %v2921_v50, %s3036_s22  ;;  %v5300_v50 = vld [vmem:[#allocation37_spill] sm:$0xff]  ;;  %v1276_v32 = vsel %vm1270_vm6, %v5301_v14, %v2694_v11  ;;  %v2690_v11 = vunpack.i.h.bf16 %v4458_v16  ;;  %v2709_v14 = vunpack.i.l.bf16 %v4382_v38  ;;  %v2544_v38 = vunpack.i.l.bf16 %v3839_v42 }
 0x14c   : > { %v2926_v31 = vpack.i.bf16 %v5300_v50, %v4426_v47  ;;  %v1372_v47 = vsel %vm1270_vm6, %v1340_v54, %v2695_v6  ;;  %v1309_v53 = vsel %vm196_vm0, %v5303_v2, %v2704_v12 }
 0x14d   : > { %v4509_v55 = vpop.permute.xlu0 %2712  ;;  %1593 = vmatmul.f32.gmra.mxu3 %v1297_v21  ;;  %v1341_v16 = vsel %vm1237_vm5, %v1309_v53, %v2690_v11  ;;  %v5308_v11 = vld [vmem:[#allocation7_spill] sm:$0xff] }
 0x14e   : > { %2932 = vrot.lane.b32.xlu2 %v5305_v19, %s3034_s27  ;;  %v2714_v53 = vunpack.i.l.bf16 %v4509_v55  ;;  %s2989_s27 = scalar_lea.hbm %s5054_s4, 128 }
 0x14f   : > { %2927 = vrot.lane.b32.xlu1 %v2926_v31, %s3036_s22  ;;  %2373 = vmatmul.msk.f32.gmra.mxu2 %vm196_vm0, %v5302_v36  ;;  %v2963_v31 = vld [vmem:[#allocation2 + $0x140] sm:$0xff]  ;;  %p2991_p1 = scmp.lt.s32.totalorder %s2989_s27, %s2985_s11 }
 0x150   : > { %v1232_v30 = vsel %vm196_vm0, %v2963_v31, %v2540_v22  ;;  %v5306_v22 = vld [vmem:[#allocation41_spill] sm:$0xff]  ;;  %v4548_v36 = vpop.permute.xlu2 %2767 }
 0x151   : > { %1530 = vmatmul.f32.gmra.mxu0 %v1276_v32  ;;  %1643 = vmatmul.f32.gmra.mxu1 %v1372_v47  ;;  %v2718_v3 = vpop.permute.xlu1 %2717  ;;  %v4533_v54 = vpop.f32.mrf.mxu2  ;;  %v1265_v8 = vsel %vm1237_vm5, %v1232_v30, %v2620_v37  ;;  %v2705_v32 = vunpack.i.h.bf16 %v2703_v59  ;;  %v2941_v47 = vpack.i.bf16 %v5306_v22, %v4465_v51  ;;  %v1277_v37 = vsel %vm1270_vm6, %v4157_v49, %v2700_v39  ;;  %v5307_v51 = vld [vmem:[#allocation53_spill] sm:$0xff]  ;;  %v2964_v39 = vld [vmem:[#allocation2 + $0x150] sm:$0xff]  ;;  %p2992_p2 = por %p2991_p1, %p2990_p0 }
 0x152   : > { %v1298_v12 = vsel %vm1270_vm6, %v1265_v8, %v2710_v56  ;;  %v1373_v56 = vsel %vm1270_vm6, %v1341_v16, %v2709_v14  ;;  %v2724_v59 = vunpack.i.l.bf16 %v4417_v9  ;;  %v1233_v30 = vsel %vm196_vm0, %v2964_v39, %v2544_v38 }
 0x153   : > { %1046 = vrot.lane.b32.xlu0 %v2962_v26, %s3035_s7  ;;  %v5304_v26 = vld [vmem:[#allocation40_spill] sm:$0xff]  ;;  %v1310_v49 = vsel %vm196_vm0, %v5308_v11, %v2705_v32  ;;  %v2720_v14 = vunpack.i.h.bf16 %v2718_v3  ;;  %p2993_p3 = pnand %p2992_p2, %p2988_p13 }
 0x154   : > { %v2936_v21 = vpack.i.bf16 %v5304_v26, %v4434_v0  ;;  %v2624_v0 = vunpack.i.l.bf16 %v4281_v43  ;;  %v2719_v43 = vunpack.i.l.bf16 %v2718_v3  ;;  %v1342_v19 = vsel %vm1237_vm5, %v1310_v49, %v2714_v53 }
 0x155   : > { %v4536_v6 = vpop.permute.xlu0 %2727  ;;  %1596 = vmatmul.f32.gmra.mxu3 %v1298_v12  ;;  %v1374_v38 = vsel %vm1270_vm6, %v1342_v19, %v2720_v14 }
 0x156   : > { %v1266_v12 = vsel %vm1237_vm5, %v1233_v30, %v2624_v0  ;;  %1048 = vrot.lane.b32.xlu2 %v2963_v31, %s3035_s7  ;;  %v1278_v32 = vsel %vm1270_vm6, %v4170_v45, %v2719_v43  ;;  %v2715_v31 = vunpack.i.h.bf16 %v4509_v55  ;;  %v2730_v39 = vunpack.i.h.bf16 %v4536_v6  ;;  %v5310_v30 = vld [vmem:[#allocation59_spill] sm:$0xff] }
 0x157   : > { %2937 = vrot.lane.b32.xlu1 %v2936_v21, %s3036_s22  ;;  %2374 = vmatmul.msk.f32.gmra.mxu2 %vm196_vm0, %v5307_v51  ;;  %v1299_v16 = vsel %vm1270_vm6, %v1266_v12, %v2724_v59  ;;  %v5309_v51 = vld [vmem:[#allocation12_spill] sm:$0xff] }
 0x158   : > { %v4573_v3 = vpop.permute.xlu2 %2782 }
 0x159   : > { %1533 = vmatmul.f32.gmra.mxu0 %v1277_v37  ;;  %1646 = vmatmul.f32.gmra.mxu1 %v1373_v56  ;;  %v2733_v42 = vpop.permute.xlu1 %2732  ;;  %v4563_v8 = vpop.f32.mrf.mxu2  ;;  %v2725_v56 = vunpack.i.h.bf16 %v4417_v9 }
 0x15a   : > { %v2735_v37 = vunpack.i.h.bf16 %v2733_v42  ;;  %v2734_v45 = vunpack.i.l.bf16 %v2733_v42  ;;  %v2739_v42 = vunpack.i.l.bf16 %v4463_v34 }
 0x15b   : > { %2942 = vrot.lane.b32.xlu0 %v2941_v47, %s3036_s22  ;;  %v2729_v47 = vunpack.i.l.bf16 %v4536_v6 }
 0x15c   : > { %v1300_v43 = vsel %vm1270_vm6, %v4300_v24, %v2735_v37  ;;  %v5311_v24 = vld [vmem:[#allocation13_spill] sm:$0xff]  ;;  %v2550_v37 = vunpack.i.h.bf16 %v3985_v44 }
 0x15d   : > { %v2743_v21 = vpop.permute.xlu0 %2742  ;;  %1599 = vmatmul.f32.gmra.mxu3 %v1299_v16  ;;  %v1311_v49 = vsel %vm196_vm0, %v5309_v51, %v2729_v47  ;;  %v1312_v6 = vsel %vm196_vm0, %v5311_v24, %v2730_v39 }
 0x15e   : > { %v1343_v9 = vsel %vm1237_vm5, %v1311_v49, %v2715_v31  ;;  %v2744_v16 = vunpack.i.l.bf16 %v2743_v21  ;;  %v2745_v47 = vunpack.i.h.bf16 %v2743_v21  ;;  %v1344_v31 = vsel %vm1237_vm5, %v1312_v6, %v2739_v42  ;;  %v2965_v21 = vld [vmem:[#allocation2 + $0x170] sm:$0xff] }
 0x15f   : > { %2375 = vmatmul.msk.f32.gmra.mxu2 %vm196_vm0, %v3740_v25  ;;  %v1279_v25 = vsel %vm1270_vm6, %v5310_v30, %v2725_v56  ;;  %v1375_v55 = vsel %vm1270_vm6, %v1343_v9, %v2734_v45  ;;  %v1236_v44 = vsel %vm196_vm0, %v2965_v21, %v2550_v37  ;;  %v2740_v9 = vunpack.i.h.bf16 %v4463_v34 }
 0x160   : > { %v4595_v19 = vpop.permute.xlu2 %2797  ;;  %v1376_v39 = vsel %vm1270_vm6, %v1344_v31, %v2745_v47 }
 0x161   : > { %1536 = vmatmul.f32.gmra.mxu0 %v1278_v32  ;;  %1649 = vmatmul.f32.gmra.mxu1 %v1374_v38  ;;  %v2748_v0 = vpop.permute.xlu1 %2747  ;;  %v4579_v59 = vpop.f32.mrf.mxu2 }
 0x162   : > { %v2749_v14 = vunpack.i.l.bf16 %v2748_v0 }
 0x164   : > { %v1301_v56 = vsel %vm1270_vm6, %v4328_v58, %v2749_v14 }
 0x165   : > { %v2758_v53 = vpop.permute.xlu0 %2757  ;;  %1602 = vmatmul.f32.gmra.mxu3 %v1300_v43  ;;  %v2754_v43 = vunpack.i.l.bf16 %v4514_v7 }
 0x166   : > { %v2760_v30 = vunpack.i.h.bf16 %v2758_v53  ;;  %v2759_v14 = vunpack.i.l.bf16 %v2758_v53 }
 0x167   : > { %2376 = vmatmul.msk.f32.gmra.mxu2 %vm196_vm0, %v3743_v5  ;;  %v5312_v5 = vld [vmem:[#allocation60_spill] sm:$0xff] }
 0x168   : > { %v1280_v49 = vsel %vm1270_vm6, %v5312_v5, %v2744_v16  ;;  %v5313_v16 = vld [vmem:[#allocation18_spill] sm:$0xff]  ;;  %v4616_v31 = vpop.permute.xlu2 %2812 }
 0x169   : > { %1539 = vmatmul.f32.gmra.mxu0 %v1279_v25  ;;  %1652 = vmatmul.f32.gmra.mxu1 %v1375_v55  ;;  %v2763_v12 = vpop.permute.xlu1 %2762  ;;  %v4597_v32 = vpop.f32.mrf.mxu2  ;;  %v2750_v55 = vunpack.i.h.bf16 %v2748_v0  ;;  %v1313_v47 = vsel %vm196_vm0, %v5313_v16, %v2754_v43 }
 0x16a   : > { %v2764_v45 = vunpack.i.l.bf16 %v2763_v12  ;;  %v1345_v0 = vsel %vm1237_vm5, %v1313_v47, %v2740_v9  ;;  %v2765_v43 = vunpack.i.h.bf16 %v2763_v12  ;;  %v2799_v12 = vunpack.i.l.bf16 %v4595_v19 }
 0x16b   : > { %v1281_v34 = vsel %vm1270_vm6, %v4178_v63, %v2750_v55  ;;  %v2769_v63 = vunpack.i.l.bf16 %v4548_v36 }
 0x16c   : > { %v1269_v25 = vsel %vm1237_vm5, %v1236_v44, %v2764_v45  ;;  %v1377_v45 = vsel %vm1270_vm6, %v1345_v0, %v2759_v14 }
 0x16d   : > { %v2773_v38 = vpop.permute.xlu0 %2772  ;;  %1605 = vmatmul.f32.gmra.mxu3 %v1301_v56  ;;  %v1302_v37 = vsel %vm1270_vm6, %v1269_v25, %v2760_v30  ;;  %v5314_v30 = vld [vmem:[#allocation19_spill] sm:$0xff]  ;;  %v2770_v25 = vunpack.i.h.bf16 %v4548_v36 }
 0x16e   : > { %v2774_v42 = vunpack.i.l.bf16 %v2773_v38  ;;  %v2775_v47 = vunpack.i.h.bf16 %v2773_v38 }
 0x16f   : > { %2377 = vmatmul.msk.f32.gmra.mxu2 %vm196_vm0, %v3761_v46  ;;  %v2755_v46 = vunpack.i.h.bf16 %v4514_v7 }
 0x170   : > { %v1327_v53 = vsel %vm196_vm0, %v5304_v26, %v2774_v42 }
 0x171   : > { %1542 = vmatmul.f32.gmra.mxu0 %v1280_v49  ;;  %1655 = vmatmul.f32.gmra.mxu1 %v1376_v39  ;;  %v2778_v58 = vpop.permute.xlu1 %2777  ;;  %v4614_v56 = vpop.f32.mrf.mxu2  ;;  %v2784_v49 = vunpack.i.l.bf16 %v4573_v3  ;;  %v1314_v21 = vsel %vm196_vm0, %v5314_v30, %v2755_v46  ;;  %v1282_v46 = vsel %vm1270_vm6, %v4181_v48, %v2769_v63  ;;  %v2814_v48 = vunpack.i.l.bf16 %v4616_v31 }
 0x172   : > { %v2779_v5 = vunpack.i.l.bf16 %v2778_v58  ;;  %v1346_v14 = vsel %vm1237_vm5, %v1314_v21, %v2765_v43  ;;  %v2785_v43 = vunpack.i.h.bf16 %v4573_v3 }
 0x173   : > { %v1378_v36 = vsel %vm1270_vm6, %v1346_v14, %v2770_v25 }
 0x174   : > { %v1359_v7 = vsel %vm1237_vm5, %v1327_v53, %v2779_v5  ;;  %v1283_v3 = vsel %vm1270_vm6, %v4203_v23, %v2785_v43 }
 0x175   : > { %v2788_v6 = vpop.permute.xlu0 %2787  ;;  %1608 = vmatmul.f32.gmra.mxu3 %v1302_v37  ;;  %v1391_v42 = vsel %vm1270_vm6, %v1359_v7, %v2784_v49  ;;  %v4637_v37 = vpop.permute.xlu2 %2827  ;;  %v5315_v49 = vld [vmem:[#allocation23_spill] sm:$0xff] }
 0x176   : > { %v2790_v0 = vunpack.i.h.bf16 %v2788_v6  ;;  %v1315_v38 = vsel %vm196_vm0, %v5315_v49, %v2775_v47  ;;  %v2789_v21 = vunpack.i.l.bf16 %v2788_v6 }
 0x179   : > { %1545 = vmatmul.f32.gmra.mxu0 %v1281_v34  ;;  %1658 = vmatmul.f32.gmra.mxu1 %v1377_v45  ;;  %v2793_v39 = vpop.permute.xlu1 %2792  ;;  %v4632_v55 = vpop.f32.mrf.mxu2  ;;  %v2780_v34 = vunpack.i.h.bf16 %v2778_v58  ;;  %v5316_v58 = vld [vmem:[#allocation38_spill] sm:$0xff] }
 0x17a   : > { %v2794_v44 = vunpack.i.l.bf16 %v2793_v39 }
 0x17b   : > { %v1347_v25 = vsel %vm1237_vm5, %v1315_v38, %v2780_v34 }
 0x17c   : > { %v1328_v5 = vsel %vm196_vm0, %v5306_v22, %v2794_v44  ;;  %v1379_v47 = vsel %vm1270_vm6, %v1347_v25, %v2789_v21 }
 0x17d   : > { %v2803_v9 = vpop.permute.xlu0 %2802  ;;  %1700 = vmatmul.f32.vlgmr.msrb.gmra.mxu3 %v1391_v42  ;;  %v1360_v45 = vsel %vm1237_vm5, %v1328_v5, %v2799_v12  ;;  %v2795_v12 = vunpack.i.h.bf16 %v2793_v39  ;;  %v2800_v5 = vunpack.i.h.bf16 %v4595_v19  ;;  %v4661_v34 = vpop.permute.xlu2 %2842 }
 0x17e   : > { %v1392_v44 = vsel %vm1270_vm6, %v1360_v45, %v2790_v0  ;;  %v5317_v45 = vld [vmem:[#allocation24_spill] sm:$0xff]  ;;  %v2804_v38 = vunpack.i.l.bf16 %v2803_v9  ;;  %v2805_v23 = vunpack.i.h.bf16 %v2803_v9 }
 0x17f   : > { %v1316_v39 = vsel %vm196_vm0, %v5317_v45, %v2795_v12 }
 0x180   : > { %v1348_v21 = vsel %vm1237_vm5, %v1316_v39, %v2800_v5  ;;  %v5319_v5 = vld [vmem:[#allocation20_spill] sm:$0xff] }
 0x181   : > { %1548 = vmatmul.f32.gmra.mxu0 %v1282_v46  ;;  %1661 = vmatmul.f32.gmra.mxu1 %v1378_v36  ;;  %v2808_v53 = vpop.permute.xlu1 %2807  ;;  %v4653_v14 = vpop.f32.mrf.mxu2  ;;  %v2829_v36 = vunpack.i.l.bf16 %v4637_v37  ;;  %v1380_v12 = vsel %vm1270_vm6, %v1348_v21, %v2805_v23  ;;  %v2830_v23 = vunpack.i.h.bf16 %v4637_v37 }
 0x182   : > { %v2809_v7 = vunpack.i.l.bf16 %v2808_v53  ;;  %v2810_v25 = vunpack.i.h.bf16 %v2808_v53  ;;  %v2844_v53 = vunpack.i.l.bf16 %v4661_v34 }
 0x184   : > { %v1329_v42 = vsel %vm196_vm0, %v5316_v58, %v2809_v7 }
 0x185   : > { %v2818_v63 = vpop.permute.xlu0 %2817  ;;  %1703 = vmatmul.f32.gmra.mxu3 %v1392_v44  ;;  %v1361_v6 = vsel %vm1237_vm5, %v1329_v42, %v2814_v48  ;;  %v5318_v48 = vld [vmem:[#allocation39_spill] sm:$0xff]  ;;  %v2858_v39 = vpop.permute.xlu2 %2857 }
 0x186   : > { %v2819_v46 = vunpack.i.l.bf16 %v2818_v63  ;;  %v1330_v19 = vsel %vm196_vm0, %v5318_v48, %v2829_v36  ;;  %v1317_v36 = vsel %vm196_vm0, %v5319_v5, %v2810_v25 }
 0x188   : > { %v1393_v7 = vsel %vm1270_vm6, %v1361_v6, %v2819_v46  ;;  %v2815_v46 = vunpack.i.h.bf16 %v4616_v31  ;;  %v5320_v31 = vld [vmem:[#allocation64_spill] sm:$0xff] }
 0x189   : > { %1551 = vmatmul.f32.gmra.mxu0 %v1283_v3  ;;  %1664 = vmatmul.f32.gmra.mxu1 %v1379_v47  ;;  %v2823_v0 = vpop.permute.xlu1 %2822  ;;  %v1284_v3 = vsel %vm1270_vm6, %v4211_v27, %v2804_v38  ;;  %v4671_v47 = vpop.f32.mrf.mxu2 }
 0x18a   : > { %v2825_v42 = vunpack.i.h.bf16 %v2823_v0  ;;  %v2824_v38 = vunpack.i.l.bf16 %v2823_v0 }
 0x18d   : > { %v2833_v43 = vpop.permute.xlu0 %2832  ;;  %1706 = vmatmul.f32.gmra.mxu3 %v1393_v7  ;;  %v2820_v7 = vunpack.i.h.bf16 %v2818_v63 }
 0x18e   : > { %v2834_v44 = vunpack.i.l.bf16 %v2833_v43  ;;  %v2835_v63 = vunpack.i.h.bf16 %v2833_v43  ;;  %v2845_v43 = vunpack.i.h.bf16 %v4661_v34 }
 0x18f   : > { %v1285_v21 = vsel %vm1270_vm6, %v5320_v31, %v2820_v7  ;;  %v4692_v31 = vpop.permute.xlu2 %2872 }
 0x190   : > { %v1362_v9 = vsel %vm1237_vm5, %v1330_v19, %v2834_v44  ;;  %v1331_v19 = vsel %vm196_vm0, %v5252_v4, %v2844_v53 }
 0x191   : > { %1554 = vmatmul.f32.gmra.mxu0 %v1284_v3  ;;  %1667 = vmatmul.f32.gmra.mxu1 %v1380_v12  ;;  %v2838_v6 = vpop.permute.xlu1 %2837  ;;  %v1394_v27 = vsel %vm1270_vm6, %v1362_v9, %v2825_v42  ;;  %v1349_v3 = vsel %vm1237_vm5, %v1317_v36, %v2815_v46  ;;  %v4687_v42 = vpop.f32.mrf.mxu2  ;;  %v5321_v9 = vld [vmem:[#allocation21_spill] sm:$0xff] }
 0x192   : > { %v1381_v25 = vsel %vm1270_vm6, %v1349_v3, %v2824_v38  ;;  %v1318_v37 = vsel %vm196_vm0, %v5321_v9, %v2830_v23  ;;  %v2839_v46 = vunpack.i.l.bf16 %v2838_v6 }
 0x193   : > { %v1350_v38 = vsel %vm1237_vm5, %v1318_v37, %v2835_v63  ;;  %v1319_v63 = vsel %vm196_vm0, %v5253_v29, %v2845_v43 }
 0x195   : > { %v2848_v48 = vpop.permute.xlu0 %2847  ;;  %1709 = vmatmul.f32.gmra.mxu3 %v1394_v27  ;;  %v2840_v27 = vunpack.i.h.bf16 %v2838_v6  ;;  %v2860_v6 = vunpack.i.h.bf16 %v2858_v39 }
 0x196   : > { %v2849_v44 = vunpack.i.l.bf16 %v2848_v48 }
 0x197   : > { %v1382_v23 = vsel %vm1270_vm6, %v1350_v38, %v2840_v27 }
 0x198   : > { %v1363_v12 = vsel %vm1237_vm5, %v1331_v19, %v2849_v44  ;;  %v2850_v19 = vunpack.i.h.bf16 %v2848_v48 }
 0x199   : > { %1557 = vmatmul.f32.gmra.mxu0 %v1285_v21  ;;  %1670 = vmatmul.f32.gmra.mxu1 %v1381_v25  ;;  %v2853_v0 = vpop.permute.xlu1 %2852  ;;  %v5322_v21 = vld [vmem:[#allocation65_spill] sm:$0xff]  ;;  %v4704_v37 = vpop.f32.mrf.mxu2 }
 0x19a   : > { %v2854_v36 = vunpack.i.l.bf16 %v2853_v0  ;;  %v1286_v44 = vsel %vm1270_vm6, %v5322_v21, %v2839_v46  ;;  %v1351_v48 = vsel %vm1237_vm5, %v1319_v63, %v2850_v19  ;;  %v4721_v19 = vld [vmem:[%s5053_s3] ss:$0 sm:$0xff] }
 0x19c   : > { %v1395_v53 = vsel %vm1270_vm6, %v1363_v12, %v2854_v36  ;;  %v2855_v12 = vunpack.i.h.bf16 %v2853_v0  ;;  %v2859_v36 = vunpack.i.l.bf16 %v2858_v39  ;;  %v4712_v0 = vld [vmem:[%s5052_s2] ss:$0 sm:$0xff] }
 0x19d   : > { %v2863_v7 = vpop.permute.xlu0 %2862  ;;  %1712 = vmatmul.f32.gmra.mxu3 %v1395_v53 }
 0x19e   : > { %v2864_v3 = vunpack.i.l.bf16 %v2863_v7  ;;  %v2865_v27 = vunpack.i.h.bf16 %v2863_v7  ;;  %v1287_v39 = vsel %vm1270_vm6, %v4220_v52, %v2855_v12  ;;  %v2874_v12 = vunpack.i.l.bf16 %v4692_v31 }
 0x1a0   : > { %v1332_v4 = vsel %vm196_vm0, %v5254_v35, %v2864_v3  ;;  %v2888_v3 = vpop.permute.xlu2 %2887  ;;  %v1320_v52 = vsel %vm196_vm0, %v5263_v28, %v2865_v27 }
 0x1a1   : > { %1560 = vmatmul.f32.gmra.mxu0 %v1286_v44  ;;  %1673 = vmatmul.f32.gmra.mxu1 %v1382_v23  ;;  %v2868_v25 = vpop.permute.xlu1 %2867 }
 0x1a2   : > { %v2869_v34 = vunpack.i.l.bf16 %v2868_v25  ;;  %v2870_v43 = vunpack.i.h.bf16 %v2868_v25 }
 0x1a4   : > { %v1364_v21 = vsel %vm1237_vm5, %v1332_v4, %v2869_v34  ;;  %v1383_v4 = vsel %vm1270_vm6, %v1351_v48, %v2859_v36 }
 0x1a5   : > { %v2878_v53 = vpop.permute.xlu0 %2877  ;;  %v1396_v23 = vsel %vm1270_vm6, %v1364_v21, %v2860_v6  ;;  %v2889_v6 = vunpack.i.l.bf16 %v2888_v3 }
 0x1a6   : > { %v1516_v46 = vpop.f32.mrf.mxu0  ;;  %v2879_v38 = vunpack.i.l.bf16 %v2878_v53  ;;  %v1629_v44 = vpop.f32.mrf.mxu1  ;;  %1715 = vmatmul.f32.gmra.mxu3 %v1396_v23 }
 0x1a7   : > { %v1630_v35 = vadd.f32 %v1629_v44, %v1516_v46  ;;  %v1352_v44 = vsel %vm1237_vm5, %v1320_v52, %v2870_v43  ;;  %v4733_v23 = vpop.f32.mrf.mxu2 }
 0x1a8   : > { %v1333_v34 = vsel %vm196_vm0, %v4306_v20, %v2879_v38  ;;  %v2880_v38 = vunpack.i.h.bf16 %v2878_v53  ;;  %v2903_v20 = vpop.permute.xlu2 %2902 }
 0x1a9   : > { %1563 = vmatmul.f32.gmra.mxu0 %v1287_v39  ;;  %v1743_v7 = vadd.f32 %v4317_v1, %v1630_v35  ;;  %1676 = vmatmul.f32.gmra.mxu1 %v1383_v4  ;;  %v2883_v63 = vpop.permute.xlu1 %2882  ;;  %v2875_v35 = vunpack.i.h.bf16 %v4692_v31  ;;  %v1288_v31 = vsel %vm1270_vm6, %v4223_v13, %v2874_v12  ;;  %v2904_v52 = vunpack.i.l.bf16 %v2903_v20 }
 0x1aa   : > { %v2884_v36 = vunpack.i.l.bf16 %v2883_v63 }
 0x1ab   : > { %v1842_v25 = vmul.f32 %v4712_v0, %v1743_v7 }
 0x1ac   : > { %v1365_v48 = vsel %vm1237_vm5, %v1333_v34, %v2884_v36  ;;  %v2885_v36 = vunpack.i.h.bf16 %v2883_v63 }
 0x1ad   : > { %v2893_v1 = vpop.permute.xlu0 %2892  ;;  %v1878_v46 = vadd.f32 %v4721_v19, %v1842_v25  ;;  %v1397_v27 = vsel %vm1270_vm6, %v1365_v48, %v2889_v6  ;;  %v1384_v25 = vsel %vm1270_vm6, %v1352_v44, %v2875_v35  ;;  %v1321_v6 = vsel %vm196_vm0, %v5266_v62, %v2880_v38  ;;  %v5323_v38 = vld [vmem:[#allocation11_spill] sm:$0xff] }
 0x1ae   : > { %v1519_v21 = vpop.f32.mrf.mxu0  ;;  %v1632_v39 = vpop.f32.mrf.mxu1  ;;  %1718 = vmatmul.f32.gmra.mxu3 %v1397_v27  ;;  %v1353_v63 = vsel %vm1237_vm5, %v1321_v6, %v2885_v36 }
 0x1af   : > { %v1910_v4 = vadd.f32 %v1878_v46, %v5268_v60  ;;  %v1633_v7 = vadd.f32 %v1632_v39, %v1519_v21  ;;  %v2890_v60 = vunpack.i.h.bf16 %v2888_v3  ;;  %v2895_v46 = vunpack.i.h.bf16 %v2893_v1 }
 0x1b0   : > { %v2894_v21 = vunpack.i.l.bf16 %v2893_v1 }
 0x1b1   : > { %1566 = vmatmul.f32.gmra.mxu0 %v1288_v31  ;;  %v1942_v34 = vmax.f32 %v1910_v4, 0.0  ;;  %v1746_v43 = vadd.f32 %v4361_v17, %v1633_v7  ;;  %1679 = vmatmul.f32.gmra.mxu1 %v1384_v25  ;;  %v2898_v53 = vpop.permute.xlu1 %2897  ;;  %v5324_v25 = vld [vmem:[#allocation17_spill] sm:$0xff] }
 0x1b2   : > { %v2899_v12 = vunpack.i.l.bf16 %v2898_v53  ;;  %v2900_v44 = vunpack.i.h.bf16 %v2898_v53  ;;  %v1289_v1 = vsel %vm1270_vm6, %v5324_v25, %v2890_v60  ;;  %v2905_v53 = vunpack.i.h.bf16 %v2903_v20 }
 0x1b3   : > { %1974 = vst.msk [vmem:[#allocation2 + $0x19] sm:$0xff] %vm196_vm0, %v1942_v34  ;;  %v1843_v13 = vmul.f32 %v4712_v0, %v1746_v43  ;;  %v4754_v34 = vpop.f32.mrf.mxu2  ;;  %v1385_v43 = vsel %vm1270_vm6, %v1353_v63, %v2894_v21 }
 0x1b4   : > { %v1334_v17 = vsel %vm196_vm0, %v4292_v61, %v2899_v12 }
 0x1b5   : > { %v1879_v35 = vadd.f32 %v4721_v19, %v1843_v13  ;;  %v2908_v39 = vpop.permute.xlu0 %2907  ;;  %v1366_v3 = vsel %vm1237_vm5, %v1334_v17, %v2904_v52  ;;  %v5325_v52 = vld [vmem:[#allocation35_spill] sm:$0xff]  ;;  %v2918_v17 = vpop.permute.xlu2 %2917 }
 0x1b6   : > { %v1522_v48 = vpop.f32.mrf.mxu0  ;;  %v1635_v27 = vpop.f32.mrf.mxu1  ;;  %v1398_v31 = vsel %vm1270_vm6, %v1366_v3, %v2895_v46  ;;  %v1322_v13 = vsel %vm196_vm0, %v5325_v52, %v2900_v44  ;;  %v2909_v46 = vunpack.i.l.bf16 %v2908_v39  ;;  %v2022_v3 = vld [vmem:[#allocation2 + $0x1] ss:$2 sm:$0xff] }
 0x1b7   : > { %v1911_v4 = vadd.f32 %v1879_v35, %v5323_v38  ;;  %v1636_v7 = vadd.f32 %v1635_v27, %v1522_v48  ;;  %1721 = vmatmul.f32.gmra.mxu3 %v1398_v31  ;;  %v2910_v35 = vunpack.i.h.bf16 %v2908_v39  ;;  %v1354_v20 = vsel %vm1237_vm5, %v1322_v13, %v2905_v53 }
 0x1b8   : > { %v2919_v31 = vunpack.i.l.bf16 %v2918_v17 }
 0x1b9   : > { %1569 = vmatmul.f32.gmra.mxu0 %v1289_v1  ;;  %v1943_v36 = vmax.f32 %v1911_v4, 0.0  ;;  %v1749_v6 = vadd.f32 %v4394_v10, %v1636_v7  ;;  %1682 = vmatmul.f32.gmra.mxu1 %v1385_v43  ;;  %v2913_v60 = vpop.permute.xlu1 %2912  ;;  %v2006_v10 = vld [vmem:[#allocation2] ss:$2 sm:$0xff]  ;;  %v5326_v4 = vld [vmem:[#allocation27_spill] sm:$0xff]  ;;  %v5327_v1 = vld [vmem:[#allocation62_spill] sm:$0xff]  ;;  %v1386_v39 = vsel %vm1270_vm6, %v1354_v20, %v2910_v35 }
 0x1ba   : > { %v2914_v48 = vunpack.i.l.bf16 %v2913_v60  ;;  %v1290_v7 = vsel %vm1270_vm6, %v5326_v4, %v2909_v46  ;;  %v2037_v13 = vmax.f32 %v2006_v10, %v2022_v3 }
 0x1bb   : > { %1975 = vst.msk [vmem:[#allocation2 + $0x21] sm:$0xff] %vm196_vm0, %v1943_v36  ;;  %v1844_v12 = vmul.f32 %v4712_v0, %v1749_v6 }
 0x1bc   : > { %v1323_v43 = vsel %vm196_vm0, %v5280_v18, %v2914_v48 }
 0x1bd   : > { %v1880_v27 = vadd.f32 %v4721_v19, %v1844_v12  ;;  %v2923_v25 = vpop.permute.xlu0 %2922  ;;  %v2046_v12 = vld [vmem:[#allocation2 + $0x2] ss:$2 sm:$0xff]  ;;  %v1355_v35 = vsel %vm1237_vm5, %v1323_v43, %v2919_v31  ;;  %v2920_v43 = vunpack.i.h.bf16 %v2918_v17 }
 0x1be   : > { %v1525_v21 = vpop.f32.mrf.mxu0  ;;  %v1638_v63 = vpop.f32.mrf.mxu1  ;;  %v2925_v46 = vunpack.i.h.bf16 %v2923_v25 }
 0x1bf   : > { %v1912_v38 = vadd.f32 %v1880_v27, %v5279_v40  ;;  %v1639_v44 = vadd.f32 %v1638_v63, %v1525_v21  ;;  %2378 = vmatmul.msk.f32.vlgmr.msra.gmra.mxu3 %vm196_vm0, %v5327_v1  ;;  %v4775_v40 = vpop.f32.mrf.mxu2  ;;  %v2924_v27 = vunpack.i.l.bf16 %v2923_v25  ;;  %v2061_v63 = vmax.f32 %v2037_v13, %v2046_v12  ;;  %v5328_v1 = vld [vmem:[#allocation29_spill] sm:$0xff]  ;;  %v4794_v12 = vpop.permute.xlu2 %2932 }
 0x1c0   : > { %v4773_v6 = vpop.f32.mrf.mxu3  ;;  %v1387_v4 = vsel %vm1270_vm6, %v1355_v35, %v2925_v46  ;;  %v2934_v17 = vunpack.i.l.bf16 %v4794_v12 }
 0x1c1   : > { %1572 = vmatmul.f32.gmra.mxu0 %v1290_v7  ;;  %v1944_v36 = vmax.f32 %v1912_v38, 0.0  ;;  %v1752_v53 = vadd.f32 %v4438_v15, %v1639_v44  ;;  %1685 = vmatmul.f32.gmra.mxu1 %v1386_v39  ;;  %v2915_v15 = vunpack.i.h.bf16 %v2913_v60  ;;  %v2928_v38 = vpop.permute.xlu1 %2927  ;;  %v1291_v25 = vsel %vm1270_vm6, %v5328_v1, %v2924_v27  ;;  %v5329_v39 = vld [vmem:[#allocation28_spill] sm:$0xff] }
 0x1c2   : > { %v2069_v7 = vld [vmem:[#allocation2 + $0x18] ss:$2 sm:$0xff] }
 0x1c3   : > { %1976 = vst.msk [vmem:[#allocation2 + $0x31] sm:$0xff] %vm196_vm0, %v1944_v36  ;;  %v1845_v21 = vmul.f32 %v4712_v0, %v1752_v53  ;;  %v2084_v53 = vmax.f32 %v2061_v63, %v2069_v7  ;;  %v1324_v13 = vsel %vm196_vm0, %v5286_v33, %v2915_v15 }
 0x1c5   : > { %v1881_v48 = vadd.f32 %v4721_v19, %v1845_v21  ;;  %v2930_v21 = vunpack.i.h.bf16 %v2928_v38  ;;  %v1047_v63 = vpop.permute.xlu0 %1046 }
 0x1c6   : > { %v1528_v20 = vpop.f32.mrf.mxu0  ;;  %v1641_v44 = vpop.f32.mrf.mxu1 }
 0x1c7   : > { %v1913_v10 = vadd.f32 %v1881_v48, %v5285_v57  ;;  %v1642_v3 = vadd.f32 %v1641_v44, %v1528_v20  ;;  %2379 = vmatmul.msk.f32.gmra.mxu3 %vm196_vm0, %v5329_v39  ;;  %v2929_v57 = vunpack.i.l.bf16 %v2928_v38  ;;  %v4796_v27 = vpop.f32.mrf.mxu2  ;;  %v1356_v20 = vsel %vm1237_vm5, %v1324_v13, %v2920_v43  ;;  %v5332_v38 = vld [vmem:[#allocation34_spill] sm:$0xff]  ;;  %v5334_v13 = vld [vmem:[#allocation44_spill] sm:$0xff] }
 0x1c8   : > { %v4788_v60 = vpop.f32.mrf.mxu3  ;;  %v1388_v39 = vsel %vm1270_vm6, %v1356_v20, %v2930_v21 }
 0x1c9   : > { %1575 = vmatmul.f32.gmra.mxu0 %v1291_v25  ;;  %v1945_v31 = vmax.f32 %v1913_v10, 0.0  ;;  %v1755_v36 = vadd.f32 %v4469_v41, %v1642_v3  ;;  %1688 = vmatmul.f32.gmra.mxu1 %v1387_v4  ;;  %v2093_v41 = vld [vmem:[#allocation2 + $0x19] ss:$2 sm:$0xff]  ;;  %v5330_v4 = vld [vmem:[#allocation14_spill] sm:$0xff]  ;;  %v2938_v25 = vpop.permute.xlu1 %2937 }
 0x1ca   : > { %v2108_v44 = vmax.f32 %v2084_v53, %v2093_v41  ;;  %v5331_v3 = vld [vmem:[#allocation30_spill] sm:$0xff]  ;;  %v2966_v41 = vld [vmem:[#allocation2 + $0x198] sm:$0xff]  ;;  %v2939_v21 = vunpack.i.l.bf16 %v2938_v25 }
 0x1cb   : > { %1977 = vst.msk [vmem:[#allocation2 + $0x39] sm:$0xff] %vm196_vm0, %v1945_v31  ;;  %v1846_v46 = vmul.f32 %v4712_v0, %v1755_v36  ;;  %v1292_v1 = vsel %vm1270_vm6, %v5331_v3, %v2929_v57  ;;  %v5333_v31 = vld [vmem:[#allocation36_spill] sm:$0xff] }
 0x1cc   : > { %v1325_v43 = vsel %vm196_vm0, %v5333_v31, %v2934_v17  ;;  %v2967_v57 = vld [vmem:[#allocation2 + $0x1a0] sm:$0xff] }
 0x1cd   : > { %v1882_v35 = vadd.f32 %v4721_v19, %v1846_v46  ;;  %v1357_v20 = vsel %vm1237_vm5, %v1325_v43, %v1047_v63 }
 0x1ce   : > { %v1531_v48 = vpop.f32.mrf.mxu0  ;;  %v1644_v15 = vpop.f32.mrf.mxu1 }
 0x1cf   : > { %v1914_v7 = vadd.f32 %v1882_v35, %v5330_v4  ;;  %v1645_v10 = vadd.f32 %v1644_v15, %v1531_v48  ;;  %2380 = vmatmul.msk.f32.gmra.mxu3 %vm196_vm0, %v5332_v38  ;;  %v1200_v35 = vrot.slane %v2966_v41, 2  ;;  %v1201_v48 = vrot.slane %v2967_v57, 2  ;;  %v2117_v15 = vld [vmem:[#allocation2 + $0x1a] ss:$2 sm:$0xff] }
 0x1d0   : > { %v4810_v46 = vpop.f32.mrf.mxu3  ;;  %v2940_v4 = vunpack.i.h.bf16 %v2938_v25  ;;  %v2132_v3 = vmax.f32 %v2108_v44, %v2117_v15  ;;  %v2935_v44 = vunpack.i.h.bf16 %v4794_v12  ;;  %v5335_v57 = vld [vmem:[#allocation15_spill] sm:$0xff]  ;;  %v5336_v15 = vld [vmem:[#allocation22_spill] sm:$0xff] }
 0x1d1   : > { %1578 = vmatmul.f32.gmra.mxu0 %v1292_v1  ;;  %v1946_v36 = vmax.f32 %v1914_v7, 0.0  ;;  %v1758_v53 = vadd.f32 %v5334_v13, %v1645_v10  ;;  %1691 = vmatmul.f32.gmra.mxu1 %v1388_v39  ;;  %v1202_v39 = vsel %vm586_vm4, %v1200_v35, %v1201_v48  ;;  %v4820_v13 = vpop.f32.mrf.mxu2 }
 0x1d2   : > { %v2141_v7 = vld [vmem:[#allocation2 + $0x30] ss:$2 sm:$0xff]  ;;  %v2165_v41 = vld [vmem:[#allocation2 + $0x31] ss:$2 sm:$0xff]  ;;  %v1389_v25 = vsel %vm1270_vm6, %v1357_v20, %v2940_v4  ;;  %v2968_v4 = vld [vmem:[#allocation2 + $0x1a8] sm:$0x3] }
 0x1d3   : > { %1978 = vst.msk [vmem:[#allocation2 + $0x49] sm:$0xff] %vm196_vm0, %v1946_v36  ;;  %v1847_v17 = vmul.f32 %v4712_v0, %v1758_v53  ;;  %v2156_v10 = vmax.f32 %v2132_v3, %v2141_v7  ;;  %v1293_v3 = vsel %vm1270_vm6, %v5336_v15, %v2939_v21  ;;  %v2189_v7 = vld [vmem:[#allocation2 + $0x32] ss:$2 sm:$0xff]  ;;  %v1203_v20 = vrot.slane %v2968_v4, 2 }
 0x1d5   : > { %v1883_v1 = vadd.f32 %v4721_v19, %v1847_v17  ;;  %v2180_v53 = vmax.f32 %v2156_v10, %v2165_v41  ;;  %v2943_v17 = vpop.permute.xlu0 %2942  ;;  %v1049_v10 = vpop.permute.xlu2 %1048 }
 0x1d6   : > { %v1534_v38 = vpop.f32.mrf.mxu0  ;;  %v1647_v36 = vpop.f32.mrf.mxu1  ;;  %v2944_v21 = vunpack.i.l.bf16 %v2943_v17 }
 0x1d7   : > { %v1915_v63 = vadd.f32 %v1883_v1, %v5335_v57  ;;  %v1648_v43 = vadd.f32 %v1647_v36, %v1534_v38  ;;  %2381 = vmatmul.msk.f32.gmra.mxu3 %vm196_vm0, %v1202_v39  ;;  %v2204_v35 = vmax.f32 %v2180_v53, %v2189_v7  ;;  %v1326_v1 = vsel %vm196_vm0, %v5300_v50, %v2935_v44 }
 0x1d8   : > { %v4829_v12 = vpop.f32.mrf.mxu3  ;;  %v1358_v39 = vsel %vm1237_vm5, %v1326_v1, %v1049_v10  ;;  %v2048_v1 = vld [vmem:[#allocation2 + $0x32] ss:$2 sm:$0xff] }
 0x1d9   : > { %1581 = vmatmul.f32.gmra.mxu0 %v1293_v3  ;;  %v1947_v61 = vmax.f32 %v1915_v63, 0.0  ;;  %v1761_v31 = vadd.f32 %v4533_v54, %v1648_v43  ;;  %1694 = vmatmul.f32.gmra.mxu1 %v1389_v25  ;;  %2212 = vst.msk [vmem:[%s4833_s28] sm:$0xff] %vm196_vm0, %v2204_v35  ;;  %v2945_v54 = vunpack.i.h.bf16 %v2943_v17  ;;  %v1204_v25 = vsel %vm586_vm4, %v1201_v48, %v1203_v20  ;;  %v5337_v63 = vld [vmem:[#allocation25_spill] sm:$0xff]  ;;  %v4845_v15 = vpop.f32.mrf.mxu2  ;;  %v2024_v3 = vld [vmem:[#allocation2 + $0x31] ss:$2 sm:$0xff] }
 0x1da   : > { %v1294_v43 = vsel %vm1270_vm6, %v5337_v63, %v2944_v21 }
 0x1db   : > { %1979 = vst.msk [vmem:[#allocation2 + $0x51] sm:$0xff] %vm196_vm0, %v1947_v61  ;;  %v1848_v38 = vmul.f32 %v4712_v0, %v1761_v31  ;;  %v1390_v61 = vsel %vm1270_vm6, %v1358_v39, %v2945_v54  ;;  %v2008_v31 = vld [vmem:[#allocation2 + $0x30] ss:$2 sm:$0xff] }
 0x1dc   : > { %v2038_v35 = vmax.f32 %v2008_v31, %v2024_v3 }
 0x1dd   : > { %v1884_v41 = vadd.f32 %v4721_v19, %v1848_v38 }
 0x1de   : > { %v1537_v36 = vpop.f32.mrf.mxu0  ;;  %v1650_v53 = vpop.f32.mrf.mxu1  ;;  %v2062_v39 = vmax.f32 %v2038_v35, %v2048_v1 }
 0x1df   : > { %v1916_v44 = vadd.f32 %v1884_v41, %v5303_v2  ;;  %v1651_v57 = vadd.f32 %v1650_v53, %v1537_v36  ;;  %2382 = vmatmul.msk.f32.gmra.mxu3 %vm196_vm0, %v1204_v25 }
 0x1e0   : > { %v4850_v48 = vpop.f32.mrf.mxu3 }
 0x1e1   : > { %1584 = vmatmul.f32.gmra.mxu0 %v1294_v43  ;;  %v1948_v7 = vmax.f32 %v1916_v44, 0.0  ;;  %v1764_v17 = vadd.f32 %v4563_v8, %v1651_v57  ;;  %1697 = vmatmul.f32.gmra.mxu1 %v1390_v61  ;;  %v4859_v25 = vpop.f32.mrf.mxu2 }
 0x1e2   : > { %v2071_v21 = vld [vmem:[#allocation2 + $0x48] ss:$2 sm:$0xff]  ;;  %v2095_v57 = vld [vmem:[#allocation2 + $0x49] ss:$2 sm:$0xff] }
 0x1e3   : > { %1980 = vst.msk [vmem:[#allocation2 + $0x61] sm:$0xff] %vm196_vm0, %v1948_v7  ;;  %v1849_v2 = vmul.f32 %v4712_v0, %v1764_v17  ;;  %v2085_v53 = vmax.f32 %v2062_v39, %v2071_v21 }
 0x1e5   : > { %v1885_v4 = vadd.f32 %v4721_v19, %v1849_v2  ;;  %v2119_v2 = vld [vmem:[#allocation2 + $0x4a] ss:$2 sm:$0xff] }
 0x1e6   : > { %v1540_v20 = vpop.f32.mrf.mxu0  ;;  %v1653_v10 = vpop.f32.mrf.mxu1 }
 0x1e7   : > { %v1917_v38 = vadd.f32 %v1885_v4, %v5308_v11  ;;  %v1654_v54 = vadd.f32 %v1653_v10, %v1540_v20  ;;  %v2109_v11 = vmax.f32 %v2085_v53, %v2095_v57 }
 0x1e8   : > { %v4857_v36 = vpop.f32.mrf.mxu3 }
 0x1e9   : > { %v1949_v41 = vmax.f32 %v1917_v38, 0.0  ;;  %v1767_v8 = vadd.f32 %v4579_v59, %v1654_v54  ;;  %v2133_v35 = vmax.f32 %v2109_v11, %v2119_v2  ;;  %v4870_v20 = vpop.f32.mrf.mxu2 }
 0x1eb   : > { %1981 = vst.msk [vmem:[#allocation2 + $0x69] sm:$0xff] %vm196_vm0, %v1949_v41  ;;  %v1850_v44 = vmul.f32 %v4712_v0, %v1767_v8 }
 0x1ed   : > { %v1886_v63 = vadd.f32 %v4721_v19, %v1850_v44 }
 0x1ee   : > { %v1543_v43 = vpop.f32.mrf.mxu0  ;;  %v1656_v61 = vpop.f32.mrf.mxu1 }
 0x1ef   : > { %v1918_v31 = vadd.f32 %v1886_v63, %v5309_v51  ;;  %v1657_v3 = vadd.f32 %v1656_v61, %v1543_v43 }
 0x1f0   : > { %v4866_v17 = vpop.f32.mrf.mxu3 }
 0x1f1   : > { %v1950_v7 = vmax.f32 %v1918_v31, 0.0  ;;  %v1770_v59 = vadd.f32 %v4597_v32, %v1657_v3  ;;  %v1814_v31 = vpop.f32.mrf.mxu2 }
 0x1f2   : > { %v2143_v10 = vld [vmem:[#allocation2 + $0x60] ss:$2 sm:$0xff]  ;;  %v2167_v38 = vld [vmem:[#allocation2 + $0x61] ss:$2 sm:$0xff] }
 0x1f3   : > { %1982 = vst.msk [vmem:[#allocation2 + $0x79] sm:$0xff] %vm196_vm0, %v1950_v7  ;;  %v1851_v4 = vmul.f32 %v4712_v0, %v1770_v59  ;;  %v2157_v1 = vmax.f32 %v2133_v35, %v2143_v10  ;;  %v2191_v8 = vld [vmem:[#allocation2 + $0x62] ss:$2 sm:$0xff]  ;;  %v2026_v2 = vld [vmem:[#allocation2 + $0x61] ss:$2 sm:$0xff] }
 0x1f4   : > { %v2010_v59 = vld [vmem:[#allocation2 + $0x60] ss:$2 sm:$0xff] }
 0x1f5   : > { %v1887_v21 = vadd.f32 %v4721_v19, %v1851_v4  ;;  %v2181_v39 = vmax.f32 %v2157_v1, %v2167_v38 }
 0x1f6   : > { %v1546_v51 = vpop.f32.mrf.mxu0  ;;  %v1659_v54 = vpop.f32.mrf.mxu1 }
 0x1f7   : > { %v1919_v32 = vadd.f32 %v1887_v21, %v5311_v24  ;;  %v1660_v41 = vadd.f32 %v1659_v54, %v1546_v51  ;;  %v2205_v53 = vmax.f32 %v2181_v39, %v2191_v8  ;;  %v2039_v21 = vmax.f32 %v2010_v59, %v2026_v2 }
 0x1f8   : > { %v4875_v63 = vpop.f32.mrf.mxu3 }
 0x1f9   : > { %v1951_v44 = vmax.f32 %v1919_v32, 0.0  ;;  %v1773_v57 = vadd.f32 %v4614_v56, %v1660_v41  ;;  %2213 = vst.msk [vmem:[%s4833_s28 + $0x8] sm:$0xff] %vm196_vm0, %v2205_v53  ;;  %v2050_v32 = vld [vmem:[#allocation2 + $0x62] ss:$2 sm:$0xff]  ;;  %v1817_v53 = vpop.f32.mrf.mxu2 }
 0x1fb   : > { %1983 = vst.msk [vmem:[#allocation2 + $0x81] sm:$0xff] %vm196_vm0, %v1951_v44  ;;  %v1852_v43 = vmul.f32 %v4712_v0, %v1773_v57  ;;  %v2063_v44 = vmax.f32 %v2039_v21, %v2050_v32 }
 0x1fd   : > { %v1888_v61 = vadd.f32 %v4721_v19, %v1852_v43 }
 0x1fe   : > { %v1549_v11 = vpop.f32.mrf.mxu0  ;;  %v1662_v3 = vpop.f32.mrf.mxu1 }
 0x1ff   : > { %v1920_v24 = vadd.f32 %v1888_v61, %v5313_v16  ;;  %v1663_v7 = vadd.f32 %v1662_v3, %v1549_v11 }
 0x200   : > { %v1701_v4 = vpop.f32.mrf.mxu3 }
 0x201   : > { %v1952_v35 = vmax.f32 %v1920_v24, 0.0  ;;  %v1776_v56 = vadd.f32 %v4632_v55, %v1663_v7  ;;  %v1702_v10 = vadd.f32 %v1701_v4, %v4773_v6 }
 0x202   : > { %v2073_v41 = vld [vmem:[#allocation2 + $0x78] ss:$2 sm:$0xff]  ;;  %v2097_v59 = vld [vmem:[#allocation2 + $0x79] ss:$2 sm:$0xff] }
 0x203   : > { %1984 = vst.msk [vmem:[#allocation2 + $0x91] sm:$0xff] %vm196_vm0, %v1952_v35  ;;  %v1853_v1 = vmul.f32 %v4712_v0, %v1776_v56  ;;  %v1815_v51 = vadd.f32 %v1814_v31, %v1702_v10  ;;  %v2086_v11 = vmax.f32 %v2063_v44, %v2073_v41 }
 0x205   : > { %v1889_v38 = vadd.f32 %v4721_v19, %v1853_v1  ;;  %v1866_v16 = vmul.f32 %v4712_v0, %v1815_v51  ;;  %v2110_v4 = vmax.f32 %v2086_v11, %v2097_v59 }
 0x206   : > { %v1552_v54 = vpop.f32.mrf.mxu0  ;;  %v1665_v39 = vpop.f32.mrf.mxu1 }
 0x207   : > { %v1921_v8 = vadd.f32 %v1889_v38, %v5314_v30  ;;  %v1666_v55 = vadd.f32 %v1665_v39, %v1552_v54  ;;  %v1902_v6 = vadd.f32 %v4721_v19, %v1866_v16  ;;  %v1820_v38 = vpop.f32.mrf.mxu2  ;;  %v2121_v54 = vld [vmem:[#allocation2 + $0x7a] ss:$2 sm:$0xff] }
 0x208   : > { %v1704_v61 = vpop.f32.mrf.mxu3  ;;  %v2134_v32 = vmax.f32 %v2110_v4, %v2121_v54 }
 0x209   : > { %v1953_v57 = vmax.f32 %v1921_v8, 0.0  ;;  %v1779_v43 = vadd.f32 %v4653_v14, %v1666_v55  ;;  %v1934_v31 = vadd.f32 %v1902_v6, %v5304_v26  ;;  %v1705_v3 = vadd.f32 %v1704_v61, %v4788_v60 }
 0x20b   : > { %1985 = vst.msk [vmem:[#allocation2 + $0x99] sm:$0xff] %vm196_vm0, %v1953_v57  ;;  %v1854_v24 = vmul.f32 %v4712_v0, %v1779_v43  ;;  %v1966_v7 = vmax.f32 %v1934_v31, 0.0  ;;  %v1818_v30 = vadd.f32 %v1817_v53, %v1705_v3 }
 0x20d   : > { %v1890_v2 = vadd.f32 %v4721_v19, %v1854_v24  ;;  %1998 = vst.msk [vmem:[#allocation2 + $0x139] sm:$0xff] %vm196_vm0, %v1966_v7  ;;  %v1867_v14 = vmul.f32 %v4712_v0, %v1818_v30 }
 0x20e   : > { %v1555_v35 = vpop.f32.mrf.mxu0  ;;  %v1668_v56 = vpop.f32.mrf.mxu1 }
 0x20f   : > { %v1922_v26 = vadd.f32 %v1890_v2, %v5315_v49  ;;  %v1669_v10 = vadd.f32 %v1668_v56, %v1555_v35  ;;  %v1903_v60 = vadd.f32 %v4721_v19, %v1867_v14 }
 0x210   : > { %v1707_v51 = vpop.f32.mrf.mxu3 }
 0x211   : > { %v1954_v1 = vmax.f32 %v1922_v26, 0.0  ;;  %v1782_v21 = vadd.f32 %v4671_v47, %v1669_v10  ;;  %v1935_v16 = vadd.f32 %v1903_v60, %v5306_v22  ;;  %v1708_v39 = vadd.f32 %v1707_v51, %v4810_v46 }
 0x212   : > { %v2145_v8 = vld [vmem:[#allocation2 + $0x90] ss:$2 sm:$0xff]  ;;  %v2169_v6 = vld [vmem:[#allocation2 + $0x91] ss:$2 sm:$0xff] }
 0x213   : > { %1986 = vst.msk [vmem:[#allocation2 + $0xa9] sm:$0xff] %vm196_vm0, %v1954_v1  ;;  %v1855_v41 = vmul.f32 %v4712_v0, %v1782_v21  ;;  %v1967_v49 = vmax.f32 %v1935_v16, 0.0  ;;  %v1821_v55 = vadd.f32 %v1820_v38, %v1708_v39  ;;  %v2158_v53 = vmax.f32 %v2134_v32, %v2145_v8  ;;  %v2193_v11 = vld [vmem:[#allocation2 + $0x92] ss:$2 sm:$0xff]  ;;  %v2028_v10 = vld [vmem:[#allocation2 + $0x91] ss:$2 sm:$0xff] }
 0x214   : > { %v2012_v26 = vld [vmem:[#allocation2 + $0x90] ss:$2 sm:$0xff] }
 0x215   : > { %v1891_v44 = vadd.f32 %v4721_v19, %v1855_v41  ;;  %1999 = vst.msk [vmem:[#allocation2 + $0x141] sm:$0xff] %vm196_vm0, %v1967_v49  ;;  %v1868_v22 = vmul.f32 %v4712_v0, %v1821_v55  ;;  %v2182_v46 = vmax.f32 %v2158_v53, %v2169_v6  ;;  %v2040_v51 = vmax.f32 %v2012_v26, %v2028_v10  ;;  %v2052_v39 = vld [vmem:[#allocation2 + $0x92] ss:$2 sm:$0xff] }
 0x216   : > { %v1558_v47 = vpop.f32.mrf.mxu0  ;;  %v1671_v57 = vpop.f32.mrf.mxu1 }
 0x217   : > { %v1923_v43 = vadd.f32 %v1891_v44, %v5317_v45  ;;  %v1672_v61 = vadd.f32 %v1671_v57, %v1558_v47  ;;  %v1904_v31 = vadd.f32 %v4721_v19, %v1868_v22  ;;  %v2206_v3 = vmax.f32 %v2182_v46, %v2193_v11 }
 0x218   : > { %v4912_v30 = vpop.f32.mrf.mxu3  ;;  %v2064_v8 = vmax.f32 %v2040_v51, %v2052_v39 }
 0x219   : > { %v1955_v24 = vmax.f32 %v1923_v43, 0.0  ;;  %v1785_v7 = vadd.f32 %v4687_v42, %v1672_v61  ;;  %v1936_v59 = vadd.f32 %v1904_v31, %v5316_v58  ;;  %2214 = vst.msk [vmem:[%s4833_s28 + $0x10] sm:$0xff] %vm196_vm0, %v2206_v3 }
 0x21b   : > { %1987 = vst.msk [vmem:[#allocation2 + $0xb1] sm:$0xff] %vm196_vm0, %v1955_v24  ;;  %v1856_v2 = vmul.f32 %v4712_v0, %v1785_v7  ;;  %v1968_v35 = vmax.f32 %v1936_v59, 0.0 }
 0x21d   : > { %v1892_v45 = vadd.f32 %v4721_v19, %v1856_v2  ;;  %2000 = vst.msk [vmem:[#allocation2 + $0x151] sm:$0xff] %vm196_vm0, %v1968_v35 }
 0x21e   : > { %v1561_v14 = vpop.f32.mrf.mxu0  ;;  %v1674_v56 = vpop.f32.mrf.mxu1 }
 0x21f   : > { %v1924_v4 = vadd.f32 %v1892_v45, %v5319_v5  ;;  %v1675_v42 = vadd.f32 %v1674_v56, %v1561_v14 }
 0x220   : > { %v4923_v1 = vpop.f32.mrf.mxu3 }
 0x221   : > { %v1956_v60 = vmax.f32 %v1924_v4, 0.0  ;;  %v1788_v58 = vadd.f32 %v4704_v37, %v1675_v42 }
 0x222   : > { %v2075_v32 = vld [vmem:[#allocation2 + $0xa8] ss:$2 sm:$0xff]  ;;  %v2099_v47 = vld [vmem:[#allocation2 + $0xa9] ss:$2 sm:$0xff] }
 0x223   : > { %1988 = vst.msk [vmem:[#allocation2 + $0xc1] sm:$0xff] %vm196_vm0, %v1956_v60  ;;  %v1857_v21 = vmul.f32 %v4712_v0, %v1788_v58  ;;  %v2087_v55 = vmax.f32 %v2064_v8, %v2075_v32 }
 0x225   : > { %v1893_v38 = vadd.f32 %v4721_v19, %v1857_v21  ;;  %v2111_v46 = vmax.f32 %v2087_v55, %v2099_v47 }
 0x226   : > { %v1564_v54 = vpop.f32.mrf.mxu0  ;;  %v1677_v16 = vpop.f32.mrf.mxu1 }
 0x227   : > { %v1925_v5 = vadd.f32 %v1893_v38, %v5321_v9  ;;  %v1678_v41 = vadd.f32 %v1677_v16, %v1564_v54 }
 0x229   : > { %v1957_v49 = vmax.f32 %v1925_v5, 0.0  ;;  %v1791_v37 = vadd.f32 %v4733_v23, %v1678_v41  ;;  %v4930_v53 = vpop.f32.mrf.mxu3  ;;  %v2123_v23 = vld [vmem:[#allocation2 + $0xaa] ss:$2 sm:$0xff]  ;;  %v1711_v5 = vadd.f32 %v4912_v30, %v4829_v12 }
 0x22a   : > { %v2135_v3 = vmax.f32 %v2111_v46, %v2123_v23 }
 0x22b   : > { %1989 = vst.msk [vmem:[#allocation2 + $0xc9] sm:$0xff] %vm196_vm0, %v1957_v49  ;;  %v1858_v44 = vmul.f32 %v4712_v0, %v1791_v37 }
 0x22d   : > { %v1894_v6 = vadd.f32 %v4721_v19, %v1858_v44 }
 0x22e   : > { %v1567_v22 = vpop.f32.mrf.mxu0  ;;  %v1680_v57 = vpop.f32.mrf.mxu1 }
 0x22f   : > { %v1926_v9 = vadd.f32 %v1894_v6, %v5253_v29  ;;  %v1681_v43 = vadd.f32 %v1680_v57, %v1567_v22 }
 0x231   : > { %v1958_v61 = vmax.f32 %v1926_v9, 0.0  ;;  %v1794_v11 = vadd.f32 %v4754_v34, %v1681_v43  ;;  %v4937_v31 = vpop.f32.mrf.mxu3  ;;  %v1714_v43 = vadd.f32 %v4923_v1, %v4850_v48 }
 0x232   : > { %v2147_v7 = vld [vmem:[#allocation2 + $0xc0] ss:$2 sm:$0xff]  ;;  %v2171_v45 = vld [vmem:[#allocation2 + $0xc1] ss:$2 sm:$0xff] }
 0x233   : > { %1990 = vst.msk [vmem:[#allocation2 + $0xd9] sm:$0xff] %vm196_vm0, %v1958_v61  ;;  %v1859_v24 = vmul.f32 %v4712_v0, %v1794_v11  ;;  %v2159_v59 = vmax.f32 %v2135_v3, %v2147_v7  ;;  %v2195_v4 = vld [vmem:[#allocation2 + $0xc2] ss:$2 sm:$0xff]  ;;  %v2030_v39 = vld [vmem:[#allocation2 + $0xc1] ss:$2 sm:$0xff]  ;;  %v5338_v11 = vld [vmem:[#allocation39_spill] sm:$0xff] }
 0x234   : > { %v2014_v16 = vld [vmem:[#allocation2 + $0xc0] ss:$2 sm:$0xff] }
 0x235   : > { %v1895_v2 = vadd.f32 %v4721_v19, %v1859_v24  ;;  %v2183_v14 = vmax.f32 %v2159_v59, %v2171_v45  ;;  %v2041_v49 = vmax.f32 %v2014_v16, %v2030_v39  ;;  %v2054_v6 = vld [vmem:[#allocation2 + $0xc2] ss:$2 sm:$0xff] }
 0x236   : > { %v1570_v35 = vpop.f32.mrf.mxu0  ;;  %v1683_v29 = vpop.f32.mrf.mxu1 }
 0x237   : > { %v1927_v56 = vadd.f32 %v1895_v2, %v5263_v28  ;;  %v1684_v34 = vadd.f32 %v1683_v29, %v1570_v35  ;;  %v2207_v42 = vmax.f32 %v2183_v14, %v2195_v4  ;;  %v2065_v46 = vmax.f32 %v2041_v49, %v2054_v6 }
 0x239   : > { %v1959_v26 = vmax.f32 %v1927_v56, 0.0  ;;  %v1797_v10 = vadd.f32 %v4775_v40, %v1684_v34  ;;  %2215 = vst.msk [vmem:[%s4833_s28 + $0x18] sm:$0xff] %vm196_vm0, %v2207_v42  ;;  %v1717_v42 = vadd.f32 %v4930_v53, %v4857_v36 }
 0x23a   : > { %v4948_v58 = vpop.f32.mrf.mxu3 }
 0x23b   : > { %1991 = vst.msk [vmem:[#allocation2 + $0xe1] sm:$0xff] %vm196_vm0, %v1959_v26  ;;  %v1860_v60 = vmul.f32 %v4712_v0, %v1797_v10  ;;  %v5339_v26 = vld [vmem:[#allocation42_spill] sm:$0xff] }
 0x23d   : > { %v1896_v21 = vadd.f32 %v4721_v19, %v1860_v60 }
 0x23e   : > { %v1573_v51 = vpop.f32.mrf.mxu0  ;;  %v1686_v38 = vpop.f32.mrf.mxu1 }
 0x23f   : > { %v1928_v28 = vadd.f32 %v1896_v21, %v5266_v62  ;;  %v1687_v54 = vadd.f32 %v1686_v38, %v1573_v51 }
 0x241   : > { %v1960_v32 = vmax.f32 %v1928_v28, 0.0  ;;  %v1800_v40 = vadd.f32 %v4796_v27, %v1687_v54 }
 0x242   : > { %v1823_v8 = vpop.f32.mrf.mxu3  ;;  %v2077_v22 = vld [vmem:[#allocation2 + $0xd8] ss:$2 sm:$0xff]  ;;  %v2101_v59 = vld [vmem:[#allocation2 + $0xd9] ss:$2 sm:$0xff] }
 0x243   : > { %1992 = vst.msk [vmem:[#allocation2 + $0xf1] sm:$0xff] %vm196_vm0, %v1960_v32  ;;  %v1861_v41 = vmul.f32 %v4712_v0, %v1800_v40  ;;  %v1824_v37 = vadd.f32 %v1823_v8, %v1711_v5  ;;  %v2088_v61 = vmax.f32 %v2065_v46, %v2077_v22  ;;  %v2125_v4 = vld [vmem:[#allocation2 + $0xda] ss:$2 sm:$0xff] }
 0x245   : > { %v1897_v55 = vadd.f32 %v4721_v19, %v1861_v41  ;;  %v1869_v62 = vmul.f32 %v4712_v0, %v1824_v37  ;;  %v2112_v48 = vmax.f32 %v2088_v61, %v2101_v59 }
 0x246   : > { %v1576_v44 = vpop.f32.mrf.mxu0  ;;  %v1689_v47 = vpop.f32.mrf.mxu1 }
 0x247   : > { %v1929_v27 = vadd.f32 %v1897_v55, %v5325_v52  ;;  %v1690_v57 = vadd.f32 %v1689_v47, %v1576_v44  ;;  %v1905_v12 = vadd.f32 %v4721_v19, %v1869_v62  ;;  %v2136_v60 = vmax.f32 %v2112_v48, %v2125_v4  ;;  %v5340_v62 = vld [vmem:[#allocation43_spill] sm:$0xff] }
 0x248   : > { %v1720_v44 = vadd.f32 %v4937_v31, %v4866_v17  ;;  %v5341_v17 = vld [vmem:[#allocation36_spill] sm:$0xff] }
 0x249   : > { %v1961_v30 = vmax.f32 %v1929_v27, 0.0  ;;  %v1803_v9 = vadd.f32 %v4820_v13, %v1690_v57  ;;  %v1937_v23 = vadd.f32 %v1905_v12, %v5338_v11 }
 0x24a   : > { %v1826_v24 = vpop.f32.mrf.mxu3 }
 0x24b   : > { %1993 = vst.msk [vmem:[#allocation2 + $0xf9] sm:$0xff] %vm196_vm0, %v1961_v30  ;;  %v1862_v3 = vmul.f32 %v4712_v0, %v1803_v9  ;;  %v1969_v7 = vmax.f32 %v1937_v23, 0.0  ;;  %v1827_v52 = vadd.f32 %v1826_v24, %v1714_v43  ;;  %v5342_v24 = vld [vmem:[#allocation48_spill] sm:$0xff] }
 0x24d   : > { %v1898_v2 = vadd.f32 %v4721_v19, %v1862_v3  ;;  %2001 = vst.msk [vmem:[#allocation2 + $0x159] sm:$0xff] %vm196_vm0, %v1969_v7  ;;  %v1870_v13 = vmul.f32 %v4712_v0, %v1827_v52  ;;  %v1723_v3 = vadd.f32 %v4948_v58, %v4875_v63 }
 0x24e   : > { %v1579_v35 = vpop.f32.mrf.mxu0  ;;  %v1692_v45 = vpop.f32.mrf.mxu1 }
 0x24f   : > { %v1930_v1 = vadd.f32 %v1898_v2, %v5280_v18  ;;  %v1693_v29 = vadd.f32 %v1692_v45, %v1579_v35  ;;  %v1906_v14 = vadd.f32 %v4721_v19, %v1870_v13 }
 0x251   : > { %v1962_v56 = vmax.f32 %v1930_v1, 0.0  ;;  %v1806_v34 = vadd.f32 %v4845_v15, %v1693_v29  ;;  %v1938_v10 = vadd.f32 %v1906_v14, %v5339_v26 }
 0x252   : > { %v1829_v51 = vpop.f32.mrf.mxu3  ;;  %v2149_v38 = vld [vmem:[#allocation2 + $0xf0] ss:$2 sm:$0xff]  ;;  %v2173_v39 = vld [vmem:[#allocation2 + $0xf1] ss:$2 sm:$0xff] }
 0x253   : > { %1994 = vst.msk [vmem:[#allocation2 + $0x109] sm:$0xff] %vm196_vm0, %v1962_v56  ;;  %v1863_v21 = vmul.f32 %v4712_v0, %v1806_v34  ;;  %v1970_v18 = vmax.f32 %v1938_v10, 0.0  ;;  %v1830_v28 = vadd.f32 %v1829_v51, %v1717_v42  ;;  %v2160_v54 = vmax.f32 %v2136_v60, %v2149_v38  ;;  %v2197_v41 = vld [vmem:[#allocation2 + $0xf2] ss:$2 sm:$0xff]  ;;  %v2032_v61 = vld [vmem:[#allocation2 + $0xf1] ss:$2 sm:$0xff] }
 0x254   : > { %v2016_v43 = vld [vmem:[#allocation2 + $0xf0] ss:$2 sm:$0xff]  ;;  %v2036_v59 = vld [vmem:[#allocation2 + $0x151] ss:$2 sm:$0xff] }
 0x255   : > { %v1899_v16 = vadd.f32 %v4721_v19, %v1863_v21  ;;  %2002 = vst.msk [vmem:[#allocation2 + $0x169] sm:$0xff] %vm196_vm0, %v1970_v18  ;;  %v1871_v36 = vmul.f32 %v4712_v0, %v1830_v28  ;;  %v2184_v32 = vmax.f32 %v2160_v54, %v2173_v39  ;;  %v2020_v52 = vld [vmem:[#allocation2 + $0x150] ss:$2 sm:$0xff]  ;;  %v2042_v13 = vmax.f32 %v2016_v43, %v2032_v61  ;;  %v2177_v43 = vld [vmem:[#allocation2 + $0x151] ss:$2 sm:$0xff] }
 0x256   : > { %v1582_v15 = vpop.f32.mrf.mxu0  ;;  %v1695_v53 = vpop.f32.mrf.mxu1  ;;  %v2044_v29 = vmax.f32 %v2020_v52, %v2036_v59  ;;  %v2056_v63 = vld [vmem:[#allocation2 + $0xf2] ss:$2 sm:$0xff] }
 0x257   : > { %v1931_v40 = vadd.f32 %v1899_v16, %v5286_v33  ;;  %v1696_v5 = vadd.f32 %v1695_v53, %v1582_v15  ;;  %v1907_v8 = vadd.f32 %v4721_v19, %v1871_v36  ;;  %v2208_v49 = vmax.f32 %v2184_v32, %v2197_v41  ;;  %v2060_v4 = vld [vmem:[#allocation2 + $0x152] ss:$2 sm:$0xff] }
 0x258   : > { %v2066_v56 = vmax.f32 %v2042_v13, %v2056_v63  ;;  %v2068_v10 = vmax.f32 %v2044_v29, %v2060_v4  ;;  %v5343_v21 = vld [vmem:[#allocation26_spill] sm:$0xff] }
 0x259   : > { %v1963_v37 = vmax.f32 %v1931_v40, 0.0  ;;  %v1809_v55 = vadd.f32 %v4859_v25, %v1696_v5  ;;  %v1939_v47 = vadd.f32 %v1907_v8, %v5340_v62  ;;  %2216 = vst.msk [vmem:[%s4833_s28 + $0x20] sm:$0xff] %vm196_vm0, %v2208_v49 }
 0x25a   : > { %v1832_v33 = vpop.f32.mrf.mxu3 }
 0x25b   : > { %1995 = vst.msk [vmem:[#allocation2 + $0x111] sm:$0xff] %vm196_vm0, %v1963_v37  ;;  %v1864_v6 = vmul.f32 %v4712_v0, %v1809_v55  ;;  %v1971_v22 = vmax.f32 %v1939_v47, 0.0  ;;  %v1833_v27 = vadd.f32 %v1832_v33, %v1720_v44  ;;  %v2081_v55 = vld [vmem:[#allocation2 + $0x138] ss:$2 sm:$0xff] }
 0x25d   : > { %v1900_v57 = vadd.f32 %v4721_v19, %v1864_v6  ;;  %2003 = vst.msk [vmem:[#allocation2 + $0x171] sm:$0xff] %vm196_vm0, %v1971_v22  ;;  %v1872_v25 = vmul.f32 %v4712_v0, %v1833_v27  ;;  %v2105_v22 = vld [vmem:[#allocation2 + $0x139] ss:$2 sm:$0xff] }
 0x25e   : > { %v1585_v46 = vpop.f32.mrf.mxu0  ;;  %v1698_v12 = vpop.f32.mrf.mxu1 }
 0x25f   : > { %v1932_v31 = vadd.f32 %v1900_v57, %v5341_v17  ;;  %v1699_v30 = vadd.f32 %v1698_v12, %v1585_v46  ;;  %v1908_v9 = vadd.f32 %v4721_v19, %v1872_v25  ;;  %v2129_v12 = vld [vmem:[#allocation2 + $0x13a] ss:$2 sm:$0xff] }
 0x261   : > { %v1964_v11 = vmax.f32 %v1932_v31, 0.0  ;;  %v1812_v23 = vadd.f32 %v4870_v20, %v1699_v30  ;;  %v1940_v7 = vadd.f32 %v1908_v9, %v5342_v24  ;;  %v2153_v30 = vld [vmem:[#allocation2 + $0x150] ss:$2 sm:$0xff] }
 0x262   : > { %v1835_v35 = vpop.f32.mrf.mxu3  ;;  %v2079_v58 = vld [vmem:[#allocation2 + $0x108] ss:$2 sm:$0xff]  ;;  %v2103_v28 = vld [vmem:[#allocation2 + $0x109] ss:$2 sm:$0xff] }
 0x263   : > { %1996 = vst.msk [vmem:[#allocation2 + $0x121] sm:$0xff] %vm196_vm0, %v1964_v11  ;;  %v1865_v2 = vmul.f32 %v4712_v0, %v1812_v23  ;;  %v1972_v45 = vmax.f32 %v1940_v7, 0.0  ;;  %v1836_v48 = vadd.f32 %v1835_v35, %v1723_v3  ;;  %v2089_v60 = vmax.f32 %v2066_v56, %v2079_v58  ;;  %v2127_v16 = vld [vmem:[#allocation2 + $0x10a] ss:$2 sm:$0xff] }
 0x264   : > { %v2083_v42 = vld [vmem:[#allocation2 + $0x168] ss:$2 sm:$0xff]  ;;  %v2107_v54 = vld [vmem:[#allocation2 + $0x169] ss:$2 sm:$0xff] }
 0x265   : > { %v1901_v1 = vadd.f32 %v4721_v19, %v1865_v2  ;;  %2004 = vst.msk [vmem:[#allocation2 + $0x181] sm:$0xff] %vm196_vm0, %v1972_v45  ;;  %v1873_v20 = vmul.f32 %v4712_v0, %v1836_v48  ;;  %v2091_v38 = vmax.f32 %v2068_v10, %v2083_v42  ;;  %v2113_v0 = vmax.f32 %v2089_v60, %v2103_v28  ;;  %v2131_v36 = vld [vmem:[#allocation2 + $0x16a] ss:$2 sm:$0xff] }
 0x266   : > { %v2201_v11 = vld [vmem:[#allocation2 + $0x152] ss:$2 sm:$0xff] }
 0x267   : > { %v1933_v14 = vadd.f32 %v1901_v1, %v5300_v50  ;;  %v1909_v34 = vadd.f32 %v4721_v19, %v1873_v20  ;;  %v2115_v50 = vmax.f32 %v2091_v38, %v2107_v54  ;;  %v2137_v39 = vmax.f32 %v2113_v0, %v2127_v16 }
 0x269   : > { %v1965_v26 = vmax.f32 %v1933_v14, 0.0  ;;  %v1941_v51 = vadd.f32 %v1909_v34, %v5343_v21  ;;  %v2139_v5 = vmax.f32 %v2115_v50, %v2131_v36 }
 0x26b   : > { %1997 = vst.msk [vmem:[#allocation2 + $0x129] sm:$0xff] %vm196_vm0, %v1965_v26  ;;  %v1973_v18 = vmax.f32 %v1941_v51, 0.0 }
 0x26d   : > { %2005 = vst.msk [vmem:[#allocation2 + $0x189] sm:$0xff] %vm196_vm0, %v1973_v18 }
 0x272   : > { %v2018_v15 = vld [vmem:[#allocation2 + $0x120] ss:$2 sm:$0xff]  ;;  %v2034_v19 = vld [vmem:[#allocation2 + $0x121] ss:$2 sm:$0xff] }
 0x273   : > { %v2043_v53 = vmax.f32 %v2018_v15, %v2034_v19  ;;  %v2151_v32 = vld [vmem:[#allocation2 + $0x120] ss:$2 sm:$0xff]  ;;  %v2175_v37 = vld [vmem:[#allocation2 + $0x121] ss:$2 sm:$0xff] }
 0x274   : > { %v2058_v40 = vld [vmem:[#allocation2 + $0x122] ss:$2 sm:$0xff]  ;;  %v2161_v41 = vmax.f32 %v2137_v39, %v2151_v32  ;;  %v2179_v6 = vld [vmem:[#allocation2 + $0x181] ss:$2 sm:$0xff] }
 0x275   : > { %v2067_v8 = vmax.f32 %v2043_v53, %v2058_v40  ;;  %v2155_v49 = vld [vmem:[#allocation2 + $0x180] ss:$2 sm:$0xff] }
 0x276   : > { %v2163_v44 = vmax.f32 %v2139_v5, %v2155_v49  ;;  %v2185_v62 = vmax.f32 %v2161_v41, %v2175_v37  ;;  %v2199_v33 = vld [vmem:[#allocation2 + $0x122] ss:$2 sm:$0xff] }
 0x277   : > { %v2090_v47 = vmax.f32 %v2067_v8, %v2081_v55  ;;  %v2203_v25 = vld [vmem:[#allocation2 + $0x182] ss:$2 sm:$0xff] }
 0x278   : > { %v2187_v27 = vmax.f32 %v2163_v44, %v2179_v6  ;;  %v2209_v57 = vmax.f32 %v2185_v62, %v2199_v33 }
 0x279   : > { %v2114_v46 = vmax.f32 %v2090_v47, %v2105_v22 }
 0x27a   : > { %v2211_v17 = vmax.f32 %v2187_v27, %v2203_v25  ;;  %2217 = vst.msk [vmem:[%s4833_s28 + $0x28] sm:$0xff] %vm196_vm0, %v2209_v57 }
 0x27b   : > { %v2138_v31 = vmax.f32 %v2114_v46, %v2129_v12 }
 0x27c   : > { %2219 = vst.msk [vmem:[%s4833_s28 + $0x38] sm:$0xff] %vm196_vm0, %v2211_v17 }
 0x27d   : > { %v2162_v9 = vmax.f32 %v2138_v31, %v2153_v30 }
 0x27f   : > { %v2186_v61 = vmax.f32 %v2162_v9, %v2177_v43 }
 0x281   : > { %v2210_v23 = vmax.f32 %v2186_v61, %v2201_v11 }
 0x283   : > { %2218 = vst.msk [vmem:[%s4833_s28 + $0x30] sm:$0xff] %vm196_vm0, %v2210_v23 }
 0x284   : > { %2996 = shalt.err (!%p2993_p3)
}
 0x285   : > { %s3037_s14 = smov 128   ;;  %s3038_s20 = smov 8  }
 0x286   : > { %2426 = dma.vmem_to_hbm [thread:$0]  (%p3102_p5), %s2234_s19, 1024, %s2236_s8, %s2221_s9, %s3037_s14, %s3037_s14, %s3038_s20  }
 0x287 PF: > { %p2432_p4 = scmp.ge.s32.totalorder %s3031_s18, 2  ;;  %s2250_s23 = sand.u32 1, %s3019_s15  }
 0x288   : > { %s2251_s28 = scalar_lea.sflag [#allocation4], %s2250_s23 }
 0x289   : > { %p2429_p7 = pnand %p2432_p4, %p3106_p6 }
 0x28b   : > { %p2430_p8 = pneg %p2429_p7 }
 0x28d   : > { %3014 = dma.done.wait (%p2430_p8), %s2251_s28, 1024  }
 0x28e   : > { %3016 = vsyncadd (%p2430_p8), %s2251_s28, 4294966272  ;;  %p14_p9 = scmp.ge.s32.totalorder %s3089_s21, 4   ;;  %s5344_s15 = smov %s3023_s16 }
 0x28f   : > { %s5345_s16 = smov %s3027_s17  ;;  %s5346_s17 = smov %s3100_s24 }
 0x290   : > { %s5347_s18 = smov %s3089_s21  ;;  %16 = sbr.rel (!%p14_p9) target bundleno = 3 (0x3), region = 143 }
 0x295   :  { %2257 = vsyncpa [#allocation4], 1 }
 0x296   :  { %2259 = vsyncpa [#allocation4 + $0x1], 1 }

</bundles_post_ra>
